<compile_context>
chip_gen: v7x
topology: tpu7x:2x2x1
jax: 0.10.0
libtpu: 0.0.40
codegen_flags: <defaults>
</compile_context>

<pallas_src>
from functools import partial

import jax
import jax.numpy as jnp
from jax.experimental import pallas as pl
from jax.experimental.pallas import tpu as pltpu

EPS = 1e-5  # PyTorch InstanceNorm2d default (affine=False, no running stats)


def _resnet_block_kernel(x_ref, w1_ref, w2_ref, o_ref, *, H, W, WP):
    """Fused ResNet block for one batch element.

    x_ref  : (1, H, W, C)  input tile, f32 (NHWC; C=256 on the lane axis)
    w1_ref : (3, 3, C, C)  conv1 weights, HWIO, bf16
    w2_ref : (3, 3, C, C)  conv2 weights, HWIO, bf16
    o_ref  : (1, H, W, C)  output tile, f32
    """
    C = x_ref.shape[-1]
    x = x_ref[0]                       # (H, W, C) f32
    n_rows = H + 3                     # H + 2 reflection rows + 1 overrun row
    L = (H + 2) * WP                   # rows needed by each dx-shifted view

    def conv3x3_in(src, w_ref, relu):
        # --- ReflectionPad2d(1), built in bf16 (single cast per conv) -------
        # padded col 0 = src col 1, cols 1..W = src, col W+1 = src col W-2,
        # cols >= W+2 are zero filler so the flatten below stays tile-aligned.
        sb = src.astype(jnp.bfloat16)                               # one cast
        pieces = [sb[:, 1:2, :], sb, sb[:, W - 2:W - 1, :]]
        if WP > W + 2:
            pieces.append(jnp.zeros((H, WP - (W + 2), C), jnp.bfloat16))
        rows = jnp.concatenate(pieces, axis=1)                      # (H, WP, C)
        padded = jnp.concatenate(
            [rows[1:2], rows, rows[H - 2:H - 1],
             jnp.zeros((1, WP, C), jnp.bfloat16)], axis=0)          # (H+3, WP, C)
        flat = padded.reshape(n_rows * WP, C)     # free reshape (WP % 16 == 0)

        # --- dx shifts applied once to the whole buffer ----------------------
        # shifted[dx][i] = flat[i + dx]; only dx=1,2 need a sublane relayout
        # (2 per conv instead of 6 misaligned per-slab slices).
        # TODO(synk): pltpu.roll(flat, shift=n_rows*WP - dx, axis=0) would move
        #             these two shifts onto the otherwise-idle XLU slot.
        shifted = [flat[0:L], flat[1:L + 1], flat[2:L + 2]]

        # --- conv3x3 = 9 aligned (H*WP, C) @ (C, C) MXU matmuls --------------
        # out[y*WP + x] = sum_{dy,dx} flat[(y+dy)*WP + x + dx] @ w[dy, dx]
        # dy*WP is a multiple of 16 -> every slab below is a tile-aligned view.
        # (columns x >= W of each WP-wide row group are garbage, dropped below;
        #  the trailing zero row absorbs the dx=1/2 shift overrun.)
        acc = None
        for dy in range(3):
            for dx in range(3):
                slab = shifted[dx][dy * WP:dy * WP + H * WP, :]
                d = jnp.dot(slab, w_ref[dy, dx],
                            preferred_element_type=jnp.float32)
                acc = d if acc is None else acc + d

        # --- InstanceNorm2d over the valid HxW window (single-pass stats) ---
        a = acc.reshape(H, WP, C)[:, :W, :]                         # (H, W, C)
        inv_n = 1.0 / (H * W)
        mean = jnp.sum(a, axis=(0, 1), keepdims=True) * inv_n
        ex2 = jnp.sum(a * a, axis=(0, 1), keepdims=True) * inv_n
        y = (a - mean) * jax.lax.rsqrt(ex2 - mean * mean + EPS)
        return jnp.maximum(y, 0.0) if relu else y

    # conv1 + IN + ReLU   (conv biases omitted: exactly cancelled by IN's mean)
    h = conv3x3_in(x, w1_ref, relu=True)
    # conv2 + IN + residual add
    o_ref[0] = (x + conv3x3_in(h, w2_ref, relu=False)).astype(o_ref.dtype)


def resnet_block_forward(x_nchw, params):
    """Full ResNetBlock forward.  Input/output in PyTorch NCHW layout."""
    x = jnp.transpose(x_nchw, (0, 2, 3, 1))         # NCHW -> NHWC (C on lanes)
    n, H, W, C = x.shape
    WP = ((W + 2 + 15) // 16) * 16                  # padded width, 16-aligned (bf16)

    w1 = params["w1"].astype(jnp.bfloat16)          # bf16 MXU weights (less DMA)
    w2 = params["w2"].astype(jnp.bfloat16)
    # Conv biases intentionally not passed: bias before an affine-free
    # per-sample InstanceNorm is a mathematical no-op.

    kernel = partial(_resnet_block_kernel, H=H, W=W, WP=WP)

    out = pl.pallas_call(
        kernel,
        out_shape=jax.ShapeDtypeStruct((n, H, W, C), jnp.float32),
        grid=(n,),
        in_specs=[
            pl.BlockSpec((1, H, W, C), lambda i: (i, 0, 0, 0)),
            pl.BlockSpec((3, 3, C, C), lambda i: (0, 0, 0, 0)),
            pl.BlockSpec((3, 3, C, C), lambda i: (0, 0, 0, 0)),
        ],
        out_specs=pl.BlockSpec((1, H, W, C), lambda i: (i, 0, 0, 0)),
        compiler_params=pltpu.CompilerParams(
            dimension_semantics=("parallel",),
            vmem_limit_bytes=56 * 1024 * 1024,      # > 16/32 MiB defaults, < v7x 64 MiB
        ),
    )(x, w1, w2)
    return jnp.transpose(out, (0, 3, 1, 2))          # NHWC -> NCHW


def _reference_forward(x_nchw, params):
    """Pure-JAX f32 reference (lax.conv, with bias) for correctness checking."""
    x = jnp.transpose(x_nchw, (0, 2, 3, 1))

    def conv(y, w, b):
        yp = jnp.pad(y, ((0, 0), (1, 1), (1, 1), (0, 0)), mode="reflect")
        z = jax.lax.conv_general_dilated(
            yp, w, window_strides=(1, 1), padding="VALID",
            dimension_numbers=("NHWC", "HWIO", "NHWC"))
        return z + b.reshape(1, 1, 1, -1)

    def inorm(y):
        m = jnp.mean(y, axis=(1, 2), keepdims=True)
        v = jnp.mean((y - m) ** 2, axis=(1, 2), keepdims=True)
        return (y - m) * jax.lax.rsqrt(v + EPS)

    h = jnp.maximum(inorm(conv(x, params["w1"], params["b1"])), 0.0)
    out = x + inorm(conv(h, params["w2"], params["b2"]))
    return jnp.transpose(out, (0, 3, 1, 2))


if __name__ == "__main__":
    N, C, H, W = 2, 256, 8, 8   # channels fixed at 256 by the module

    key = jax.random.PRNGKey(0)
    kx, kw1, kb1, kw2, kb2 = jax.random.split(key, 5)

    x = jax.random.normal(kx, (N, C, H, W), dtype=jnp.float32)
    params = {
        # HWIO conv weights (PyTorch OIHW weights transposed with (2, 3, 1, 0))
        "w1": jax.random.normal(kw1, (3, 3, C, C), dtype=jnp.float32) * 0.05,
        "b1": jax.random.normal(kb1, (C,), dtype=jnp.float32) * 0.05,
        "w2": jax.random.normal(kw2, (3, 3, C, C), dtype=jnp.float32) * 0.05,
        "b2": jax.random.normal(kb2, (C,), dtype=jnp.float32) * 0.05,
    }

    out = jax.block_until_ready(resnet_block_forward(x, params))
    ref = jax.block_until_ready(_reference_forward(x, params))

    assert out.shape == (N, C, H, W) and out.dtype == jnp.float32
    max_err = float(jnp.max(jnp.abs(out - ref)))
    # Tolerance reflects bf16 MXU operands (f32 accumulation) vs. all-f32 ref.
    assert jnp.allclose(out, ref, atol=3e-2, rtol=3e-2), max_err
    print("KERNEL_OK")
</pallas_src>

<mosaic_0001>
module attributes {stable_mosaic.version = 11 : i64} {
  func.func @_resnet_block_kernel(%arg0: i32, %arg1: memref<1x8x8x256xf32, #tpu.memory_space<vmem>>, %arg2: memref<3x3x256x256xbf16, #tpu.memory_space<vmem>>, %arg3: memref<3x3x256x256xbf16, #tpu.memory_space<vmem>>, %arg4: memref<1x8x8x256xf32, #tpu.memory_space<vmem>>) attributes {dimension_semantics = [#tpu.dimension_semantics<parallel>], iteration_bounds = array<i64: 2>, scalar_prefetch = 0 : i64, scratch_operands = 0 : i64, tpu.core_type = #tpu.core_type<tc>, window_params = [{transform_indices = @transform_0, window_bounds = array<i64: 1, 8, 8, 256>}, {pipeline_mode = #tpu.pipeline_mode<synchronous>, transform_indices = @transform_1, window_bounds = array<i64: 3, 3, 256, 256>}, {pipeline_mode = #tpu.pipeline_mode<synchronous>, transform_indices = @transform_2, window_bounds = array<i64: 3, 3, 256, 256>}, {transform_indices = @transform_3, window_bounds = array<i64: 1, 8, 8, 256>}]} {
    %c0 = arith.constant 0 : index
    %c0_0 = arith.constant 0 : index
    %c0_1 = arith.constant 0 : index
    %c0_2 = arith.constant 0 : index
    %0 = vector.load %arg1[%c0, %c0_0, %c0_1, %c0_2] : memref<1x8x8x256xf32, #tpu.memory_space<vmem>>, vector<1x8x8x256xf32>
    %1 = vector.shape_cast %0 : vector<1x8x8x256xf32> to vector<8x8x256xf32>
    %2 = arith.truncf %1 : vector<8x8x256xf32> to vector<8x8x256xbf16>
    %3 = vector.extract_strided_slice %2 {offsets = [0, 1, 0], sizes = [8, 1, 256], strides = [1, 1, 1]} : vector<8x8x256xbf16> to vector<8x1x256xbf16>
    %4 = vector.extract_strided_slice %2 {offsets = [0, 6, 0], sizes = [8, 1, 256], strides = [1, 1, 1]} : vector<8x8x256xbf16> to vector<8x1x256xbf16>
    %cst = arith.constant 0.000000e+00 : bf16
    %5 = vector.broadcast %cst : bf16 to vector<8x6x256xbf16>
    %6 = tpu.concatenate %3, %2, %4, %5 in 1 : vector<8x1x256xbf16>, vector<8x8x256xbf16>, vector<8x1x256xbf16>, vector<8x6x256xbf16> -> vector<8x16x256xbf16>
    %7 = vector.extract_strided_slice %6 {offsets = [1, 0, 0], sizes = [1, 16, 256], strides = [1, 1, 1]} : vector<8x16x256xbf16> to vector<1x16x256xbf16>
    %8 = vector.extract_strided_slice %6 {offsets = [6, 0, 0], sizes = [1, 16, 256], strides = [1, 1, 1]} : vector<8x16x256xbf16> to vector<1x16x256xbf16>
    %cst_3 = arith.constant 0.000000e+00 : bf16
    %9 = vector.broadcast %cst_3 : bf16 to vector<1x16x256xbf16>
    %10 = tpu.concatenate %7, %6, %8, %9 in 0 : vector<1x16x256xbf16>, vector<8x16x256xbf16>, vector<1x16x256xbf16>, vector<1x16x256xbf16> -> vector<11x16x256xbf16>
    %11 = vector.shape_cast %10 : vector<11x16x256xbf16> to vector<176x256xbf16>
    %12 = vector.extract_strided_slice %11 {offsets = [0, 0], sizes = [160, 256], strides = [1, 1]} : vector<176x256xbf16> to vector<160x256xbf16>
    %13 = vector.extract_strided_slice %11 {offsets = [1, 0], sizes = [160, 256], strides = [1, 1]} : vector<176x256xbf16> to vector<160x256xbf16>
    %14 = vector.extract_strided_slice %11 {offsets = [2, 0], sizes = [160, 256], strides = [1, 1]} : vector<176x256xbf16> to vector<160x256xbf16>
    %15 = vector.extract_strided_slice %12 {offsets = [0, 0], sizes = [128, 256], strides = [1, 1]} : vector<160x256xbf16> to vector<128x256xbf16>
    %c0_4 = arith.constant 0 : index
    %c0_5 = arith.constant 0 : index
    %c0_6 = arith.constant 0 : index
    %c0_7 = arith.constant 0 : index
    %16 = vector.load %arg2[%c0_4, %c0_5, %c0_6, %c0_7] : memref<3x3x256x256xbf16, #tpu.memory_space<vmem>>, vector<1x1x256x256xbf16>
    %17 = vector.shape_cast %16 : vector<1x1x256x256xbf16> to vector<256x256xbf16>
    %cst_8 = arith.constant dense<0.000000e+00> : vector<128x256xf32>
    %18 = tpu.matmul %15, %17, %cst_8 {dimension_numbers = #tpu.dot_dimension_numbers<[1], [0], [0], [1], [0, 0, 1, 1], [], []>} : vector<128x256xbf16>, vector<256x256xbf16>, vector<128x256xf32> -> vector<128x256xf32>
    %19 = vector.extract_strided_slice %13 {offsets = [0, 0], sizes = [128, 256], strides = [1, 1]} : vector<160x256xbf16> to vector<128x256xbf16>
    %c0_9 = arith.constant 0 : index
    %c1 = arith.constant 1 : index
    %c0_10 = arith.constant 0 : index
    %c0_11 = arith.constant 0 : index
    %20 = vector.load %arg2[%c0_9, %c1, %c0_10, %c0_11] : memref<3x3x256x256xbf16, #tpu.memory_space<vmem>>, vector<1x1x256x256xbf16>
    %21 = vector.shape_cast %20 : vector<1x1x256x256xbf16> to vector<256x256xbf16>
    %cst_12 = arith.constant dense<0.000000e+00> : vector<128x256xf32>
    %22 = tpu.matmul %19, %21, %cst_12 {dimension_numbers = #tpu.dot_dimension_numbers<[1], [0], [0], [1], [0, 0, 1, 1], [], []>} : vector<128x256xbf16>, vector<256x256xbf16>, vector<128x256xf32> -> vector<128x256xf32>
    %23 = arith.addf %18, %22 : vector<128x256xf32>
    %24 = vector.extract_strided_slice %14 {offsets = [0, 0], sizes = [128, 256], strides = [1, 1]} : vector<160x256xbf16> to vector<128x256xbf16>
    %c0_13 = arith.constant 0 : index
    %c2 = arith.constant 2 : index
    %c0_14 = arith.constant 0 : index
    %c0_15 = arith.constant 0 : index
    %25 = vector.load %arg2[%c0_13, %c2, %c0_14, %c0_15] : memref<3x3x256x256xbf16, #tpu.memory_space<vmem>>, vector<1x1x256x256xbf16>
    %26 = vector.shape_cast %25 : vector<1x1x256x256xbf16> to vector<256x256xbf16>
    %cst_16 = arith.constant dense<0.000000e+00> : vector<128x256xf32>
    %27 = tpu.matmul %24, %26, %cst_16 {dimension_numbers = #tpu.dot_dimension_numbers<[1], [0], [0], [1], [0, 0, 1, 1], [], []>} : vector<128x256xbf16>, vector<256x256xbf16>, vector<128x256xf32> -> vector<128x256xf32>
    %28 = arith.addf %23, %27 : vector<128x256xf32>
    %29 = vector.extract_strided_slice %12 {offsets = [16, 0], sizes = [128, 256], strides = [1, 1]} : vector<160x256xbf16> to vector<128x256xbf16>
    %c1_17 = arith.constant 1 : index
    %c0_18 = arith.constant 0 : index
    %c0_19 = arith.constant 0 : index
    %c0_20 = arith.constant 0 : index
    %30 = vector.load %arg2[%c1_17, %c0_18, %c0_19, %c0_20] : memref<3x3x256x256xbf16, #tpu.memory_space<vmem>>, vector<1x1x256x256xbf16>
    %31 = vector.shape_cast %30 : vector<1x1x256x256xbf16> to vector<256x256xbf16>
    %cst_21 = arith.constant dense<0.000000e+00> : vector<128x256xf32>
    %32 = tpu.matmul %29, %31, %cst_21 {dimension_numbers = #tpu.dot_dimension_numbers<[1], [0], [0], [1], [0, 0, 1, 1], [], []>} : vector<128x256xbf16>, vector<256x256xbf16>, vector<128x256xf32> -> vector<128x256xf32>
    %33 = arith.addf %28, %32 : vector<128x256xf32>
    %34 = vector.extract_strided_slice %13 {offsets = [16, 0], sizes = [128, 256], strides = [1, 1]} : vector<160x256xbf16> to vector<128x256xbf16>
    %c1_22 = arith.constant 1 : index
    %c1_23 = arith.constant 1 : index
    %c0_24 = arith.constant 0 : index
    %c0_25 = arith.constant 0 : index
    %35 = vector.load %arg2[%c1_22, %c1_23, %c0_24, %c0_25] : memref<3x3x256x256xbf16, #tpu.memory_space<vmem>>, vector<1x1x256x256xbf16>
    %36 = vector.shape_cast %35 : vector<1x1x256x256xbf16> to vector<256x256xbf16>
    %cst_26 = arith.constant dense<0.000000e+00> : vector<128x256xf32>
    %37 = tpu.matmul %34, %36, %cst_26 {dimension_numbers = #tpu.dot_dimension_numbers<[1], [0], [0], [1], [0, 0, 1, 1], [], []>} : vector<128x256xbf16>, vector<256x256xbf16>, vector<128x256xf32> -> vector<128x256xf32>
    %38 = arith.addf %33, %37 : vector<128x256xf32>
    %39 = vector.extract_strided_slice %14 {offsets = [16, 0], sizes = [128, 256], strides = [1, 1]} : vector<160x256xbf16> to vector<128x256xbf16>
    %c1_27 = arith.constant 1 : index
    %c2_28 = arith.constant 2 : index
    %c0_29 = arith.constant 0 : index
    %c0_30 = arith.constant 0 : index
    %40 = vector.load %arg2[%c1_27, %c2_28, %c0_29, %c0_30] : memref<3x3x256x256xbf16, #tpu.memory_space<vmem>>, vector<1x1x256x256xbf16>
    %41 = vector.shape_cast %40 : vector<1x1x256x256xbf16> to vector<256x256xbf16>
    %cst_31 = arith.constant dense<0.000000e+00> : vector<128x256xf32>
    %42 = tpu.matmul %39, %41, %cst_31 {dimension_numbers = #tpu.dot_dimension_numbers<[1], [0], [0], [1], [0, 0, 1, 1], [], []>} : vector<128x256xbf16>, vector<256x256xbf16>, vector<128x256xf32> -> vector<128x256xf32>
    %43 = arith.addf %38, %42 : vector<128x256xf32>
    %44 = vector.extract_strided_slice %12 {offsets = [32, 0], sizes = [128, 256], strides = [1, 1]} : vector<160x256xbf16> to vector<128x256xbf16>
    %c2_32 = arith.constant 2 : index
    %c0_33 = arith.constant 0 : index
    %c0_34 = arith.constant 0 : index
    %c0_35 = arith.constant 0 : index
    %45 = vector.load %arg2[%c2_32, %c0_33, %c0_34, %c0_35] : memref<3x3x256x256xbf16, #tpu.memory_space<vmem>>, vector<1x1x256x256xbf16>
    %46 = vector.shape_cast %45 : vector<1x1x256x256xbf16> to vector<256x256xbf16>
    %cst_36 = arith.constant dense<0.000000e+00> : vector<128x256xf32>
    %47 = tpu.matmul %44, %46, %cst_36 {dimension_numbers = #tpu.dot_dimension_numbers<[1], [0], [0], [1], [0, 0, 1, 1], [], []>} : vector<128x256xbf16>, vector<256x256xbf16>, vector<128x256xf32> -> vector<128x256xf32>
    %48 = arith.addf %43, %47 : vector<128x256xf32>
    %49 = vector.extract_strided_slice %13 {offsets = [32, 0], sizes = [128, 256], strides = [1, 1]} : vector<160x256xbf16> to vector<128x256xbf16>
    %c2_37 = arith.constant 2 : index
    %c1_38 = arith.constant 1 : index
    %c0_39 = arith.constant 0 : index
    %c0_40 = arith.constant 0 : index
    %50 = vector.load %arg2[%c2_37, %c1_38, %c0_39, %c0_40] : memref<3x3x256x256xbf16, #tpu.memory_space<vmem>>, vector<1x1x256x256xbf16>
    %51 = vector.shape_cast %50 : vector<1x1x256x256xbf16> to vector<256x256xbf16>
    %cst_41 = arith.constant dense<0.000000e+00> : vector<128x256xf32>
    %52 = tpu.matmul %49, %51, %cst_41 {dimension_numbers = #tpu.dot_dimension_numbers<[1], [0], [0], [1], [0, 0, 1, 1], [], []>} : vector<128x256xbf16>, vector<256x256xbf16>, vector<128x256xf32> -> vector<128x256xf32>
    %53 = arith.addf %48, %52 : vector<128x256xf32>
    %54 = vector.extract_strided_slice %14 {offsets = [32, 0], sizes = [128, 256], strides = [1, 1]} : vector<160x256xbf16> to vector<128x256xbf16>
    %c2_42 = arith.constant 2 : index
    %c2_43 = arith.constant 2 : index
    %c0_44 = arith.constant 0 : index
    %c0_45 = arith.constant 0 : index
    %55 = vector.load %arg2[%c2_42, %c2_43, %c0_44, %c0_45] : memref<3x3x256x256xbf16, #tpu.memory_space<vmem>>, vector<1x1x256x256xbf16>
    %56 = vector.shape_cast %55 : vector<1x1x256x256xbf16> to vector<256x256xbf16>
    %cst_46 = arith.constant dense<0.000000e+00> : vector<128x256xf32>
    %57 = tpu.matmul %54, %56, %cst_46 {dimension_numbers = #tpu.dot_dimension_numbers<[1], [0], [0], [1], [0, 0, 1, 1], [], []>} : vector<128x256xbf16>, vector<256x256xbf16>, vector<128x256xf32> -> vector<128x256xf32>
    %58 = arith.addf %53, %57 : vector<128x256xf32>
    %59 = vector.shape_cast %58 : vector<128x256xf32> to vector<8x16x256xf32>
    %60 = vector.extract_strided_slice %59 {offsets = [0, 0, 0], sizes = [8, 8, 256], strides = [1, 1, 1]} : vector<8x16x256xf32> to vector<8x8x256xf32>
    %cst_47 = arith.constant dense<0.000000e+00> : vector<256xf32>
    %61 = vector.multi_reduction <add>, %60, %cst_47 [0, 1] : vector<8x8x256xf32> to vector<256xf32>
    %62 = vector.shape_cast %61 : vector<256xf32> to vector<1x1x256xf32>
    %cst_48 = arith.constant 1.562500e-02 : f32
    %63 = vector.broadcast %cst_48 : f32 to vector<1x1x256xf32>
    %64 = arith.mulf %62, %63 : vector<1x1x256xf32>
    %65 = arith.mulf %60, %60 : vector<8x8x256xf32>
    %cst_49 = arith.constant dense<0.000000e+00> : vector<256xf32>
    %66 = vector.multi_reduction <add>, %65, %cst_49 [0, 1] : vector<8x8x256xf32> to vector<256xf32>
    %67 = vector.shape_cast %66 : vector<256xf32> to vector<1x1x256xf32>
    %cst_50 = arith.constant 1.562500e-02 : f32
    %68 = vector.broadcast %cst_50 : f32 to vector<1x1x256xf32>
    %69 = arith.mulf %67, %68 : vector<1x1x256xf32>
    %70 = vector.broadcast %64 : vector<1x1x256xf32> to vector<8x8x256xf32>
    %71 = arith.subf %60, %70 : vector<8x8x256xf32>
    %72 = arith.mulf %64, %64 : vector<1x1x256xf32>
    %73 = arith.subf %69, %72 : vector<1x1x256xf32>
    %cst_51 = arith.constant 9.99999974E-6 : f32
    %74 = vector.broadcast %cst_51 : f32 to vector<1x1x256xf32>
    %75 = arith.addf %73, %74 : vector<1x1x256xf32>
    %76 = math.rsqrt %75 : vector<1x1x256xf32>
    %77 = vector.broadcast %76 : vector<1x1x256xf32> to vector<8x8x256xf32>
    %78 = arith.mulf %71, %77 : vector<8x8x256xf32>
    %cst_52 = arith.constant 0.000000e+00 : f32
    %79 = vector.broadcast %cst_52 : f32 to vector<8x8x256xf32>
    %80 = arith.maximumf %78, %79 : vector<8x8x256xf32>
    %81 = arith.truncf %80 : vector<8x8x256xf32> to vector<8x8x256xbf16>
    %82 = vector.extract_strided_slice %81 {offsets = [0, 1, 0], sizes = [8, 1, 256], strides = [1, 1, 1]} : vector<8x8x256xbf16> to vector<8x1x256xbf16>
    %83 = vector.extract_strided_slice %81 {offsets = [0, 6, 0], sizes = [8, 1, 256], strides = [1, 1, 1]} : vector<8x8x256xbf16> to vector<8x1x256xbf16>
    %cst_53 = arith.constant 0.000000e+00 : bf16
    %84 = vector.broadcast %cst_53 : bf16 to vector<8x6x256xbf16>
    %85 = tpu.concatenate %82, %81, %83, %84 in 1 : vector<8x1x256xbf16>, vector<8x8x256xbf16>, vector<8x1x256xbf16>, vector<8x6x256xbf16> -> vector<8x16x256xbf16>
    %86 = vector.extract_strided_slice %85 {offsets = [1, 0, 0], sizes = [1, 16, 256], strides = [1, 1, 1]} : vector<8x16x256xbf16> to vector<1x16x256xbf16>
    %87 = vector.extract_strided_slice %85 {offsets = [6, 0, 0], sizes = [1, 16, 256], strides = [1, 1, 1]} : vector<8x16x256xbf16> to vector<1x16x256xbf16>
    %cst_54 = arith.constant 0.000000e+00 : bf16
    %88 = vector.broadcast %cst_54 : bf16 to vector<1x16x256xbf16>
    %89 = tpu.concatenate %86, %85, %87, %88 in 0 : vector<1x16x256xbf16>, vector<8x16x256xbf16>, vector<1x16x256xbf16>, vector<1x16x256xbf16> -> vector<11x16x256xbf16>
    %90 = vector.shape_cast %89 : vector<11x16x256xbf16> to vector<176x256xbf16>
    %91 = vector.extract_strided_slice %90 {offsets = [0, 0], sizes = [160, 256], strides = [1, 1]} : vector<176x256xbf16> to vector<160x256xbf16>
    %92 = vector.extract_strided_slice %90 {offsets = [1, 0], sizes = [160, 256], strides = [1, 1]} : vector<176x256xbf16> to vector<160x256xbf16>
    %93 = vector.extract_strided_slice %90 {offsets = [2, 0], sizes = [160, 256], strides = [1, 1]} : vector<176x256xbf16> to vector<160x256xbf16>
    %94 = vector.extract_strided_slice %91 {offsets = [0, 0], sizes = [128, 256], strides = [1, 1]} : vector<160x256xbf16> to vector<128x256xbf16>
    %c0_55 = arith.constant 0 : index
    %c0_56 = arith.constant 0 : index
    %c0_57 = arith.constant 0 : index
    %c0_58 = arith.constant 0 : index
    %95 = vector.load %arg3[%c0_55, %c0_56, %c0_57, %c0_58] : memref<3x3x256x256xbf16, #tpu.memory_space<vmem>>, vector<1x1x256x256xbf16>
    %96 = vector.shape_cast %95 : vector<1x1x256x256xbf16> to vector<256x256xbf16>
    %cst_59 = arith.constant dense<0.000000e+00> : vector<128x256xf32>
    %97 = tpu.matmul %94, %96, %cst_59 {dimension_numbers = #tpu.dot_dimension_numbers<[1], [0], [0], [1], [0, 0, 1, 1], [], []>} : vector<128x256xbf16>, vector<256x256xbf16>, vector<128x256xf32> -> vector<128x256xf32>
    %98 = vector.extract_strided_slice %92 {offsets = [0, 0], sizes = [128, 256], strides = [1, 1]} : vector<160x256xbf16> to vector<128x256xbf16>
    %c0_60 = arith.constant 0 : index
    %c1_61 = arith.constant 1 : index
    %c0_62 = arith.constant 0 : index
    %c0_63 = arith.constant 0 : index
    %99 = vector.load %arg3[%c0_60, %c1_61, %c0_62, %c0_63] : memref<3x3x256x256xbf16, #tpu.memory_space<vmem>>, vector<1x1x256x256xbf16>
    %100 = vector.shape_cast %99 : vector<1x1x256x256xbf16> to vector<256x256xbf16>
    %cst_64 = arith.constant dense<0.000000e+00> : vector<128x256xf32>
    %101 = tpu.matmul %98, %100, %cst_64 {dimension_numbers = #tpu.dot_dimension_numbers<[1], [0], [0], [1], [0, 0, 1, 1], [], []>} : vector<128x256xbf16>, vector<256x256xbf16>, vector<128x256xf32> -> vector<128x256xf32>
    %102 = arith.addf %97, %101 : vector<128x256xf32>
    %103 = vector.extract_strided_slice %93 {offsets = [0, 0], sizes = [128, 256], strides = [1, 1]} : vector<160x256xbf16> to vector<128x256xbf16>
    %c0_65 = arith.constant 0 : index
    %c2_66 = arith.constant 2 : index
    %c0_67 = arith.constant 0 : index
    %c0_68 = arith.constant 0 : index
    %104 = vector.load %arg3[%c0_65, %c2_66, %c0_67, %c0_68] : memref<3x3x256x256xbf16, #tpu.memory_space<vmem>>, vector<1x1x256x256xbf16>
    %105 = vector.shape_cast %104 : vector<1x1x256x256xbf16> to vector<256x256xbf16>
    %cst_69 = arith.constant dense<0.000000e+00> : vector<128x256xf32>
    %106 = tpu.matmul %103, %105, %cst_69 {dimension_numbers = #tpu.dot_dimension_numbers<[1], [0], [0], [1], [0, 0, 1, 1], [], []>} : vector<128x256xbf16>, vector<256x256xbf16>, vector<128x256xf32> -> vector<128x256xf32>
    %107 = arith.addf %102, %106 : vector<128x256xf32>
    %108 = vector.extract_strided_slice %91 {offsets = [16, 0], sizes = [128, 256], strides = [1, 1]} : vector<160x256xbf16> to vector<128x256xbf16>
    %c1_70 = arith.constant 1 : index
    %c0_71 = arith.constant 0 : index
    %c0_72 = arith.constant 0 : index
    %c0_73 = arith.constant 0 : index
    %109 = vector.load %arg3[%c1_70, %c0_71, %c0_72, %c0_73] : memref<3x3x256x256xbf16, #tpu.memory_space<vmem>>, vector<1x1x256x256xbf16>
    %110 = vector.shape_cast %109 : vector<1x1x256x256xbf16> to vector<256x256xbf16>
    %cst_74 = arith.constant dense<0.000000e+00> : vector<128x256xf32>
    %111 = tpu.matmul %108, %110, %cst_74 {dimension_numbers = #tpu.dot_dimension_numbers<[1], [0], [0], [1], [0, 0, 1, 1], [], []>} : vector<128x256xbf16>, vector<256x256xbf16>, vector<128x256xf32> -> vector<128x256xf32>
    %112 = arith.addf %107, %111 : vector<128x256xf32>
    %113 = vector.extract_strided_slice %92 {offsets = [16, 0], sizes = [128, 256], strides = [1, 1]} : vector<160x256xbf16> to vector<128x256xbf16>
    %c1_75 = arith.constant 1 : index
    %c1_76 = arith.constant 1 : index
    %c0_77 = arith.constant 0 : index
    %c0_78 = arith.constant 0 : index
    %114 = vector.load %arg3[%c1_75, %c1_76, %c0_77, %c0_78] : memref<3x3x256x256xbf16, #tpu.memory_space<vmem>>, vector<1x1x256x256xbf16>
    %115 = vector.shape_cast %114 : vector<1x1x256x256xbf16> to vector<256x256xbf16>
    %cst_79 = arith.constant dense<0.000000e+00> : vector<128x256xf32>
    %116 = tpu.matmul %113, %115, %cst_79 {dimension_numbers = #tpu.dot_dimension_numbers<[1], [0], [0], [1], [0, 0, 1, 1], [], []>} : vector<128x256xbf16>, vector<256x256xbf16>, vector<128x256xf32> -> vector<128x256xf32>
    %117 = arith.addf %112, %116 : vector<128x256xf32>
    %118 = vector.extract_strided_slice %93 {offsets = [16, 0], sizes = [128, 256], strides = [1, 1]} : vector<160x256xbf16> to vector<128x256xbf16>
    %c1_80 = arith.constant 1 : index
    %c2_81 = arith.constant 2 : index
    %c0_82 = arith.constant 0 : index
    %c0_83 = arith.constant 0 : index
    %119 = vector.load %arg3[%c1_80, %c2_81, %c0_82, %c0_83] : memref<3x3x256x256xbf16, #tpu.memory_space<vmem>>, vector<1x1x256x256xbf16>
    %120 = vector.shape_cast %119 : vector<1x1x256x256xbf16> to vector<256x256xbf16>
    %cst_84 = arith.constant dense<0.000000e+00> : vector<128x256xf32>
    %121 = tpu.matmul %118, %120, %cst_84 {dimension_numbers = #tpu.dot_dimension_numbers<[1], [0], [0], [1], [0, 0, 1, 1], [], []>} : vector<128x256xbf16>, vector<256x256xbf16>, vector<128x256xf32> -> vector<128x256xf32>
    %122 = arith.addf %117, %121 : vector<128x256xf32>
    %123 = vector.extract_strided_slice %91 {offsets = [32, 0], sizes = [128, 256], strides = [1, 1]} : vector<160x256xbf16> to vector<128x256xbf16>
    %c2_85 = arith.constant 2 : index
    %c0_86 = arith.constant 0 : index
    %c0_87 = arith.constant 0 : index
    %c0_88 = arith.constant 0 : index
    %124 = vector.load %arg3[%c2_85, %c0_86, %c0_87, %c0_88] : memref<3x3x256x256xbf16, #tpu.memory_space<vmem>>, vector<1x1x256x256xbf16>
    %125 = vector.shape_cast %124 : vector<1x1x256x256xbf16> to vector<256x256xbf16>
    %cst_89 = arith.constant dense<0.000000e+00> : vector<128x256xf32>
    %126 = tpu.matmul %123, %125, %cst_89 {dimension_numbers = #tpu.dot_dimension_numbers<[1], [0], [0], [1], [0, 0, 1, 1], [], []>} : vector<128x256xbf16>, vector<256x256xbf16>, vector<128x256xf32> -> vector<128x256xf32>
    %127 = arith.addf %122, %126 : vector<128x256xf32>
    %128 = vector.extract_strided_slice %92 {offsets = [32, 0], sizes = [128, 256], strides = [1, 1]} : vector<160x256xbf16> to vector<128x256xbf16>
    %c2_90 = arith.constant 2 : index
    %c1_91 = arith.constant 1 : index
    %c0_92 = arith.constant 0 : index
    %c0_93 = arith.constant 0 : index
    %129 = vector.load %arg3[%c2_90, %c1_91, %c0_92, %c0_93] : memref<3x3x256x256xbf16, #tpu.memory_space<vmem>>, vector<1x1x256x256xbf16>
    %130 = vector.shape_cast %129 : vector<1x1x256x256xbf16> to vector<256x256xbf16>
    %cst_94 = arith.constant dense<0.000000e+00> : vector<128x256xf32>
    %131 = tpu.matmul %128, %130, %cst_94 {dimension_numbers = #tpu.dot_dimension_numbers<[1], [0], [0], [1], [0, 0, 1, 1], [], []>} : vector<128x256xbf16>, vector<256x256xbf16>, vector<128x256xf32> -> vector<128x256xf32>
    %132 = arith.addf %127, %131 : vector<128x256xf32>
    %133 = vector.extract_strided_slice %93 {offsets = [32, 0], sizes = [128, 256], strides = [1, 1]} : vector<160x256xbf16> to vector<128x256xbf16>
    %c2_95 = arith.constant 2 : index
    %c2_96 = arith.constant 2 : index
    %c0_97 = arith.constant 0 : index
    %c0_98 = arith.constant 0 : index
    %134 = vector.load %arg3[%c2_95, %c2_96, %c0_97, %c0_98] : memref<3x3x256x256xbf16, #tpu.memory_space<vmem>>, vector<1x1x256x256xbf16>
    %135 = vector.shape_cast %134 : vector<1x1x256x256xbf16> to vector<256x256xbf16>
    %cst_99 = arith.constant dense<0.000000e+00> : vector<128x256xf32>
    %136 = tpu.matmul %133, %135, %cst_99 {dimension_numbers = #tpu.dot_dimension_numbers<[1], [0], [0], [1], [0, 0, 1, 1], [], []>} : vector<128x256xbf16>, vector<256x256xbf16>, vector<128x256xf32> -> vector<128x256xf32>
    %137 = arith.addf %132, %136 : vector<128x256xf32>
    %138 = vector.shape_cast %137 : vector<128x256xf32> to vector<8x16x256xf32>
    %139 = vector.extract_strided_slice %138 {offsets = [0, 0, 0], sizes = [8, 8, 256], strides = [1, 1, 1]} : vector<8x16x256xf32> to vector<8x8x256xf32>
    %cst_100 = arith.constant dense<0.000000e+00> : vector<256xf32>
    %140 = vector.multi_reduction <add>, %139, %cst_100 [0, 1] : vector<8x8x256xf32> to vector<256xf32>
    %141 = vector.shape_cast %140 : vector<256xf32> to vector<1x1x256xf32>
    %cst_101 = arith.constant 1.562500e-02 : f32
    %142 = vector.broadcast %cst_101 : f32 to vector<1x1x256xf32>
    %143 = arith.mulf %141, %142 : vector<1x1x256xf32>
    %144 = arith.mulf %139, %139 : vector<8x8x256xf32>
    %cst_102 = arith.constant dense<0.000000e+00> : vector<256xf32>
    %145 = vector.multi_reduction <add>, %144, %cst_102 [0, 1] : vector<8x8x256xf32> to vector<256xf32>
    %146 = vector.shape_cast %145 : vector<256xf32> to vector<1x1x256xf32>
    %cst_103 = arith.constant 1.562500e-02 : f32
    %147 = vector.broadcast %cst_103 : f32 to vector<1x1x256xf32>
    %148 = arith.mulf %146, %147 : vector<1x1x256xf32>
    %149 = vector.broadcast %143 : vector<1x1x256xf32> to vector<8x8x256xf32>
    %150 = arith.subf %139, %149 : vector<8x8x256xf32>
    %151 = arith.mulf %143, %143 : vector<1x1x256xf32>
    %152 = arith.subf %148, %151 : vector<1x1x256xf32>
    %cst_104 = arith.constant 9.99999974E-6 : f32
    %153 = vector.broadcast %cst_104 : f32 to vector<1x1x256xf32>
    %154 = arith.addf %152, %153 : vector<1x1x256xf32>
    %155 = math.rsqrt %154 : vector<1x1x256xf32>
    %156 = vector.broadcast %155 : vector<1x1x256xf32> to vector<8x8x256xf32>
    %157 = arith.mulf %150, %156 : vector<8x8x256xf32>
    %158 = arith.addf %1, %157 : vector<8x8x256xf32>
    %c0_105 = arith.constant 0 : index
    %c0_106 = arith.constant 0 : index
    %c0_107 = arith.constant 0 : index
    %c0_108 = arith.constant 0 : index
    %159 = vector.load %arg4[%c0_105, %c0_106, %c0_107, %c0_108] : memref<1x8x8x256xf32, #tpu.memory_space<vmem>>, vector<1x8x8x256xf32>
    %160 = vector.shape_cast %159 : vector<1x8x8x256xf32> to vector<8x8x256xf32>
    %161 = vector.shape_cast %158 : vector<8x8x256xf32> to vector<1x8x8x256xf32>
    tpu.vector_store %arg4[%c0_105, %c0_106, %c0_107, %c0_108], %161 {strides = array<i32>} : memref<1x8x8x256xf32, #tpu.memory_space<vmem>>, vector<1x8x8x256xf32>,
    return
  }
  func.func @transform_0(%arg0: i32) -> (i32, i32, i32, i32) {
    %c0_i32 = arith.constant 0 : i32
    %c0_i32_0 = arith.constant 0 : i32
    %c0_i32_1 = arith.constant 0 : i32
    %c0_i32_2 = arith.constant 0 : i32
    return %arg0, %c0_i32, %c0_i32_0, %c0_i32_1 : i32, i32, i32, i32
  }
  func.func @transform_1(%arg0: i32) -> (i32, i32, i32, i32) {
    %c0_i32 = arith.constant 0 : i32
    %c0_i32_0 = arith.constant 0 : i32
    %c0_i32_1 = arith.constant 0 : i32
    %c0_i32_2 = arith.constant 0 : i32
    %c0_i32_3 = arith.constant 0 : i32
    return %c0_i32, %c0_i32_0, %c0_i32_1, %c0_i32_2 : i32, i32, i32, i32
  }
  func.func @transform_2(%arg0: i32) -> (i32, i32, i32, i32) {
    %c0_i32 = arith.constant 0 : i32
    %c0_i32_0 = arith.constant 0 : i32
    %c0_i32_1 = arith.constant 0 : i32
    %c0_i32_2 = arith.constant 0 : i32
    %c0_i32_3 = arith.constant 0 : i32
    return %c0_i32, %c0_i32_0, %c0_i32_1, %c0_i32_2 : i32, i32, i32, i32
  }
  func.func @transform_3(%arg0: i32) -> (i32, i32, i32, i32) {
    %c0_i32 = arith.constant 0 : i32
    %c0_i32_0 = arith.constant 0 : i32
    %c0_i32_1 = arith.constant 0 : i32
    %c0_i32_2 = arith.constant 0 : i32
    return %arg0, %c0_i32, %c0_i32_0, %c0_i32_1 : i32, i32, i32, i32
  }
}

</mosaic_0001>

<bundles_post_ra>
// kernel: tpu_custom_call.1
= control target key start
LH: loop header
LB: loop body
LE: loop exit
PB: predicated region body
PF: predicated region fallthrough
CT: control target
= control target key end

     0   :  { %8 = vsyncpa [#allocation3], 0  ;;  %s11155_s0 = inlined_call_operand.hbm [shape: f32[2,8,8,256], index: 0, kind: input, shape index: {}]   ;;  %s11156_s1 = inlined_call_operand.hbm [shape: bf16[3,3,256,256], index: 1, kind: input, shape index: {}]   ;;  %s11157_s2 = inlined_call_operand.hbm [shape: bf16[3,3,256,256], index: 2, kind: input, shape index: {}]   ;;  %s11158_s3 = inlined_call_operand.hbm [shape: f32[2,8,8,256], index: 3, kind: output, shape index: {}]  }
   0x1   :  { %10 = vsyncpa [#allocation3 + $0x1], 0 }
   0x2   :  { %11 = vsyncpa [#allocation6], 0 }
   0x3   :  { %12 = vsyncpa [#allocation4], 0 }
   0x4   :  { %14 = vsyncpa [#allocation4 + $0x1], 0  ;;  %s9385_s12 = smov 0   ;;  %s9387_s13 = smov 0  }
   0x5   :  { %s9389_s14 = smov 0   ;;  %s9391_s15 = smov 0  }
   0x6 LB: > { %s9406_s16 = sadd.s32 4294967295, %s9352_s15   ;;  %s7030_s17 = sadd.s32 4294967294, %s9352_s15   ;;  %s9352_s15 = sphi %s9391_s15, %s11203_s15   ;;  %s9348_s14 = sphi %s9389_s14, %s11202_s14   ;;  %s9344_s13 = sphi %s9387_s13, %s11201_s13   ;;  %s9340_s12 = sphi %s9385_s12, %s11200_s12  }
   0x7   : > { %p40_p0 = scmp.ne.s32.totalorder %s9344_s13, %s9340_s12  ;;  %p11159_p1 = scmp.eq.s32.totalorder %s9406_s16, 0 }
   0x8   : > { %p112_p3 = scmp.eq.s32.totalorder %s7030_s17, 1  ;;  %p7031_p5 = scmp.ge.s32.totalorder %s9352_s15, 1 }
   0x9   : > { %p9415_p4 = por %p11159_p1, %p40_p0  ;;  %p119_p7 = scmp.lt.s32.totalorder %s9352_s15, 3 }
   0xa   : > { %p9420_p6 = por %p112_p3, %p40_p0  ;;  %s9354_s21 = smov [#allocation5]  }
   0xb   : > { %s11172_s18 = scalar_select %p9415_p4, 1, 0 }
   0xc   : > { %s11173_s19 = scalar_select %p9420_p6, 1, 0 }
   0xd   : > { %p9425_p8 = pnand %p7031_p5, %p119_p7  ;;  %s131_s22 = sshll.u32 %s9354_s21, 4  ;;  %s9429_s22 = int_to_ptr.vmem [resolvable:$true] %s131_s22 }
   0xe   : > { %s9355_s24 = smov [#allocation7]   ;;  %s9196_s28 = scalar_lea.hbm %s11156_s1, 36864 }
   0xf   : > { %p8246_p9 = pneg %p9425_p8  ;;  %s144_s25 = sshll.u32 %s9355_s24, 4  ;;  %s9440_s25 = int_to_ptr.vmem [resolvable:$true] %s144_s25 }
  0x10   : > { %p9197_p12 = scmp.ne.s32.totalorder %s11156_s1, %s9196_s28  ;;  %p9203_p5 = scmp.lt.u32.totalorder %s9196_s28, %s11156_s1 }
  0x11   : > { %p9436_p11 = pnand %p8246_p9, %p11159_p1 }
  0x13   : > { %p9198_p13 = pneg %p9436_p11 }
  0x15   : > { %p9199_p0 = pnand %p9198_p13, %p9197_p12 }
  0x17   : > { %p9200_p3 = pneg %p9199_p0 }
  0x19   : > { %p9205_p7 = pnand %p9203_p5, %p9200_p3 }
  0x1b   : > { %9208 = shalt.err (!%p9205_p7)
}
  0x1c   : > { %s9209_s6 = scalar_lea.vmem %s9429_s22, 36864  ;;  %p9217_p2 = scmp.lt.s32.totalorder %s9429_s22, %s9429_s22 }
  0x1d   : > { %p9210_p9 = scmp.ne.s32.totalorder %s9429_s22, %s9209_s6  ;;  %p9218_p12 = scmp.lt.s32.totalorder %s9209_s6, %s9209_s6 }
  0x1f   : > { %p9212_p10 = pnand %p9210_p9, %p9198_p13  ;;  %p9219_p0 = por %p9218_p12, %p9217_p2 }
  0x21   : > { %p9213_p1 = pneg %p9212_p10 }
  0x23   : > { %p9220_p6 = pnand %p9219_p0, %p9213_p1 }
  0x25   : > { %9223 = shalt.err (!%p9220_p6)
}
  0x26   : > { %s9356_s7 = smov 128   ;;  %s9357_s8 = smov 8  }
  0x27   : > { %8249 = dma.hbm_to_vmem [thread:$0]  (!%p9436_p11), %s11156_s1, 36864, %s9429_s22, [#allocation6], %s9356_s7, %s9356_s7, %s9357_s8  }
  0x28   : > { %s9224_s21 = scalar_lea.hbm %s11157_s2, 36864 }
  0x29   : > { %p9225_p2 = scmp.ne.s32.totalorder %s11157_s2, %s9224_s21  ;;  %p9231_p10 = scmp.lt.u32.totalorder %s9224_s21, %s11157_s2 }
  0x2b   : > { %p9227_p1 = pnand %p9225_p2, %p9198_p13 }
  0x2d   : > { %p9228_p6 = pneg %p9227_p1 }
  0x2f   : > { %p9233_p3 = pnand %p9231_p10, %p9228_p6 }
  0x31   : > { %9236 = shalt.err (!%p9233_p3)
}
  0x32   : > { %s9237_s22 = scalar_lea.vmem %s9440_s25, 36864  ;;  %p9245_p12 = scmp.lt.s32.totalorder %s9440_s25, %s9440_s25 }
  0x33   : > { %p9238_p5 = scmp.ne.s32.totalorder %s9440_s25, %s9237_s22  ;;  %p9246_p0 = scmp.lt.s32.totalorder %s9237_s22, %s9237_s22 }
  0x35   : > { %p9240_p7 = pnand %p9238_p5, %p9198_p13  ;;  %p9247_p2 = por %p9246_p0, %p9245_p12 }
  0x37   : > { %p9241_p9 = pneg %p9240_p7 }
  0x39   : > { %p9248_p1 = pnand %p9247_p2, %p9241_p9 }
  0x3b   : > { %9251 = shalt.err (!%p9248_p1)
}
  0x3c   : > { %8252 = dma.hbm_to_vmem [thread:$0]  (!%p9436_p11), %s11157_s2, 36864, %s9440_s25, [#allocation6], %s9356_s7, %s9356_s7, %s9357_s8  }
  0x3d   : > { %s9495_s4 = sadd.s32 1, %s9352_s15   ;;  %s27_s23 = sadd.s32 1, %s9348_s14 }
  0x3e   : > { %s24_s5 = ssub.s32 %s9352_s15, %s9495_s4  ;;  %p34_p13 = scmp.ne.s32.totalorder %s9348_s14, %s9344_s13 }
  0x3f   : > { %p25_p6 = scmp.eq.s32.totalorder %s24_s5, 0  ;;  %p35_p10 = scmp.eq.s32.totalorder %s9352_s15, 0 }
  0x40   : > { %p11176_p3 = scmp.eq.s32.totalorder %s9406_s16, 1  ;;  %p8263_p7 = scmp.lt.s32.totalorder %s9352_s15, 2 }
  0x41   : > { %s9511_s9 = scalar_select %p25_p6, %s9348_s14, %s27_s23  }
  0x42   : > { %p9505_p5 = por %p11176_p3, %p34_p13  ;;  %p36_p9 = por %p35_p10, %p34_p13 }
  0x43   : > { %s158_s10 = sand.u32 1, %s9348_s14   ;;  %s7720_s25 = sshll.u32 %s9352_s15, 11 }
  0x44   : > { %s11177_s6 = scalar_select %p9505_p5, 1, 0 }
  0x45   : > { %s7035_s11 = sshll.u32 %s158_s10, 7  ;;  %s9518_s17 = scalar_lea.hbm %s11155_s0, %s7720_s25 }
  0x46   : > { %s162_s21 = scalar_lea.vmem [#allocation2], %s7035_s11  ;;  %p9522_p11 = pnand %p8263_p7, %p36_p9 }
  0x47   : > { %s169_s24 = sshll.u32 %s162_s21, 4  ;;  %s9526_s27 = scalar_lea.sflag [#allocation3], %s158_s10  ;;  %s9520_s24 = int_to_ptr.vmem [resolvable:$true] %s169_s24 }
  0x48   : > { %s9252_s28 = scalar_lea.hbm %s9518_s17, 2048  ;;  %p9254_p0 = pneg %p9522_p11 }
  0x49   : > { %p9253_p12 = scmp.ne.s32.totalorder %s9518_s17, %s9252_s28  ;;  %s9257_s30 = scalar_lea.hbm %s11155_s0, 4096 }
  0x4a   : > { %p9258_p13 = scmp.lt.u32.totalorder %s9518_s17, %s11155_s0  ;;  %p9259_p6 = scmp.lt.u32.totalorder %s9257_s30, %s9252_s28 }
  0x4b   : > { %p9255_p2 = pnand %p9254_p0, %p9253_p12  ;;  %p9261_p3 = scmp.lt.u32.totalorder %s9252_s28, %s9518_s17 }
  0x4c   : > { %p9260_p10 = por %p9259_p6, %p9258_p13 }
  0x4d   : > { %p9256_p1 = pneg %p9255_p2 }
  0x4e   : > { %p9262_p7 = por %p9261_p3, %p9260_p10 }
  0x50   : > { %p9263_p9 = pnand %p9262_p7, %p9256_p1 }
  0x52   : > { %9266 = shalt.err (!%p9263_p9)
}
  0x53   : > { %s9267_s10 = scalar_lea.vmem %s9520_s24, 2048  ;;  %s9358_s11 = smov [#allocation2]  }
  0x54   : > { %p9268_p12 = scmp.ne.s32.totalorder %s9520_s24, %s9267_s10  ;;  %s9272_s25 = sshll.u32 %s9358_s11, 4  ;;  %s9273_s25 = int_to_ptr.vmem [resolvable:$false] %s9272_s25 }
  0x55   : > { %s9274_s7 = scalar_lea.vmem %s9273_s25, 4096  ;;  %p9275_p4 = scmp.lt.s32.totalorder %s9520_s24, %s9273_s25 }
  0x56   : > { %p9270_p2 = pnand %p9268_p12, %p9254_p0  ;;  %p9276_p13 = scmp.lt.s32.totalorder %s9274_s7, %s9267_s10 }
  0x58   : > { %p9271_p5 = pneg %p9270_p2  ;;  %p9277_p6 = por %p9276_p13, %p9275_p4 }
  0x5a   : > { %p9278_p10 = pnand %p9277_p6, %p9271_p5 }
  0x5c   : > { %9281 = shalt.err (!%p9278_p10)
}
  0x5d   : > { %s9359_s8 = smov 256   ;;  %s9360_s21 = smov 16  }
  0x5e   : > { %8256 = dma.hbm_to_vmem [thread:$0]  (!%p9522_p11), %s9518_s17, 2048, %s9520_s24, %s9526_s27, %s9359_s8, %s9359_s8, %s9360_s21  }
  0x5f   : > { %181 = sbr.rel (%p9425_p8) target bundleno = 1854 (0x73e), region = 32 }
  0x66   : > { %s9557_s28 = sand.u32 1, %s9344_s13   ;;  %p11179_p4 = scmp.ne.s32.totalorder %s11172_s18, 0 }
  0x67   : > { %s7039_s22 = sshll.u32 %s9557_s28, 7  ;;  %s184_s29 = scalar_lea.sflag [#allocation3], %s9557_s28 }
  0x68   : > { %s9563_s30 = scalar_lea.vmem [#allocation2], %s7039_s22 }
  0x69   : > { %9327 = dma.done.wait (%p11179_p4), %s184_s29, 2048  }
  0x6a   : > { %9329 = vsyncadd (%p11179_p4), %s184_s29, 4294965248  ;;  %p11180_p5 = scmp.eq.s32.totalorder %s9406_s16, 0 }
  0x6c   : > { %9331 = dma.done.wait (%p11180_p5), [#allocation6], 73728   ;;  %p11181_p8 = pmov %p11180_p5 }
  0x6d   : > { %v8308_v0 = vld [vmem:[#allocation5 + $0x104] ss:$8 sps:$4 sm:$0xff]   ;;  %v8310_v1 = vld [vmem:[#allocation5 + $0x100] ss:$8 sps:$4 sm:$0xff]   ;;  %v8311_v2 = vld [vmem:[#allocation5 + $0x114] ss:$8 sps:$4 sm:$0xff]  }
  0x6e   : > { %9333 = vsyncadd (%p11181_p8), [#allocation6], 4294893568  ;;  %863 = vmatprep.subr.bf16.mxu0 %v8308_v0  ;;  %v8313_v3 = vld [vmem:[#allocation5 + $0x110] ss:$8 sps:$4 sm:$0xff]   ;;  %v8314_v4 = vld [vmem:[#allocation5 + $0x124] ss:$8 sps:$4 sm:$0xff]  }
  0x6f   : > { %864 = vmatpush1.bf16.msra.mxu0 %v8310_v1  ;;  %v8316_v5 = vld [vmem:[#allocation5 + $0x120] ss:$8 sps:$4 sm:$0xff]   ;;  %v8317_v6 = vld [vmem:[#allocation5 + $0x134] ss:$8 sps:$4 sm:$0xff]   ;;  %v8319_v7 = vld [vmem:[#allocation5 + $0x130] ss:$8 sps:$4 sm:$0xff]  }
  0x70   : > { %865 = vmatprep.subr.bf16.mxu0 %v8311_v2  ;;  %v8320_v8 = vld [vmem:[#allocation5 + $0x144] ss:$8 sps:$4 sm:$0xff]   ;;  %v8322_v9 = vld [vmem:[#allocation5 + $0x140] ss:$8 sps:$4 sm:$0xff]   ;;  %v8323_v10 = vld [vmem:[#allocation5 + $0x154] ss:$8 sps:$4 sm:$0xff]  }
  0x71   : > { %v8325_v11 = vld [vmem:[#allocation5 + $0x150] ss:$8 sps:$4 sm:$0xff]   ;;  %v8326_v12 = vld [vmem:[#allocation5 + $0x164] ss:$8 sps:$4 sm:$0xff]   ;;  %v8328_v15 = vld [vmem:[#allocation5 + $0x160] ss:$8 sps:$4 sm:$0xff]  }
  0x72   : > { %v220_v13 = vld [vmem:[%s9563_s30 + $0x8] sm:$0xff]  ;;  %v222_v14 = vld [vmem:[%s9563_s30 + $0x18] sm:$0xff]  ;;  %vm427_vm0 = vcmask 1040384   ;;  %vm428_vm1 = vsmask.f32 256  ;;  %v221_v19 = vld [vmem:[%s9563_s30 + $0x10] sm:$0xff] }
  0x73   : > { %866 = vmatpush1.bf16.msra.mxu0 %v8313_v3  ;;  %v236_v16 = vpack.c.bf16 %v220_v13, %v220_v13  ;;  %v238_v17 = vpack.c.bf16 %v222_v14, %v222_v14  ;;  %v8329_v18 = vld [vmem:[#allocation5 + $0x174] ss:$8 sps:$4 sm:$0xff]   ;;  %vm446_vm2 = vcmask 1044480   ;;  %vm447_vm3 = vsmask.f32 4352  ;;  %vm9576_vm4 = vmand %vm427_vm0, %vm428_vm1  ;;  %v219_v27 = vld [vmem:[%s9563_s30] sm:$0xff] }
  0x74   : > { %867 = vmatprep.subr.bf16.mxu0 %v8314_v4  ;;  %v237_v28 = vpack.c.bf16 %v221_v19, %v221_v19  ;;  %v8331_v29 = vld [vmem:[#allocation5 + $0x170] ss:$8 sps:$4 sm:$0xff]   ;;  %v8332_v32 = vld [vmem:[#allocation5 + $0x184] ss:$8 sps:$4 sm:$0xff]   ;;  %vm9582_vm5 = vmand %vm446_vm2, %vm447_vm3  ;;  %v11184_v35 = vmov 0  ;;  %v235_v36 = vpack.c.bf16 %v219_v27, %v219_v27  ;;  %vm1266_vm7 = vcmask 1046528  }
  0x75   : > { %v255_v20 = vshrl.u32 %v236_v16, 16  ;;  %v261_v21 = vshrl.u32 %v238_v17, 16  ;;  %v320_v22 = vshll.u32 %v236_v16, 16  ;;  %v328_v23 = vshll.u32 %v238_v17, 16  ;;  %v8334_v40 = vld [vmem:[#allocation5 + $0x180] ss:$8 sps:$4 sm:$0xff]  }
  0x76   : > { %v11185_v35 = vsel %vm9582_vm5, 4294967295, %v11184_v35  ;;  %v258_v39 = vshrl.u32 %v237_v28, 16  ;;  %v8335_v43 = vld [vmem:[#allocation5 + $0x194] ss:$8 sps:$4 sm:$0xff]   ;;  %v252_v49 = vshrl.u32 %v235_v36, 16  ;;  %v324_v51 = vshll.u32 %v237_v28, 16 }
  0x77   : > { %868 = vmatpush1.bf16.msra.mxu0 %v8316_v5  ;;  %v319_v24 = vrot.slane %v255_v20, 7  ;;  %v327_v25 = vrot.slane %v261_v21, 7  ;;  %v396_v30 = vrot.slane %v320_v22, 7  ;;  %v398_v31 = vrot.slane %v328_v23, 7  ;;  %11186 = vst [vmem:[#allocation12_spill] sm:$0xff] %v11185_v35  ;;  %v224_v56 = vld [vmem:[%s9563_s30 + $0x28] sm:$0xff] }
  0x78   : > { %869 = vmatprep.subr.bf16.mxu0 %v8317_v6  ;;  %v323_v50 = vrot.slane %v258_v39, 7  ;;  %v8337_v52 = vld [vmem:[#allocation5 + $0x190] ss:$8 sps:$4 sm:$0xff]   ;;  %v8338_v55 = vld [vmem:[#allocation5 + $0x1a4] ss:$8 sps:$4 sm:$0xff]   ;;  %v315_v58 = vrot.slane %v252_v49, 7  ;;  %v240_v0 = vpack.c.bf16 %v224_v56, %v224_v56 }
  0x79   : > { %v322_v33 = vor.u32 %v320_v22, %v319_v24  ;;  %v330_v34 = vor.u32 %v328_v23, %v327_v25  ;;  %vm580_vm6 = vsmask.f32 7424  ;;  %v316_v59 = vshll.u32 %v235_v36, 16  ;;  %v223_v60 = vld [vmem:[%s9563_s30 + $0x20] sm:$0xff]  ;;  %v226_v1 = vld [vmem:[%s9563_s30 + $0x38] sm:$0xff]  ;;  %v225_v19 = vld [vmem:[%s9563_s30 + $0x30] sm:$0xff] }
  0x7a   : > { %v326_v61 = vor.u32 %v324_v51, %v323_v50  ;;  %v8340_v62 = vld [vmem:[#allocation5 + $0x1a0] ss:$8 sps:$4 sm:$0xff]   ;;  %v8341_v2 = vld [vmem:[#allocation5 + $0x1b4] ss:$8 sps:$4 sm:$0xff]   ;;  %v239_v3 = vpack.c.bf16 %v223_v60, %v223_v60  ;;  %v397_v5 = vrot.slane %v324_v51, 7  ;;  %v9639_v28 = vpack.c.bf16 %v225_v19, %v225_v19  ;;  %s7721_s18 = sshll.u32 %s9406_s16, 11 }
  0x7b   : > { %870 = vmatpush1.bf16.msra.mxu0 %v8319_v7  ;;  %v431_v37 = vsel %vm9576_vm4, %v255_v20, %v322_v33  ;;  %v433_v38 = vsel %vm9576_vm4, %v261_v21, %v330_v34  ;;  %v318_v4 = vor.u32 %v316_v59, %v315_v58  ;;  %v242_v7 = vpack.c.bf16 %v226_v1, %v226_v1  ;;  %v8346_v16 = vld [vmem:[#allocation5 + $0x1c0] ss:$8 sps:$4 sm:$0xff]   ;;  %v8347_v20 = vld [vmem:[#allocation5 + $0x1d4] ss:$8 sps:$4 sm:$0xff]   ;;  %v8350_v34 = vld [vmem:[#allocation5 + $0x1e4] ss:$8 sps:$4 sm:$0xff]   ;;  %s11097_s26 = scalar_lea.hbm %s11158_s3, %s7721_s18 }
  0x7c   : > { %871 = vmatprep.subr.bf16.mxu0 %v8320_v8  ;;  %v9592_v41 = vsel %vm9582_vm5, %v431_v37, %v396_v30  ;;  %v9596_v42 = vsel %vm9582_vm5, %v433_v38, %v398_v31  ;;  %v432_v6 = vsel %vm9576_vm4, %v258_v39, %v326_v61  ;;  %v8343_v8 = vld [vmem:[#allocation5 + $0x1b0] ss:$8 sps:$4 sm:$0xff]   ;;  %v332_v24 = vshll.u32 %v239_v3, 16  ;;  %v8352_v37 = vld [vmem:[#allocation5 + $0x1e0] ss:$8 sps:$4 sm:$0xff]   ;;  %s11079_s20 = scalar_lea.vmem [#allocation8], %s7039_s22 }
  0x7d   : > { %v9600_v44 = vsel %vm446_vm2, %v9592_v41, 0  ;;  %v9604_v45 = vsel %vm446_vm2, %v9596_v42, 0  ;;  %v430_v13 = vsel %vm9576_vm4, %v252_v49, %v318_v4  ;;  %v9628_v14 = vsel %vm9582_vm5, %v432_v6, %v397_v5  ;;  %v8349_v30 = vld [vmem:[#allocation5 + $0x1d0] ss:$8 sps:$4 sm:$0xff]   ;;  %v227_v51 = vld [vmem:[%s9563_s30 + $0x40] sm:$0xff]  ;;  %s6938_s17 = sshll.u32 %s11079_s20, 4  ;;  %s11099_s17 = int_to_ptr.vmem [resolvable:$true] %s6938_s17 }
  0x7e   : > { %v591_v46 = vshrl.u32 %v9604_v45, 16  ;;  %v593_v47 = vshll.u32 %v9604_v45, 16  ;;  %v597_v48 = vshll.u32 %v9600_v44, 16  ;;  %v9637_v22 = vsel %vm446_vm2, %v9628_v14, 0  ;;  %v8355_v1 = vld [vmem:[#allocation5 + $0x1f0] ss:$8 sps:$4 sm:$0xff]  }
  0x7f   : > { %872 = vmatpush1.bf16.msra.mxu0 %v8322_v9  ;;  %v267_v9 = vshrl.u32 %v240_v0, 16  ;;  %v344_v27 = vshll.u32 %v242_v7, 16  ;;  %v399_v50 = vrot.slane %v332_v24, 7  ;;  %v230_v5 = vld [vmem:[%s9563_s30 + $0x58] sm:$0xff]  ;;  %v8358_v6 = vld [vmem:[#allocation5 + $0x4] ss:$8 sps:$4 sm:$0xff]  }
  0x80   : > { %873 = vmatprep.subr.bf16.mxu0 %v8323_v10  ;;  %v9609_v53 = vrot.slane %v593_v47, 1  ;;  %v9611_v54 = vrot.slane %v597_v48, 1  ;;  %v8344_v10 = vld [vmem:[#allocation5 + $0x1c4] ss:$8 sps:$4 sm:$0xff]   ;;  %v581_v47 = vshrl.u32 %v9637_v22, 16  ;;  %s6925_s27 = scalar_lea.sflag [#allocation4], %s9557_s28 }
  0x81   : > { %v335_v17 = vrot.slane %v267_v9, 7  ;;  %v402_v58 = vrot.slane %v344_v27, 7  ;;  %v8361_v19 = vld [vmem:[#allocation5 + $0x14] ss:$8 sps:$4 sm:$0xff]   ;;  %s9282_s23 = scalar_lea.vmem %s11099_s17, 2048  ;;  %p11197_p0 = scmp.ne.s32.totalorder %s11177_s6, 0 }
  0x82   : > { %v9615_v57 = vor.u32 %v9609_v53, %v591_v46  ;;  %v270_v46 = vshrl.u32 %v9639_v28, 16  ;;  %v8415_v35 = vld [vmem:[#allocation5 + $0x234] ss:$8 sps:$4 sm:$0xff]   ;;  %p9283_p11 = scmp.ne.s32.totalorder %s11099_s17, %s9282_s23  ;;  %s9362_s5 = smov [#allocation8]  }
  0x83   : > { %874 = vmatpush1.bf16.msra.mxu0 %v8325_v11  ;;  %v395_v11 = vrot.slane %v316_v59, 7  ;;  %v340_v59 = vshll.u32 %v9639_v28, 16  ;;  %s9286_s10 = sshll.u32 %s9362_s5, 4  ;;  %s9287_s10 = int_to_ptr.vmem [resolvable:$false] %s9286_s10 }
  0x84   : > { %875 = vmatprep.subr.bf16.mxu0 %v8326_v12  ;;  %v600_v63 = vsel %vm580_vm6, %v9615_v57, %v9611_v54  ;;  %v264_v12 = vshrl.u32 %v239_v3, 16  ;;  %p9284_p1 = pnand %p9283_p11, %p11197_p0  ;;  %s9288_s11 = scalar_lea.vmem %s9287_s10, 4096 }
  0x85   : > { %895 = vmatprep.mubr.bf16.mxu0 %v600_v63  ;;  %v9633_v21 = vsel %vm9582_vm5, %v430_v13, %v395_v11  ;;  %v339_v63 = vrot.slane %v270_v46, 7  ;;  %v401_v28 = vrot.slane %v340_v59, 7  ;;  %p9289_p7 = scmp.lt.s32.totalorder %s11099_s17, %s9287_s10  ;;  %p9290_p9 = scmp.lt.s32.totalorder %s9288_s11, %s9282_s23 }
  0x86   : > { %v331_v23 = vrot.slane %v264_v12, 7  ;;  %v9644_v31 = vsel %vm446_vm2, %v9633_v21, 0  ;;  %p9285_p3 = pneg %p9284_p1 }
  0x87   : > { %876 = vmatpush1.bf16.msra.mxu0 %v8328_v15  ;;  %v273_v15 = vshrl.u32 %v242_v7, 16  ;;  %v587_v39 = vshll.u32 %v9644_v31, 16  ;;  %v342_v13 = vor.u32 %v340_v59, %v339_v63  ;;  %p9291_p12 = por %p9290_p9, %p9289_p7 }
  0x88   : > { %877 = vmatprep.subr.bf16.mxu0 %v8329_v18  ;;  %v336_v18 = vshll.u32 %v240_v0, 16  ;;  %v334_v36 = vor.u32 %v332_v24, %v331_v23  ;;  %v9668_v0 = vpack.c.bf16 %v227_v51, %v227_v51 }
  0x89   : > { %v343_v25 = vrot.slane %v273_v15, 7  ;;  %v589_v3 = vrot.slane %v587_v39, 1  ;;  %v229_v39 = vld [vmem:[%s9563_s30 + $0x50] sm:$0xff]  ;;  %p9292_p2 = pnand %p9291_p12, %p9285_p3 }
  0x8a   : > { %v338_v33 = vor.u32 %v336_v18, %v335_v17  ;;  %v434_v56 = vsel %vm9576_vm4, %v264_v12, %v334_v36  ;;  %v8356_v17 = vld [vmem:[#allocation5] ss:$8 sps:$4 sm:$0xff]  }
  0x8b   : > { %878 = vmatpush1.bf16.msra.mxu0 %v8331_v29  ;;  %v228_v29 = vld [vmem:[%s9563_s30 + $0x48] sm:$0xff]  ;;  %v9675_v4 = vsel %vm9582_vm5, %v434_v56, %v399_v50 }
  0x8c   : > { %879 = vmatprep.subr.bf16.mxu0 %v8332_v32  ;;  %v583_v32 = vshll.u32 %v9637_v22, 16  ;;  %v9647_v38 = vpack.c.bf16 %v228_v29, %v228_v29  ;;  %v435_v49 = vsel %vm9576_vm4, %v267_v9, %v338_v33  ;;  %v9690_v12 = vsel %vm446_vm2, %v9675_v4, 0 }
  0x8d   : > { %v348_v33 = vshll.u32 %v9668_v0, 16 }
  0x8e   : > { %v9652_v48 = vrot.slane %v583_v32, 1  ;;  %v279_v60 = vshrl.u32 %v9647_v38, 16  ;;  %v352_v11 = vshll.u32 %v9647_v38, 16  ;;  %v436_v32 = vsel %vm9576_vm4, %v270_v46, %v342_v13 }
  0x8f   : > { %880 = vmatpush1.bf16.msra.mxu0 %v8334_v40  ;;  %v400_v40 = vrot.slane %v336_v18, 7  ;;  %v601_v18 = vshrl.u32 %v9644_v31, 16 }
  0x90   : > { %881 = vmatprep.subr.bf16.mxu0 %v8335_v43  ;;  %v346_v43 = vor.u32 %v344_v27, %v343_v25  ;;  %v8359_v25 = vld [vmem:[#allocation5 + $0x10] ss:$8 sps:$4 sm:$0xff]   ;;  %v609_v27 = vshll.u32 %v9690_v12, 16  ;;  %v404_v50 = vrot.slane %v352_v11, 7 }
  0x91   : > { %v9664_v61 = vsel %vm9582_vm5, %v435_v49, %v400_v40  ;;  %v603_v36 = vor.u32 %v601_v18, %v589_v3  ;;  %v9720_v49 = vsel %vm9582_vm5, %v436_v32, %v401_v28  ;;  %v1270_v28 = vrot.slane %v9604_v45, 1 }
  0x92   : > { %v611_v46 = vrot.slane %v609_v27, 1  ;;  %v1267_v45 = vrot.slane %v9637_v22, 1 }
  0x93   : > { %882 = vmatpush1.bf16.msra.mxu0 %v8337_v52  ;;  %v8353_v52 = vld [vmem:[#allocation5 + $0x1f4] ss:$8 sps:$4 sm:$0xff]   ;;  %v9729_v59 = vsel %vm580_vm6, %v603_v36, %v9652_v48 }
  0x94   : > { %883 = vmatprep.subr.bf16.mxu0 %v8338_v55  ;;  %v605_v55 = vshrl.u32 %v9600_v44, 16 }
  0x96   : > { %v607_v7 = vor.u32 %v605_v55, %v9611_v54 }
  0x97   : > { %884 = vmatpush1.bf16.msra.mxu0 %v8340_v62  ;;  %v437_v62 = vsel %vm9576_vm4, %v273_v15, %v346_v43  ;;  %v276_v15 = vshrl.u32 %v9668_v0, 16  ;;  %v617_v43 = vshrl.u32 %v9690_v12, 16 }
  0x98   : > { %885 = vmatprep.subr.bf16.mxu0 %v8341_v2  ;;  %v9671_v2 = vor.u32 %v9652_v48, %v581_v47  ;;  %v9685_v9 = vsel %vm9582_vm5, %v437_v62, %v402_v58  ;;  %v232_v47 = vld [vmem:[%s9563_s30 + $0x68] sm:$0xff]  ;;  %v9725_v58 = vpack.c.bf16 %v229_v39, %v229_v39  ;;  %v8373_v39 = vld [vmem:[#allocation5 + $0x54] ss:$8 sps:$4 sm:$0xff]  }
  0x99   : > { %v9705_v24 = vsel %vm446_vm2, %v9685_v9, 0  ;;  %v8362_v62 = vld [vmem:[#allocation5 + $0x20] ss:$8 sps:$4 sm:$0xff]  }
  0x9a   : > { %v590_v54 = vsel %vm580_vm6, %v9671_v2, %v589_v3  ;;  %v627_v38 = vshll.u32 %v9705_v24, 16  ;;  %v8367_v3 = vld [vmem:[#allocation5 + $0x34] ss:$8 sps:$4 sm:$0xff]   ;;  %v9743_v48 = vsel %vm580_vm6, %v9671_v2, %v611_v46  ;;  %v356_v27 = vshll.u32 %v9725_v58, 16 }
  0x9b   : > { %886 = vmatpush1.bf16.msra.mxu0 %v8343_v8  ;;  %v9681_v8 = vsel %vm446_vm2, %v9664_v61, 0 }
  0x9c   : > { %887 = vmatprep.subr.bf16.mxu0 %v8344_v10  ;;  %v351_v10 = vrot.slane %v279_v60, 7  ;;  %v613_v23 = vshll.u32 %v9681_v8, 16  ;;  %v629_v0 = vrot.slane %v627_v38, 1 }
  0x9e   : > { %v354_v29 = vor.u32 %v352_v11, %v351_v10  ;;  %v615_v40 = vrot.slane %v613_v23, 1  ;;  %v8365_v10 = vld [vmem:[#allocation5 + $0x30] ss:$8 sps:$4 sm:$0xff]   ;;  %v8370_v11 = vld [vmem:[#allocation5 + $0x44] ss:$8 sps:$4 sm:$0xff]  }
  0x9f   : > { %888 = vmatpush1.bf16.msra.mxu0 %v8346_v16  ;;  %v9693_v16 = vpack.c.bf16 %v230_v5, %v230_v5  ;;  %v9739_v5 = vsel %vm446_vm2, %v9720_v49, 0 }
  0xa0   : > { %889 = vmatprep.subr.bf16.mxu0 %v8347_v20  ;;  %v9700_v20 = vsel %vm580_vm6, %v607_v7, %v9609_v53  ;;  %v347_v53 = vrot.slane %v276_v15, 7  ;;  %v439_v51 = vsel %vm9576_vm4, %v279_v60, %v354_v29  ;;  %v9735_v60 = vsel %vm580_vm6, %v9615_v57, %v615_v40 }
  0xa1   : > { %v360_v56 = vshll.u32 %v9693_v16, 16  ;;  %v403_v7 = vrot.slane %v348_v33, 7  ;;  %v619_v57 = vor.u32 %v617_v43, %v611_v46  ;;  %v620_v18 = vshll.u32 %v9739_v5, 16 }
  0xa3   : > { %890 = vmatpush1.bf16.msra.mxu0 %v8349_v30  ;;  %v8364_v30 = vld [vmem:[#allocation5 + $0x24] ss:$8 sps:$4 sm:$0xff]   ;;  %v622_v46 = vrot.slane %v620_v18, 1 }
  0xa4   : > { %891 = vmatprep.subr.bf16.mxu0 %v8350_v34  ;;  %v285_v34 = vshrl.u32 %v9693_v16, 16 }
  0xa6   : > { %v359_v55 = vrot.slane %v285_v34, 7 }
  0xa7   : > { %892 = vmatpush1.bf16.msra.mxu0 %v8352_v37  ;;  %v624_v37 = vshrl.u32 %v9681_v8, 16 }
  0xa8   : > { %893 = vmatprep.subr.bf16.mxu0 %v8353_v52  ;;  %v350_v52 = vor.u32 %v348_v33, %v347_v53  ;;  %v362_v16 = vor.u32 %v360_v56, %v359_v55  ;;  %v1271_v53 = vrot.slane %v9600_v44, 1  ;;  %v8368_v33 = vld [vmem:[#allocation5 + $0x40] ss:$8 sps:$4 sm:$0xff]   ;;  %v1268_v44 = vrot.slane %v9644_v31, 1 }
  0xa9   : > { %v626_v63 = vor.u32 %v624_v37, %v615_v40 }
  0xaa   : > { %v438_v13 = vsel %vm9576_vm4, %v276_v15, %v350_v52  ;;  %v441_v36 = vsel %vm9576_vm4, %v285_v34, %v362_v16  ;;  %v631_v52 = vshrl.u32 %v9739_v5, 16  ;;  %v9798_v55 = vsel %vm1266_vm7, %v1267_v45, %v1268_v44 }
  0xab   : > { %894 = vmatpush1.bf16.msra.mxu0 %v8355_v1  ;;  %v9731_v1 = vpack.c.bf16 %v232_v47, %v232_v47  ;;  %v9756_v2 = vsel %vm580_vm6, %v626_v63, %v629_v0  ;;  %v9770_v29 = vsel %vm9582_vm5, %v438_v13, %v403_v7  ;;  %v9784_v47 = vsel %vm1266_vm7, %v1270_v28, %v1271_v53  ;;  %v233_v13 = vld [vmem:[%s9563_s30 + $0x70] sm:$0xff] }
  0xac   : > { %1120 = vmatprep.subr.bf16.mxu0 %v8358_v6  ;;  %v9747_v6 = vsel %vm9582_vm5, %v439_v51, %v404_v50  ;;  %v9789_v50 = vsel %vm1266_vm7, %v1271_v53, %v1270_v28  ;;  %v1277_v51 = vrot.slane %v9681_v8, 1  ;;  %v9794_v22 = vsel %vm446_vm2, %v9770_v29, 0 }
  0xad   : > { %v291_v23 = vshrl.u32 %v9731_v1, 16  ;;  %v9764_v15 = vsel %vm446_vm2, %v9747_v6, 0  ;;  %v368_v38 = vshll.u32 %v9731_v1, 16  ;;  %v9801_v31 = vsel %vm1266_vm7, %v1268_v44, %v1267_v45 }
  0xae   : > { %896 = vmatmul.mubr.bf16.vlgmr.msra.gmra.mrb[0].mxu0 %v590_v54  ;;  %v282_v54 = vshrl.u32 %v9725_v58, 16  ;;  %v641_v34 = vshll.u32 %v9764_v15, 16  ;;  %v9810_v1 = vsel %vm1266_vm7, %v1270_v28, %v1277_v51  ;;  %v1275_v16 = vrot.slane %v9690_v12, 1 }
  0xaf   : > { %1121 = vmatpush1.bf16.msra.mxu0 %v8356_v17  ;;  %903 = vmatprep.mubr.bf16.mxu0 %v9700_v20  ;;  %v231_v17 = vld [vmem:[%s9563_s30 + $0x60] sm:$0xff]  ;;  %v367_v40 = vrot.slane %v291_v23, 7  ;;  %v405_v28 = vrot.slane %v356_v27, 7  ;;  %v408_v53 = vrot.slane %v368_v38, 7 }
  0xb0   : > { %1122 = vmatprep.subr.bf16.mxu0 %v8361_v19  ;;  %v638_v19 = vshrl.u32 %v9705_v24, 16  ;;  %v9772_v32 = vpack.c.bf16 %v231_v17, %v231_v17  ;;  %v355_v37 = vrot.slane %v282_v54, 7  ;;  %v9817_v17 = vsel %vm580_vm6, %v619_v57, %v622_v46 }
  0xb1   : > { %v643_v18 = vrot.slane %v641_v34, 1 }
  0xb2   : > { %v358_v8 = vor.u32 %v356_v27, %v355_v37  ;;  %v288_v63 = vshrl.u32 %v9772_v32, 16  ;;  %v640_v7 = vor.u32 %v638_v19, %v629_v0  ;;  %v364_v0 = vshll.u32 %v9772_v32, 16 }
  0xb3   : > { %1123 = vmatpush1.bf16.msra.mxu0 %v8359_v25  ;;  %v234_v25 = vld [vmem:[%s9563_s30 + $0x78] sm:$0xff]  ;;  %v9826_v19 = vsel %vm1266_vm7, %v1267_v45, %v1275_v16  ;;  %v1281_v27 = vrot.slane %v9705_v24, 1  ;;  %v1279_v45 = vrot.slane %v9739_v5, 1 }
  0xb4   : > { %1124 = vmatprep.subr.bf16.mxu0 %v8364_v30  ;;  %v406_v30 = vrot.slane %v360_v56, 7  ;;  %v9781_v43 = vpack.c.bf16 %v234_v25, %v234_v25  ;;  %v8371_v56 = vld [vmem:[#allocation5 + $0x50] ss:$8 sps:$4 sm:$0xff]   ;;  %v634_v25 = vshll.u32 %v9794_v22, 16  ;;  %v440_v12 = vsel %vm9576_vm4, %v282_v54, %v358_v8 }
  0xb5   : > { %v363_v57 = vrot.slane %v288_v63, 7  ;;  %v9840_v58 = vsel %vm580_vm6, %v640_v7, %v643_v18  ;;  %v652_v54 = vshrl.u32 %v9764_v15, 16  ;;  %v9845_v24 = vsel %vm1266_vm7, %v1277_v51, %v1281_v27 }
  0xb6   : > { %904 = vmatmul.mubr.bf16.gmra.mrb[4].mxu0 %v9729_v59  ;;  %v376_v32 = vshll.u32 %v9781_v43, 16  ;;  %v633_v51 = vor.u32 %v631_v52, %v622_v46  ;;  %v636_v8 = vrot.slane %v634_v25, 1 }
  0xb7   : > { %1125 = vmatpush1.bf16.msra.mxu0 %v8362_v62  ;;  %911 = vmatprep.mubr.bf16.mxu0 %v9735_v60  ;;  %v9806_v62 = vsel %vm9582_vm5, %v441_v36, %v406_v30  ;;  %v9832_v36 = vpack.c.bf16 %v233_v13, %v233_v13  ;;  %v366_v44 = vor.u32 %v364_v0, %v363_v57  ;;  %v1285_v57 = vrot.slane %v9764_v15, 1 }
  0xb8   : > { %1126 = vmatprep.subr.bf16.mxu0 %v8367_v3  ;;  %v8376_v3 = vld [vmem:[#allocation5 + $0x64] ss:$8 sps:$4 sm:$0xff]   ;;  %v9822_v30 = vsel %vm446_vm2, %v9806_v62, 0  ;;  %v410_v25 = vrot.slane %v376_v32, 7 }
  0xb9   : > { %v294_v34 = vshrl.u32 %v9832_v36, 16  ;;  %v372_v46 = vshll.u32 %v9832_v36, 16  ;;  %v442_v52 = vsel %vm9576_vm4, %v288_v63, %v366_v44  ;;  %v8385_v36 = vld [vmem:[#allocation5 + $0x94] ss:$8 sps:$4 sm:$0xff]   ;;  %v666_v63 = vshrl.u32 %v9822_v30, 16 }
  0xbb   : > { %1127 = vmatpush1.bf16.msra.mxu0 %v8365_v10  ;;  %v370_v10 = vor.u32 %v368_v38, %v367_v40  ;;  %v655_v40 = vshll.u32 %v9822_v30, 16 }
  0xbc   : > { %1128 = vmatprep.subr.bf16.mxu0 %v8370_v11  ;;  %v297_v11 = vshrl.u32 %v9781_v43, 16  ;;  %v9852_v43 = vsel %vm1266_vm7, %v1275_v16, %v1279_v45 }
  0xbd   : > { %v443_v37 = vsel %vm9576_vm4, %v291_v23, %v370_v10  ;;  %v9849_v23 = vsel %vm9582_vm5, %v440_v12, %v405_v28  ;;  %v654_v10 = vor.u32 %v652_v54, %v643_v18  ;;  %v657_v13 = vrot.slane %v655_v40, 1 }
  0xbe   : > { %912 = vmatmul.mubr.bf16.gmra.mrb[8].mxu0 %v9743_v48  ;;  %v375_v38 = vrot.slane %v297_v11, 7  ;;  %v9857_v5 = vsel %vm9582_vm5, %v443_v37, %v408_v53  ;;  %v9863_v16 = vsel %vm446_vm2, %v9849_v23, 0  ;;  %v645_v28 = vshrl.u32 %v9794_v22, 16  ;;  %v8380_v53 = vld [vmem:[#allocation5 + $0x80] ss:$8 sps:$4 sm:$0xff]  }
  0xbf   : > { %1129 = vmatpush1.bf16.msra.mxu0 %v8368_v33  ;;  %919 = vmatprep.mubr.bf16.mxu0 %v9756_v2  ;;  %v8374_v33 = vld [vmem:[#allocation5 + $0x60] ss:$8 sps:$4 sm:$0xff]   ;;  %v407_v12 = vrot.slane %v364_v0, 7  ;;  %v371_v18 = vrot.slane %v294_v34, 7  ;;  %v9875_v37 = vsel %vm580_vm6, %v633_v51, %v636_v8  ;;  %v1283_v0 = vrot.slane %v9794_v22, 1 }
  0xc0   : > { %1130 = vmatprep.subr.bf16.mxu0 %v8373_v39  ;;  %v8379_v39 = vld [vmem:[#allocation5 + $0x74] ss:$8 sps:$4 sm:$0xff]   ;;  %v378_v7 = vor.u32 %v376_v32, %v375_v38  ;;  %v648_v38 = vshll.u32 %v9863_v16, 16  ;;  %v9882_v54 = vsel %vm580_vm6, %v654_v10, %v657_v13  ;;  %v9887_v32 = vsel %vm1266_vm7, %v1281_v27, %v1285_v57 }
  0xc1   : > { %v9891_v40 = vsel %vm9582_vm5, %v442_v52, %v407_v12  ;;  %v374_v44 = vor.u32 %v372_v46, %v371_v18  ;;  %v647_v27 = vor.u32 %v645_v28, %v636_v8  ;;  %v8386_v12 = vld [vmem:[#allocation5 + $0xa0] ss:$8 sps:$4 sm:$0xff]   ;;  %v11163_v8 = vrot.slane %v9822_v30, 1 }
  0xc2   : > { %v650_v51 = vrot.slane %v648_v38, 1  ;;  %v659_v28 = vshrl.u32 %v9863_v16, 16  ;;  %v11162_v38 = vrot.slane %v9863_v16, 1 }
  0xc3   : > { %1131 = vmatpush1.bf16.msra.mxu0 %v8371_v56  ;;  %v8377_v56 = vld [vmem:[#allocation5 + $0x70] ss:$8 sps:$4 sm:$0xff]  }
  0xc4   : > { %1132 = vmatprep.subr.bf16.mxu0 %v8376_v3  ;;  %v8382_v3 = vld [vmem:[#allocation5 + $0x84] ss:$8 sps:$4 sm:$0xff]  }
  0xc6   : > { %920 = vmatmul.mubr.bf16.gmra.mrb[12].mxu0 %v9817_v17 }
  0xc7   : > { %1133 = vmatpush1.bf16.msra.mxu0 %v8374_v33  ;;  %927 = vmatprep.mubr.bf16.mxu0 %v9840_v58  ;;  %v9868_v33 = vsel %vm446_vm2, %v9857_v5, 0 }
  0xc8   : > { %1134 = vmatprep.subr.bf16.mxu0 %v8379_v39  ;;  %v445_v39 = vsel %vm9576_vm4, %v297_v11, %v378_v7  ;;  %v669_v15 = vshll.u32 %v9868_v33, 16  ;;  %v9894_v11 = vsel %vm1266_vm7, %v1279_v45, %v1283_v0  ;;  %v668_v7 = vor.u32 %v666_v63, %v657_v13 }
  0xc9   : > { %v9899_v22 = vsel %vm9582_vm5, %v445_v39, %v410_v25  ;;  %v9906_v45 = vsel %vm446_vm2, %v9891_v40, 0  ;;  %v444_v25 = vsel %vm9576_vm4, %v294_v34, %v374_v44  ;;  %v9916_v13 = vsel %vm580_vm6, %v647_v27, %v650_v51  ;;  %v8391_v39 = vld [vmem:[#allocation5 + $0xb4] ss:$8 sps:$4 sm:$0xff]  }
  0xca   : > { %v9902_v10 = vrot.slane %v669_v15, 1  ;;  %v9910_v52 = vsel %vm446_vm2, %v9899_v22, 0  ;;  %v662_v18 = vshll.u32 %v9906_v45, 16  ;;  %v680_v34 = vshrl.u32 %v9868_v33, 16 }
  0xcb   : > { %1135 = vmatpush1.bf16.msra.mxu0 %v8377_v56  ;;  %v8383_v56 = vld [vmem:[#allocation5 + $0x90] ss:$8 sps:$4 sm:$0xff]   ;;  %v9930_v63 = vsel %vm1266_vm7, %v1285_v57, %v11163_v8  ;;  %v9939_v44 = vsel %vm1266_vm7, %v1283_v0, %v11162_v38  ;;  %v661_v27 = vor.u32 %v659_v28, %v650_v51  ;;  %v8394_v57 = vld [vmem:[#allocation5 + $0xc4] ss:$8 sps:$4 sm:$0xff]   ;;  %v673_v51 = vshrl.u32 %v9906_v45, 16 }
  0xcc   : > { %1136 = vmatprep.subr.bf16.mxu0 %v8382_v3  ;;  %v8388_v3 = vld [vmem:[#allocation5 + $0xa4] ss:$8 sps:$4 sm:$0xff]   ;;  %v8403_v8 = vld [vmem:[#allocation5 + $0xf4] ss:$8 sps:$4 sm:$0xff]  }
  0xce   : > { %928 = vmatmul.mubr.bf16.gmra.mrb[16].mxu0 %v9875_v37 }
  0xcf   : > { %1137 = vmatpush1.bf16.msra.mxu0 %v8380_v53  ;;  %935 = vmatprep.mubr.bf16.mxu0 %v9882_v54  ;;  %v409_v53 = vrot.slane %v372_v46, 7  ;;  %v9923_v46 = vsel %vm580_vm6, %v668_v7, %v9902_v10  ;;  %v9946_v7 = vor.u32 %v680_v34, %v9902_v10  ;;  %v8395_v34 = vld [vmem:[#allocation5 + $0xd0] ss:$8 sps:$4 sm:$0xff]  }
  0xd0   : > { %1138 = vmatprep.subr.bf16.mxu0 %v8385_v36  ;;  %v683_v36 = vshll.u32 %v9910_v52, 16 }
  0xd1   : > { %v9934_v15 = vsel %vm9582_vm5, %v444_v25, %v409_v53  ;;  %v8392_v25 = vld [vmem:[#allocation5 + $0xc0] ss:$8 sps:$4 sm:$0xff]  }
  0xd2   : > { %v9948_v53 = vrot.slane %v683_v36, 1  ;;  %v9952_v0 = vsel %vm446_vm2, %v9934_v15, 0 }
  0xd3   : > { %1139 = vmatpush1.bf16.msra.mxu0 %v8383_v56  ;;  %v8389_v56 = vld [vmem:[#allocation5 + $0xb0] ss:$8 sps:$4 sm:$0xff]   ;;  %v676_v28 = vshll.u32 %v9952_v0, 16 }
  0xd4   : > { %1140 = vmatprep.subr.bf16.mxu0 %v8388_v3  ;;  %v9943_v3 = vrot.slane %v662_v18, 1  ;;  %v8397_v18 = vld [vmem:[#allocation5 + $0xd4] ss:$8 sps:$4 sm:$0xff]  }
  0xd6   : > { %936 = vmatmul.mubr.bf16.gmra.mrb[20].mxu0 %v9916_v13  ;;  %v9968_v36 = vor.u32 %v673_v51, %v9943_v3  ;;  %v8406_v51 = vld [vmem:[#allocation5 + $0x204] ss:$8 sps:$4 sm:$0xff]  }
  0xd7   : > { %1141 = vmatpush1.bf16.msra.mxu0 %v8386_v12  ;;  %943 = vmatprep.mubr.bf16.mxu0 %v9923_v46  ;;  %v9956_v12 = vsel %vm580_vm6, %v661_v27, %v9943_v3  ;;  %v8400_v27 = vld [vmem:[#allocation5 + $0xe4] ss:$8 sps:$4 sm:$0xff]  }
  0xd8   : > { %1142 = vmatprep.subr.bf16.mxu0 %v8391_v39  ;;  %v9963_v39 = vsel %vm580_vm6, %v9946_v7, %v9948_v53 }
  0xdb   : > { %1143 = vmatpush1.bf16.msra.mxu0 %v8389_v56  ;;  %v9970_v56 = vrot.slane %v676_v28, 1  ;;  %v8404_v28 = vld [vmem:[#allocation5 + $0x200] ss:$8 sps:$4 sm:$0xff]  }
  0xdc   : > { %1144 = vmatprep.subr.bf16.mxu0 %v8394_v57  ;;  %v8398_v57 = vld [vmem:[#allocation5 + $0xe0] ss:$8 sps:$4 sm:$0xff]  }
  0xdd   : > { %v9975_v38 = vsel %vm580_vm6, %v9968_v36, %v9970_v56 }
  0xde   : > { %944 = vmatmul.mubr.bf16.gmra.mrb[24].mxu0 %v9956_v12 }
  0xdf   : > { %1145 = vmatpush1.bf16.msra.mxu0 %v8392_v25  ;;  %951 = vmatprep.mubr.bf16.mxu0 %v9963_v39  ;;  %v8401_v25 = vld [vmem:[#allocation5 + $0xf0] ss:$8 sps:$4 sm:$0xff]  }
  0xe0   : > { %1146 = vmatprep.subr.bf16.mxu0 %v8397_v18  ;;  %v8409_v18 = vld [vmem:[#allocation5 + $0x214] ss:$8 sps:$4 sm:$0xff]  }
  0xe3   : > { %1147 = vmatpush1.bf16.msra.mxu0 %v8395_v34  ;;  %v8407_v34 = vld [vmem:[#allocation5 + $0x210] ss:$8 sps:$4 sm:$0xff]  }
  0xe4   : > { %1148 = vmatprep.subr.bf16.mxu0 %v8400_v27  ;;  %v8412_v27 = vld [vmem:[#allocation5 + $0x224] ss:$8 sps:$4 sm:$0xff]  }
  0xe6   : > { %952 = vmatmul.mubr.bf16.gmra.mrb[28].mxu0 %v9975_v38 }
  0xe7   : > { %1149 = vmatpush1.bf16.msra.mxu0 %v8398_v57  ;;  %7107 = vmatprep.mubr.msk.bf16.mxu0 %vm446_vm2, %v9596_v42  ;;  %v8410_v57 = vld [vmem:[#allocation5 + $0x220] ss:$8 sps:$4 sm:$0xff]  }
  0xe8   : > { %1150 = vmatprep.subr.bf16.mxu0 %v8403_v8  ;;  %v8413_v8 = vld [vmem:[#allocation5 + $0x230] ss:$8 sps:$4 sm:$0xff]  }
  0xeb   : > { %1151 = vmatpush1.bf16.msra.mxu0 %v8401_v25  ;;  %v8418_v25 = vld [vmem:[#allocation5 + $0x244] ss:$8 sps:$4 sm:$0xff]  }
  0xec   : > { %1475 = vmatprep.subr.bf16.mxu0 %v8406_v51  ;;  %v8416_v51 = vld [vmem:[#allocation5 + $0x240] ss:$8 sps:$4 sm:$0xff]  }
  0xee   : > { %7108 = vmatmul.mubr.msk.bf16.vlgmr.msra.gmra.mrb[0].mxu0 %vm446_vm2, %v9628_v14 }
  0xef   : > { %1476 = vmatpush1.bf16.msra.mxu0 %v8404_v28  ;;  %7109 = vmatprep.mubr.msk.bf16.mxu0 %vm446_vm2, %v9592_v41  ;;  %v8421_v28 = vld [vmem:[#allocation5 + $0x254] ss:$8 sps:$4 sm:$0xff]  }
  0xf0   : > { %1477 = vmatprep.subr.bf16.mxu0 %v8409_v18  ;;  %v8419_v18 = vld [vmem:[#allocation5 + $0x250] ss:$8 sps:$4 sm:$0xff]  }
  0xf3   : > { %1478 = vmatpush1.bf16.msra.mxu0 %v8407_v34  ;;  %v8424_v34 = vld [vmem:[#allocation5 + $0x264] ss:$8 sps:$4 sm:$0xff]  }
  0xf4   : > { %1479 = vmatprep.subr.bf16.mxu0 %v8412_v27  ;;  %v8422_v27 = vld [vmem:[#allocation5 + $0x260] ss:$8 sps:$4 sm:$0xff]  }
  0xf6   : > { %7110 = vmatmul.mubr.msk.bf16.gmra.mrb[4].mxu0 %vm446_vm2, %v9633_v21 }
  0xf7   : > { %1480 = vmatpush1.bf16.msra.mxu0 %v8410_v57  ;;  %7111 = vmatprep.mubr.msk.bf16.mxu0 %vm446_vm2, %v9596_v42  ;;  %v8427_v57 = vld [vmem:[#allocation5 + $0x274] ss:$8 sps:$4 sm:$0xff]  }
  0xf8   : > { %1481 = vmatprep.subr.bf16.mxu0 %v8415_v35  ;;  %v8425_v35 = vld [vmem:[#allocation5 + $0x270] ss:$8 sps:$4 sm:$0xff]  }
  0xfb   : > { %1482 = vmatpush1.bf16.msra.mxu0 %v8413_v8  ;;  %v8430_v8 = vld [vmem:[#allocation5 + $0x284] ss:$8 sps:$4 sm:$0xff]  }
  0xfc   : > { %1483 = vmatprep.subr.bf16.mxu0 %v8418_v25  ;;  %v8428_v25 = vld [vmem:[#allocation5 + $0x280] ss:$8 sps:$4 sm:$0xff]  }
  0xfe   : > { %7112 = vmatmul.mubr.msk.bf16.gmra.mrb[8].mxu0 %vm446_vm2, %v9628_v14 }
  0xff   : > { %1484 = vmatpush1.bf16.msra.mxu0 %v8416_v51  ;;  %7113 = vmatprep.mubr.msk.bf16.mxu0 %vm446_vm2, %v9664_v61  ;;  %v8433_v51 = vld [vmem:[#allocation5 + $0x294] ss:$8 sps:$4 sm:$0xff]  }
 0x100   : > { %1485 = vmatprep.subr.bf16.mxu0 %v8421_v28  ;;  %v8431_v28 = vld [vmem:[#allocation5 + $0x290] ss:$8 sps:$4 sm:$0xff]  }
 0x103   : > { %1486 = vmatpush1.bf16.msra.mxu0 %v8419_v18  ;;  %v8436_v18 = vld [vmem:[#allocation5 + $0x2a4] ss:$8 sps:$4 sm:$0xff]  }
 0x104   : > { %1487 = vmatprep.subr.bf16.mxu0 %v8424_v34  ;;  %v8434_v34 = vld [vmem:[#allocation5 + $0x2a0] ss:$8 sps:$4 sm:$0xff]  }
 0x106   : > { %7114 = vmatmul.mubr.msk.bf16.gmra.mrb[12].mxu0 %vm446_vm2, %v9675_v4 }
 0x107   : > { %1488 = vmatpush1.bf16.msra.mxu0 %v8422_v27  ;;  %7115 = vmatprep.mubr.msk.bf16.mxu0 %vm446_vm2, %v9685_v9  ;;  %v8439_v27 = vld [vmem:[#allocation5 + $0x2b4] ss:$8 sps:$4 sm:$0xff]  }
 0x108   : > { %1489 = vmatprep.subr.bf16.mxu0 %v8427_v57  ;;  %v8437_v57 = vld [vmem:[#allocation5 + $0x2b0] ss:$8 sps:$4 sm:$0xff]  }
 0x10b   : > { %1490 = vmatpush1.bf16.msra.mxu0 %v8425_v35  ;;  %v8442_v35 = vld [vmem:[#allocation5 + $0x2c4] ss:$8 sps:$4 sm:$0xff]  }
 0x10c   : > { %1491 = vmatprep.subr.bf16.mxu0 %v8430_v8  ;;  %v8440_v8 = vld [vmem:[#allocation5 + $0x2c0] ss:$8 sps:$4 sm:$0xff]  }
 0x10e   : > { %7116 = vmatmul.mubr.msk.bf16.gmra.mrb[16].mxu0 %vm446_vm2, %v9720_v49 }
 0x10f   : > { %1492 = vmatpush1.bf16.msra.mxu0 %v8428_v25  ;;  %7117 = vmatprep.mubr.msk.bf16.mxu0 %vm446_vm2, %v9747_v6  ;;  %v8445_v25 = vld [vmem:[#allocation5 + $0x2d4] ss:$8 sps:$4 sm:$0xff]  }
 0x110   : > { %1493 = vmatprep.subr.bf16.mxu0 %v8433_v51  ;;  %v8443_v51 = vld [vmem:[#allocation5 + $0x2d0] ss:$8 sps:$4 sm:$0xff]  }
 0x113   : > { %1494 = vmatpush1.bf16.msra.mxu0 %v8431_v28  ;;  %v8448_v28 = vld [vmem:[#allocation5 + $0x2e4] ss:$8 sps:$4 sm:$0xff]  }
 0x114   : > { %1495 = vmatprep.subr.bf16.mxu0 %v8436_v18  ;;  %v8446_v18 = vld [vmem:[#allocation5 + $0x2e0] ss:$8 sps:$4 sm:$0xff]  }
 0x116   : > { %7118 = vmatmul.mubr.msk.bf16.gmra.mrb[20].mxu0 %vm446_vm2, %v9770_v29 }
 0x117   : > { %1496 = vmatpush1.bf16.msra.mxu0 %v8434_v34  ;;  %7119 = vmatprep.mubr.msk.bf16.mxu0 %vm446_vm2, %v9806_v62  ;;  %v8451_v34 = vld [vmem:[#allocation5 + $0x2f4] ss:$8 sps:$4 sm:$0xff]  }
 0x118   : > { %1497 = vmatprep.subr.bf16.mxu0 %v8439_v27  ;;  %v8449_v27 = vld [vmem:[#allocation5 + $0x2f0] ss:$8 sps:$4 sm:$0xff]  }
 0x11b   : > { %1498 = vmatpush1.bf16.msra.mxu0 %v8437_v57  ;;  %v8454_v57 = vld [vmem:[#allocation5 + $0x304] ss:$8 sps:$4 sm:$0xff]  }
 0x11c   : > { %1499 = vmatprep.subr.bf16.mxu0 %v8442_v35  ;;  %v8452_v35 = vld [vmem:[#allocation5 + $0x300] ss:$8 sps:$4 sm:$0xff]  }
 0x11e   : > { %7120 = vmatmul.mubr.msk.bf16.gmra.mrb[24].mxu0 %vm446_vm2, %v9849_v23 }
 0x11f   : > { %1500 = vmatpush1.bf16.msra.mxu0 %v8440_v8  ;;  %7121 = vmatprep.mubr.msk.bf16.mxu0 %vm446_vm2, %v9857_v5  ;;  %v8457_v8 = vld [vmem:[#allocation5 + $0x314] ss:$8 sps:$4 sm:$0xff]  }
 0x120   : > { %1501 = vmatprep.subr.bf16.mxu0 %v8445_v25  ;;  %v8455_v25 = vld [vmem:[#allocation5 + $0x310] ss:$8 sps:$4 sm:$0xff]  }
 0x123   : > { %1502 = vmatpush1.bf16.msra.mxu0 %v8443_v51  ;;  %v8460_v51 = vld [vmem:[#allocation5 + $0x324] ss:$8 sps:$4 sm:$0xff]  }
 0x124   : > { %1503 = vmatprep.subr.bf16.mxu0 %v8448_v28  ;;  %v8458_v28 = vld [vmem:[#allocation5 + $0x320] ss:$8 sps:$4 sm:$0xff]  }
 0x126   : > { %7122 = vmatmul.mubr.msk.bf16.gmra.mrb[28].mxu0 %vm446_vm2, %v9891_v40 }
 0x127   : > { %1504 = vmatpush1.bf16.msra.mxu0 %v8446_v18  ;;  %1507 = vmatprep.mubr.bf16.mxu0 %v9784_v47  ;;  %v8463_v18 = vld [vmem:[#allocation5 + $0x334] ss:$8 sps:$4 sm:$0xff]   ;;  %v8461_v47 = vld [vmem:[#allocation5 + $0x330] ss:$8 sps:$4 sm:$0xff]  }
 0x128   : > { %1505 = vmatprep.subr.bf16.mxu0 %v8451_v34  ;;  %v8466_v34 = vld [vmem:[#allocation5 + $0x344] ss:$8 sps:$4 sm:$0xff]  }
 0x12b   : > { %1506 = vmatpush1.bf16.msra.mxu0 %v8449_v27  ;;  %v8464_v27 = vld [vmem:[#allocation5 + $0x340] ss:$8 sps:$4 sm:$0xff]  }
 0x12c   : > { %1781 = vmatprep.subr.bf16.mxu0 %v8454_v57  ;;  %v8467_v57 = vld [vmem:[#allocation5 + $0x350] ss:$8 sps:$4 sm:$0xff]  }
 0x12e   : > { %1508 = vmatmul.mubr.bf16.vlgmr.msra.gmra.mrb[0].mxu0 %v9798_v55  ;;  %v8469_v55 = vld [vmem:[#allocation5 + $0x354] ss:$8 sps:$4 sm:$0xff]  }
 0x12f   : > { %1782 = vmatpush1.bf16.msra.mxu0 %v8452_v35  ;;  %1515 = vmatprep.mubr.bf16.mxu0 %v9789_v50  ;;  %v8472_v35 = vld [vmem:[#allocation5 + $0x364] ss:$8 sps:$4 sm:$0xff]  }
 0x130   : > { %1783 = vmatprep.subr.bf16.mxu0 %v8457_v8  ;;  %v8470_v8 = vld [vmem:[#allocation5 + $0x360] ss:$8 sps:$4 sm:$0xff]  }
 0x133   : > { %1784 = vmatpush1.bf16.msra.mxu0 %v8455_v25  ;;  %v8475_v25 = vld [vmem:[#allocation5 + $0x374] ss:$8 sps:$4 sm:$0xff]  }
 0x134   : > { %1785 = vmatprep.subr.bf16.mxu0 %v8460_v51  ;;  %v8473_v51 = vld [vmem:[#allocation5 + $0x370] ss:$8 sps:$4 sm:$0xff]  }
 0x136   : > { %1516 = vmatmul.mubr.bf16.gmra.mrb[4].mxu0 %v9801_v31 }
 0x137   : > { %1786 = vmatpush1.bf16.msra.mxu0 %v8458_v28  ;;  %1523 = vmatprep.mubr.bf16.mxu0 %v9810_v1  ;;  %v8478_v28 = vld [vmem:[#allocation5 + $0x384] ss:$8 sps:$4 sm:$0xff]  }
 0x138   : > { %1787 = vmatprep.subr.bf16.mxu0 %v8463_v18  ;;  %v8476_v18 = vld [vmem:[#allocation5 + $0x380] ss:$8 sps:$4 sm:$0xff]  }
 0x13b   : > { %1788 = vmatpush1.bf16.msra.mxu0 %v8461_v47  ;;  %v8481_v47 = vld [vmem:[#allocation5 + $0x394] ss:$8 sps:$4 sm:$0xff]  }
 0x13c   : > { %1789 = vmatprep.subr.bf16.mxu0 %v8466_v34  ;;  %v8479_v34 = vld [vmem:[#allocation5 + $0x390] ss:$8 sps:$4 sm:$0xff]  }
 0x13e   : > { %1524 = vmatmul.mubr.bf16.gmra.mrb[8].mxu0 %v9826_v19 }
 0x13f   : > { %1790 = vmatpush1.bf16.msra.mxu0 %v8464_v27  ;;  %1531 = vmatprep.mubr.bf16.mxu0 %v9845_v24  ;;  %v8484_v27 = vld [vmem:[#allocation5 + $0x3a4] ss:$8 sps:$4 sm:$0xff]  }
 0x140   : > { %1791 = vmatprep.subr.bf16.mxu0 %v8469_v55  ;;  %v10022_v55 = vrot.slane %v9868_v33, 1  ;;  %v8490_v33 = vld [vmem:[#allocation5 + $0x3c4] ss:$8 sps:$4 sm:$0xff]  }
 0x143   : > { %1792 = vmatpush1.bf16.msra.mxu0 %v8467_v57  ;;  %v8482_v57 = vld [vmem:[#allocation5 + $0x3a0] ss:$8 sps:$4 sm:$0xff]  }
 0x144   : > { %1793 = vmatprep.subr.bf16.mxu0 %v8472_v35  ;;  %v8487_v35 = vld [vmem:[#allocation5 + $0x3b4] ss:$8 sps:$4 sm:$0xff]  }
 0x146   : > { %1532 = vmatmul.mubr.bf16.gmra.mrb[12].mxu0 %v9852_v43 }
 0x147   : > { %1794 = vmatpush1.bf16.msra.mxu0 %v8470_v8  ;;  %1539 = vmatprep.mubr.bf16.mxu0 %v9887_v32  ;;  %v11187_v8 = vrot.slane %v9822_v30, 1  ;;  %v11188_v30 = vrot.slane %v9863_v16, 1  ;;  %v8496_v16 = vld [vmem:[#allocation5 + $0x3e4] ss:$8 sps:$4 sm:$0xff]  }
 0x148   : > { %1795 = vmatprep.subr.bf16.mxu0 %v8475_v25 }
 0x149   : > { %v10028_v25 = vsel %vm1266_vm7, %v11187_v8, %v10022_v55  ;;  %v8494_v8 = vld [vmem:[#allocation5 + $0x3e0] ss:$8 sps:$4 sm:$0xff]  }
 0x14b   : > { %1796 = vmatpush1.bf16.msra.mxu0 %v8473_v51  ;;  %v8485_v51 = vld [vmem:[#allocation5 + $0x3b0] ss:$8 sps:$4 sm:$0xff]  }
 0x14c   : > { %1797 = vmatprep.subr.bf16.mxu0 %v8478_v28  ;;  %v10033_v28 = vrot.slane %v9906_v45, 1 }
 0x14e   : > { %1540 = vmatmul.mubr.bf16.gmra.mrb[16].mxu0 %v9894_v11 }
 0x14f   : > { %1798 = vmatpush1.bf16.msra.mxu0 %v8476_v18  ;;  %1547 = vmatprep.mubr.bf16.mxu0 %v9930_v63  ;;  %v1297_v18 = vrot.slane %v9910_v52, 1 }
 0x150   : > { %1799 = vmatprep.subr.bf16.mxu0 %v8481_v47  ;;  %v8488_v47 = vld [vmem:[#allocation5 + $0x3c0] ss:$8 sps:$4 sm:$0xff]  }
 0x151   : > { %v10046_v45 = vsel %vm1266_vm7, %v10022_v55, %v1297_v18 }
 0x153   : > { %1800 = vmatpush1.bf16.msra.mxu0 %v8479_v34  ;;  %v10040_v34 = vsel %vm1266_vm7, %v11188_v30, %v10033_v28  ;;  %v8502_v30 = vld [vmem:[#allocation5 + $0x404] ss:$8 sps:$4 sm:$0xff]  }
 0x154   : > { %1801 = vmatprep.subr.bf16.mxu0 %v8484_v27  ;;  %v8493_v27 = vld [vmem:[#allocation5 + $0x3d4] ss:$8 sps:$4 sm:$0xff]  }
 0x156   : > { %1548 = vmatmul.mubr.bf16.gmra.mrb[20].mxu0 %v9939_v44 }
 0x157   : > { %1802 = vmatpush1.bf16.msra.mxu0 %v8482_v57  ;;  %1555 = vmatprep.mubr.bf16.mxu0 %v10028_v25  ;;  %v8491_v57 = vld [vmem:[#allocation5 + $0x3d0] ss:$8 sps:$4 sm:$0xff]  }
 0x158   : > { %1803 = vmatprep.subr.bf16.mxu0 %v8487_v35  ;;  %v11166_v35 = vrot.slane %v9952_v0, 1 }
 0x15b   : > { %1804 = vmatpush1.bf16.msra.mxu0 %v8485_v51  ;;  %v10055_v51 = vsel %vm1266_vm7, %v10033_v28, %v11166_v35  ;;  %v8503_v35 = vld [vmem:[#allocation5 + $0x410] ss:$8 sps:$4 sm:$0xff]  }
 0x15c   : > { %1805 = vmatprep.subr.bf16.mxu0 %v8490_v33  ;;  %v8499_v33 = vld [vmem:[#allocation5 + $0x3f4] ss:$8 sps:$4 sm:$0xff]  }
 0x15e   : > { %1556 = vmatmul.mubr.bf16.gmra.mrb[24].mxu0 %v10040_v34 }
 0x15f   : > { %1806 = vmatpush1.bf16.msra.mxu0 %v8488_v47  ;;  %1563 = vmatprep.mubr.bf16.mxu0 %v10046_v45  ;;  %v8497_v47 = vld [vmem:[#allocation5 + $0x3f0] ss:$8 sps:$4 sm:$0xff]  }
 0x160   : > { %1807 = vmatprep.subr.bf16.mxu0 %v8493_v27  ;;  %v8500_v27 = vld [vmem:[#allocation5 + $0x400] ss:$8 sps:$4 sm:$0xff]  }
 0x163   : > { %1808 = vmatpush1.bf16.msra.mxu0 %v8491_v57  ;;  %v8505_v57 = vld [vmem:[#allocation5 + $0x414] ss:$8 sps:$4 sm:$0xff]  }
 0x164   : > { %1809 = vmatprep.subr.bf16.mxu0 %v8496_v16  ;;  %v8508_v16 = vld [vmem:[#allocation5 + $0x424] ss:$8 sps:$4 sm:$0xff]  }
 0x166   : > { %1564 = vmatmul.mubr.bf16.gmra.mrb[28].mxu0 %v10055_v51 }
 0x167   : > { %1810 = vmatpush1.bf16.msra.mxu0 %v8494_v8  ;;  %7187 = vmatprep.mubr.msk.bf16.mxu0 %vm446_vm2, %v9592_v41  ;;  %v8506_v8 = vld [vmem:[#allocation5 + $0x420] ss:$8 sps:$4 sm:$0xff]   ;;  %v8511_v41 = vld [vmem:[#allocation5 + $0x434] ss:$8 sps:$4 sm:$0xff]  }
 0x168   : > { %1811 = vmatprep.subr.bf16.mxu0 %v8499_v33  ;;  %v8509_v33 = vld [vmem:[#allocation5 + $0x430] ss:$8 sps:$4 sm:$0xff]  }
 0x16b   : > { %1812 = vmatpush1.bf16.msra.mxu0 %v8497_v47  ;;  %v8512_v47 = vld [vmem:[#allocation5 + $0x440] ss:$8 sps:$4 sm:$0xff]  }
 0x16c   : > { %2097 = vmatprep.subr.bf16.mxu0 %v8502_v30  ;;  %v8517_v30 = vld [vmem:[#allocation5 + $0x454] ss:$8 sps:$4 sm:$0xff]  }
 0x16e   : > { %7188 = vmatmul.mubr.msk.bf16.vlgmr.msra.gmra.mrb[0].mxu0 %vm446_vm2, %v9633_v21  ;;  %v8514_v21 = vld [vmem:[#allocation5 + $0x444] ss:$8 sps:$4 sm:$0xff]  }
 0x16f   : > { %2098 = vmatpush1.bf16.msra.mxu0 %v8500_v27  ;;  %7189 = vmatprep.mubr.msk.bf16.mxu0 %vm446_vm2, %v9596_v42  ;;  %v8520_v27 = vld [vmem:[#allocation5 + $0x464] ss:$8 sps:$4 sm:$0xff]  }
 0x170   : > { %2099 = vmatprep.subr.bf16.mxu0 %v8505_v57  ;;  %v8518_v57 = vld [vmem:[#allocation5 + $0x460] ss:$8 sps:$4 sm:$0xff]  }
 0x173   : > { %2100 = vmatpush1.bf16.msra.mxu0 %v8503_v35  ;;  %v8515_v35 = vld [vmem:[#allocation5 + $0x450] ss:$8 sps:$4 sm:$0xff]  }
 0x174   : > { %2101 = vmatprep.subr.bf16.mxu0 %v8508_v16  ;;  %v8523_v16 = vld [vmem:[#allocation5 + $0x474] ss:$8 sps:$4 sm:$0xff]  }
 0x176   : > { %7190 = vmatmul.mubr.msk.bf16.gmra.mrb[4].mxu0 %vm446_vm2, %v9628_v14 }
 0x177   : > { %2102 = vmatpush1.bf16.msra.mxu0 %v8506_v8  ;;  %7191 = vmatprep.mubr.msk.bf16.mxu0 %vm446_vm2, %v9664_v61  ;;  %v8521_v8 = vld [vmem:[#allocation5 + $0x470] ss:$8 sps:$4 sm:$0xff]  }
 0x178   : > { %2103 = vmatprep.subr.bf16.mxu0 %v8511_v41  ;;  %v8526_v41 = vld [vmem:[#allocation5 + $0x484] ss:$8 sps:$4 sm:$0xff]  }
 0x17b   : > { %2104 = vmatpush1.bf16.msra.mxu0 %v8509_v33  ;;  %v8524_v33 = vld [vmem:[#allocation5 + $0x480] ss:$8 sps:$4 sm:$0xff]  }
 0x17c   : > { %2105 = vmatprep.subr.bf16.mxu0 %v8514_v21  ;;  %v8529_v21 = vld [vmem:[#allocation5 + $0x494] ss:$8 sps:$4 sm:$0xff]  }
 0x17e   : > { %7192 = vmatmul.mubr.msk.bf16.gmra.mrb[8].mxu0 %vm446_vm2, %v9675_v4 }
 0x17f   : > { %2106 = vmatpush1.bf16.msra.mxu0 %v8512_v47  ;;  %7193 = vmatprep.mubr.msk.bf16.mxu0 %vm446_vm2, %v9685_v9  ;;  %v8527_v47 = vld [vmem:[#allocation5 + $0x490] ss:$8 sps:$4 sm:$0xff]  }
 0x180   : > { %2107 = vmatprep.subr.bf16.mxu0 %v8517_v30  ;;  %v8532_v30 = vld [vmem:[#allocation5 + $0x4a4] ss:$8 sps:$4 sm:$0xff]  }
 0x183   : > { %2108 = vmatpush1.bf16.msra.mxu0 %v8515_v35  ;;  %v8530_v35 = vld [vmem:[#allocation5 + $0x4a0] ss:$8 sps:$4 sm:$0xff]  }
 0x184   : > { %2109 = vmatprep.subr.bf16.mxu0 %v8520_v27  ;;  %v8535_v27 = vld [vmem:[#allocation5 + $0x4b4] ss:$8 sps:$4 sm:$0xff]  }
 0x186   : > { %7194 = vmatmul.mubr.msk.bf16.gmra.mrb[12].mxu0 %vm446_vm2, %v9720_v49 }
 0x187   : > { %2110 = vmatpush1.bf16.msra.mxu0 %v8518_v57  ;;  %7195 = vmatprep.mubr.msk.bf16.mxu0 %vm446_vm2, %v9747_v6  ;;  %v8533_v57 = vld [vmem:[#allocation5 + $0x4b0] ss:$8 sps:$4 sm:$0xff]  }
 0x188   : > { %2111 = vmatprep.subr.bf16.mxu0 %v8523_v16  ;;  %v8538_v16 = vld [vmem:[#allocation5 + $0x4c4] ss:$8 sps:$4 sm:$0xff]  }
 0x18b   : > { %2112 = vmatpush1.bf16.msra.mxu0 %v8521_v8  ;;  %v8536_v8 = vld [vmem:[#allocation5 + $0x4c0] ss:$8 sps:$4 sm:$0xff]  }
 0x18c   : > { %2113 = vmatprep.subr.bf16.mxu0 %v8526_v41  ;;  %v8541_v41 = vld [vmem:[#allocation5 + $0x4d4] ss:$8 sps:$4 sm:$0xff]  }
 0x18e   : > { %7196 = vmatmul.mubr.msk.bf16.gmra.mrb[16].mxu0 %vm446_vm2, %v9770_v29 }
 0x18f   : > { %2114 = vmatpush1.bf16.msra.mxu0 %v8524_v33  ;;  %7197 = vmatprep.mubr.msk.bf16.mxu0 %vm446_vm2, %v9806_v62  ;;  %v8539_v33 = vld [vmem:[#allocation5 + $0x4d0] ss:$8 sps:$4 sm:$0xff]  }
 0x190   : > { %2115 = vmatprep.subr.bf16.mxu0 %v8529_v21  ;;  %v8544_v21 = vld [vmem:[#allocation5 + $0x4e4] ss:$8 sps:$4 sm:$0xff]  }
 0x193   : > { %2116 = vmatpush1.bf16.msra.mxu0 %v8527_v47  ;;  %v8542_v47 = vld [vmem:[#allocation5 + $0x4e0] ss:$8 sps:$4 sm:$0xff]  }
 0x194   : > { %2117 = vmatprep.subr.bf16.mxu0 %v8532_v30  ;;  %v8547_v30 = vld [vmem:[#allocation5 + $0x4f4] ss:$8 sps:$4 sm:$0xff]  }
 0x196   : > { %7198 = vmatmul.mubr.msk.bf16.gmra.mrb[20].mxu0 %vm446_vm2, %v9849_v23 }
 0x197   : > { %2118 = vmatpush1.bf16.msra.mxu0 %v8530_v35  ;;  %7199 = vmatprep.mubr.msk.bf16.mxu0 %vm446_vm2, %v9857_v5  ;;  %v8545_v35 = vld [vmem:[#allocation5 + $0x4f0] ss:$8 sps:$4 sm:$0xff]  }
 0x198   : > { %2119 = vmatprep.subr.bf16.mxu0 %v8535_v27  ;;  %v8550_v27 = vld [vmem:[#allocation5 + $0x504] ss:$8 sps:$4 sm:$0xff]  }
 0x19b   : > { %2120 = vmatpush1.bf16.msra.mxu0 %v8533_v57  ;;  %v8548_v57 = vld [vmem:[#allocation5 + $0x500] ss:$8 sps:$4 sm:$0xff]  }
 0x19c   : > { %2121 = vmatprep.subr.bf16.mxu0 %v8538_v16  ;;  %v8553_v16 = vld [vmem:[#allocation5 + $0x514] ss:$8 sps:$4 sm:$0xff]  }
 0x19e   : > { %7200 = vmatmul.mubr.msk.bf16.gmra.mrb[24].mxu0 %vm446_vm2, %v9891_v40 }
 0x19f   : > { %2122 = vmatpush1.bf16.msra.mxu0 %v8536_v8  ;;  %7201 = vmatprep.mubr.msk.bf16.mxu0 %vm446_vm2, %v9899_v22  ;;  %v8551_v8 = vld [vmem:[#allocation5 + $0x510] ss:$8 sps:$4 sm:$0xff]  }
 0x1a0   : > { %2123 = vmatprep.subr.bf16.mxu0 %v8541_v41  ;;  %v8556_v41 = vld [vmem:[#allocation5 + $0x524] ss:$8 sps:$4 sm:$0xff]  }
 0x1a3   : > { %2124 = vmatpush1.bf16.msra.mxu0 %v8539_v33  ;;  %v8554_v33 = vld [vmem:[#allocation5 + $0x520] ss:$8 sps:$4 sm:$0xff]  }
 0x1a4   : > { %2125 = vmatprep.subr.bf16.mxu0 %v8544_v21  ;;  %v8559_v21 = vld [vmem:[#allocation5 + $0x534] ss:$8 sps:$4 sm:$0xff]  }
 0x1a6   : > { %7202 = vmatmul.mubr.msk.bf16.gmra.mrb[28].mxu0 %vm446_vm2, %v9934_v15 }
 0x1a7   : > { %2126 = vmatpush1.bf16.msra.mxu0 %v8542_v47  ;;  %2129 = vmatprep.mubr.bf16.mxu0 %v9700_v20  ;;  %v8557_v20 = vld [vmem:[#allocation5 + $0x530] ss:$8 sps:$4 sm:$0xff]   ;;  %v8562_v47 = vld [vmem:[#allocation5 + $0x544] ss:$8 sps:$4 sm:$0xff]  }
 0x1a8   : > { %2127 = vmatprep.subr.bf16.mxu0 %v8547_v30  ;;  %v8565_v30 = vld [vmem:[#allocation5 + $0x554] ss:$8 sps:$4 sm:$0xff]  }
 0x1ab   : > { %2128 = vmatpush1.bf16.msra.mxu0 %v8545_v35  ;;  %v8563_v35 = vld [vmem:[#allocation5 + $0x550] ss:$8 sps:$4 sm:$0xff]  }
 0x1ac   : > { %2407 = vmatprep.subr.bf16.mxu0 %v8550_v27  ;;  %v8568_v27 = vld [vmem:[#allocation5 + $0x564] ss:$8 sps:$4 sm:$0xff]  }
 0x1ae   : > { %2130 = vmatmul.mubr.bf16.vlgmr.msra.gmra.mrb[0].mxu0 %v9729_v59  ;;  %v8560_v59 = vld [vmem:[#allocation5 + $0x540] ss:$8 sps:$4 sm:$0xff]  }
 0x1af   : > { %2408 = vmatpush1.bf16.msra.mxu0 %v8548_v57  ;;  %2137 = vmatprep.mubr.bf16.mxu0 %v9735_v60  ;;  %v8566_v57 = vld [vmem:[#allocation5 + $0x560] ss:$8 sps:$4 sm:$0xff]  }
 0x1b0   : > { %2409 = vmatprep.subr.bf16.mxu0 %v8553_v16  ;;  %v8571_v16 = vld [vmem:[#allocation5 + $0x574] ss:$8 sps:$4 sm:$0xff]  }
 0x1b3   : > { %2410 = vmatpush1.bf16.msra.mxu0 %v8551_v8  ;;  %v8569_v8 = vld [vmem:[#allocation5 + $0x570] ss:$8 sps:$4 sm:$0xff]  }
 0x1b4   : > { %2411 = vmatprep.subr.bf16.mxu0 %v8556_v41  ;;  %v8574_v41 = vld [vmem:[#allocation5 + $0x584] ss:$8 sps:$4 sm:$0xff]  }
 0x1b6   : > { %2138 = vmatmul.mubr.bf16.gmra.mrb[4].mxu0 %v9743_v48 }
 0x1b7   : > { %2412 = vmatpush1.bf16.msra.mxu0 %v8554_v33  ;;  %2145 = vmatprep.mubr.bf16.mxu0 %v9756_v2  ;;  %v8572_v33 = vld [vmem:[#allocation5 + $0x580] ss:$8 sps:$4 sm:$0xff]  }
 0x1b8   : > { %2413 = vmatprep.subr.bf16.mxu0 %v8559_v21  ;;  %v8577_v21 = vld [vmem:[#allocation5 + $0x594] ss:$8 sps:$4 sm:$0xff]  }
 0x1bb   : > { %2414 = vmatpush1.bf16.msra.mxu0 %v8557_v20  ;;  %v8575_v20 = vld [vmem:[#allocation5 + $0x590] ss:$8 sps:$4 sm:$0xff]  }
 0x1bc   : > { %2415 = vmatprep.subr.bf16.mxu0 %v8562_v47  ;;  %v8580_v47 = vld [vmem:[#allocation5 + $0x5a4] ss:$8 sps:$4 sm:$0xff]  }
 0x1be   : > { %2146 = vmatmul.mubr.bf16.gmra.mrb[8].mxu0 %v9817_v17 }
 0x1bf   : > { %2416 = vmatpush1.bf16.msra.mxu0 %v8560_v59  ;;  %2153 = vmatprep.mubr.bf16.mxu0 %v9840_v58  ;;  %v8578_v59 = vld [vmem:[#allocation5 + $0x5a0] ss:$8 sps:$4 sm:$0xff]  }
 0x1c0   : > { %2417 = vmatprep.subr.bf16.mxu0 %v8565_v30  ;;  %v8583_v30 = vld [vmem:[#allocation5 + $0x5b4] ss:$8 sps:$4 sm:$0xff]  }
 0x1c3   : > { %2418 = vmatpush1.bf16.msra.mxu0 %v8563_v35  ;;  %v1931_v35 = vshrl.u32 %v9910_v52, 16  ;;  %v8643_v52 = vld [vmem:[#allocation5 + $0x6f4] ss:$8 sps:$4 sm:$0xff]  }
 0x1c4   : > { %2419 = vmatprep.subr.bf16.mxu0 %v8568_v27  ;;  %v8581_v27 = vld [vmem:[#allocation5 + $0x5b0] ss:$8 sps:$4 sm:$0xff]  }
 0x1c6   : > { %2154 = vmatmul.mubr.bf16.gmra.mrb[12].mxu0 %v9875_v37 }
 0x1c7   : > { %2420 = vmatpush1.bf16.msra.mxu0 %v8566_v57  ;;  %2161 = vmatprep.mubr.bf16.mxu0 %v9882_v54  ;;  %v8586_v57 = vld [vmem:[#allocation5 + $0x5c4] ss:$8 sps:$4 sm:$0xff]  }
 0x1c8   : > { %2421 = vmatprep.subr.bf16.mxu0 %v8571_v16  ;;  %v1933_v16 = vor.u32 %v1931_v35, %v9948_v53  ;;  %v8592_v53 = vld [vmem:[#allocation5 + $0x5e4] ss:$8 sps:$4 sm:$0xff]   ;;  %v8595_v35 = vld [vmem:[#allocation5 + $0x5f4] ss:$8 sps:$4 sm:$0xff]  }
 0x1cb   : > { %2422 = vmatpush1.bf16.msra.mxu0 %v8569_v8  ;;  %v8584_v8 = vld [vmem:[#allocation5 + $0x5c0] ss:$8 sps:$4 sm:$0xff]  }
 0x1cc   : > { %2423 = vmatprep.subr.bf16.mxu0 %v8574_v41  ;;  %v1927_v41 = vshrl.u32 %v9952_v0, 16 }
 0x1ce   : > { %2162 = vmatmul.mubr.bf16.gmra.mrb[16].mxu0 %v9916_v13 }
 0x1cf   : > { %2424 = vmatpush1.bf16.msra.mxu0 %v8572_v33  ;;  %2169 = vmatprep.mubr.bf16.mxu0 %v9923_v46  ;;  %v8589_v33 = vld [vmem:[#allocation5 + $0x5d4] ss:$8 sps:$4 sm:$0xff]  }
 0x1d0   : > { %2425 = vmatprep.subr.bf16.mxu0 %v8577_v21  ;;  %v10108_v21 = vsel %vm580_vm6, %v1933_v16, %v9902_v10  ;;  %v8593_v10 = vld [vmem:[#allocation5 + $0x5f0] ss:$8 sps:$4 sm:$0xff]   ;;  %v8604_v16 = vld [vmem:[#allocation5 + $0x624] ss:$8 sps:$4 sm:$0xff]  }
 0x1d3   : > { %2426 = vmatpush1.bf16.msra.mxu0 %v8575_v20  ;;  %v8587_v20 = vld [vmem:[#allocation5 + $0x5d0] ss:$8 sps:$4 sm:$0xff]  }
 0x1d4   : > { %2427 = vmatprep.subr.bf16.mxu0 %v8580_v47  ;;  %v1929_v47 = vor.u32 %v1927_v41, %v9970_v56  ;;  %v8596_v56 = vld [vmem:[#allocation5 + $0x600] ss:$8 sps:$4 sm:$0xff]   ;;  %v8607_v41 = vld [vmem:[#allocation5 + $0x634] ss:$8 sps:$4 sm:$0xff]  }
 0x1d6   : > { %2170 = vmatmul.mubr.bf16.gmra.mrb[20].mxu0 %v9956_v12 }
 0x1d7   : > { %2428 = vmatpush1.bf16.msra.mxu0 %v8578_v59  ;;  %2177 = vmatprep.mubr.bf16.mxu0 %v9963_v39  ;;  %v10115_v59 = vsel %vm580_vm6, %v1929_v47, %v9943_v3  ;;  %v8599_v3 = vld [vmem:[#allocation5 + $0x610] ss:$8 sps:$4 sm:$0xff]  }
 0x1d8   : > { %2429 = vmatprep.subr.bf16.mxu0 %v8583_v30  ;;  %v8590_v30 = vld [vmem:[#allocation5 + $0x5e0] ss:$8 sps:$4 sm:$0xff]   ;;  %v8611_v47 = vld [vmem:[#allocation5 + $0x650] ss:$8 sps:$4 sm:$0xff]  }
 0x1db   : > { %2430 = vmatpush1.bf16.msra.mxu0 %v8581_v27  ;;  %v8598_v27 = vld [vmem:[#allocation5 + $0x604] ss:$8 sps:$4 sm:$0xff]  }
 0x1dc   : > { %2431 = vmatprep.subr.bf16.mxu0 %v8586_v57  ;;  %v8601_v57 = vld [vmem:[#allocation5 + $0x614] ss:$8 sps:$4 sm:$0xff]  }
 0x1de   : > { %2178 = vmatmul.mubr.bf16.gmra.mrb[24].mxu0 %v9975_v38 }
 0x1df   : > { %2432 = vmatpush1.bf16.msra.mxu0 %v8584_v8  ;;  %2185 = vmatprep.mubr.bf16.mxu0 %v10108_v21  ;;  %v8602_v8 = vld [vmem:[#allocation5 + $0x620] ss:$8 sps:$4 sm:$0xff]  }
 0x1e0   : > { %2433 = vmatprep.subr.bf16.mxu0 %v8589_v33  ;;  %v8610_v33 = vld [vmem:[#allocation5 + $0x644] ss:$8 sps:$4 sm:$0xff]  }
 0x1e3   : > { %2434 = vmatpush1.bf16.msra.mxu0 %v8587_v20  ;;  %v8613_v20 = vld [vmem:[#allocation5 + $0x654] ss:$8 sps:$4 sm:$0xff]  }
 0x1e4   : > { %2435 = vmatprep.subr.bf16.mxu0 %v8592_v53  ;;  %v8616_v53 = vld [vmem:[#allocation5 + $0x664] ss:$8 sps:$4 sm:$0xff]  }
 0x1e6   : > { %2186 = vmatmul.mubr.bf16.gmra.mrb[28].mxu0 %v10115_v59 }
 0x1e7   : > { %2436 = vmatpush1.bf16.msra.mxu0 %v8590_v30  ;;  %2439 = vmatprep.mubr.bf16.mxu0 %v9789_v50  ;;  %v8605_v50 = vld [vmem:[#allocation5 + $0x630] ss:$8 sps:$4 sm:$0xff]   ;;  %v8614_v30 = vld [vmem:[#allocation5 + $0x660] ss:$8 sps:$4 sm:$0xff]  }
 0x1e8   : > { %2437 = vmatprep.subr.bf16.mxu0 %v8595_v35  ;;  %v8619_v35 = vld [vmem:[#allocation5 + $0x674] ss:$8 sps:$4 sm:$0xff]  }
 0x1eb   : > { %2438 = vmatpush1.bf16.msra.mxu0 %v8593_v10  ;;  %v8617_v10 = vld [vmem:[#allocation5 + $0x670] ss:$8 sps:$4 sm:$0xff]  }
 0x1ec   : > { %2713 = vmatprep.subr.bf16.mxu0 %v8598_v27  ;;  %v8622_v27 = vld [vmem:[#allocation5 + $0x684] ss:$8 sps:$4 sm:$0xff]  }
 0x1ee   : > { %2440 = vmatmul.mubr.bf16.vlgmr.msra.gmra.mrb[0].mxu0 %v9801_v31  ;;  %v8608_v31 = vld [vmem:[#allocation5 + $0x640] ss:$8 sps:$4 sm:$0xff]  }
 0x1ef   : > { %2714 = vmatpush1.bf16.msra.mxu0 %v8596_v56  ;;  %2447 = vmatprep.mubr.bf16.mxu0 %v9810_v1  ;;  %v8620_v56 = vld [vmem:[#allocation5 + $0x680] ss:$8 sps:$4 sm:$0xff]  }
 0x1f0   : > { %2715 = vmatprep.subr.bf16.mxu0 %v8601_v57  ;;  %v8625_v57 = vld [vmem:[#allocation5 + $0x694] ss:$8 sps:$4 sm:$0xff]  }
 0x1f3   : > { %2716 = vmatpush1.bf16.msra.mxu0 %v8599_v3  ;;  %v8623_v3 = vld [vmem:[#allocation5 + $0x690] ss:$8 sps:$4 sm:$0xff]  }
 0x1f4   : > { %2717 = vmatprep.subr.bf16.mxu0 %v8604_v16  ;;  %v8628_v16 = vld [vmem:[#allocation5 + $0x6a4] ss:$8 sps:$4 sm:$0xff]  }
 0x1f6   : > { %2448 = vmatmul.mubr.bf16.gmra.mrb[4].mxu0 %v9826_v19 }
 0x1f7   : > { %2718 = vmatpush1.bf16.msra.mxu0 %v8602_v8  ;;  %2455 = vmatprep.mubr.bf16.mxu0 %v9845_v24  ;;  %v8626_v8 = vld [vmem:[#allocation5 + $0x6a0] ss:$8 sps:$4 sm:$0xff]  }
 0x1f8   : > { %2719 = vmatprep.subr.bf16.mxu0 %v8607_v41  ;;  %v8631_v41 = vld [vmem:[#allocation5 + $0x6b4] ss:$8 sps:$4 sm:$0xff]  }
 0x1fb   : > { %2720 = vmatpush1.bf16.msra.mxu0 %v8605_v50  ;;  %v8629_v50 = vld [vmem:[#allocation5 + $0x6b0] ss:$8 sps:$4 sm:$0xff]  }
 0x1fc   : > { %2721 = vmatprep.subr.bf16.mxu0 %v8610_v33  ;;  %v8634_v33 = vld [vmem:[#allocation5 + $0x6c4] ss:$8 sps:$4 sm:$0xff]  }
 0x1fe   : > { %2456 = vmatmul.mubr.bf16.gmra.mrb[8].mxu0 %v9852_v43 }
 0x1ff   : > { %2722 = vmatpush1.bf16.msra.mxu0 %v8608_v31  ;;  %2463 = vmatprep.mubr.bf16.mxu0 %v9887_v32  ;;  %v8632_v31 = vld [vmem:[#allocation5 + $0x6c0] ss:$8 sps:$4 sm:$0xff]  }
 0x200   : > { %2723 = vmatprep.subr.bf16.mxu0 %v8613_v20  ;;  %v8637_v20 = vld [vmem:[#allocation5 + $0x6d4] ss:$8 sps:$4 sm:$0xff]  }
 0x203   : > { %2724 = vmatpush1.bf16.msra.mxu0 %v8611_v47  ;;  %v10135_v47 = vsel %vm1266_vm7, %v1297_v18, %v10022_v55  ;;  %v8641_v18 = vld [vmem:[#allocation5 + $0x6f0] ss:$8 sps:$4 sm:$0xff]  }
 0x204   : > { %2725 = vmatprep.subr.bf16.mxu0 %v8616_v53  ;;  %v8635_v53 = vld [vmem:[#allocation5 + $0x6d0] ss:$8 sps:$4 sm:$0xff]  }
 0x206   : > { %2464 = vmatmul.mubr.bf16.gmra.mrb[12].mxu0 %v9894_v11 }
 0x207   : > { %2726 = vmatpush1.bf16.msra.mxu0 %v8614_v30  ;;  %2471 = vmatprep.mubr.bf16.mxu0 %v9930_v63  ;;  %v8640_v30 = vld [vmem:[#allocation5 + $0x6e4] ss:$8 sps:$4 sm:$0xff]  }
 0x208   : > { %2727 = vmatprep.subr.bf16.mxu0 %v8619_v35  ;;  %v11189_v35 = vrot.slane %v9952_v0, 1  ;;  %v8647_v0 = vld [vmem:[#allocation5 + $0x710] ss:$8 sps:$4 sm:$0xff]  }
 0x20b   : > { %2728 = vmatpush1.bf16.msra.mxu0 %v8617_v10  ;;  %v10143_v10 = vsel %vm1266_vm7, %v11189_v35, %v10033_v28  ;;  %v8674_v35 = vld [vmem:[#allocation5 + $0x7a0] ss:$8 sps:$4 sm:$0xff]  }
 0x20c   : > { %2729 = vmatprep.subr.bf16.mxu0 %v8622_v27  ;;  %v8638_v27 = vld [vmem:[#allocation5 + $0x6e0] ss:$8 sps:$4 sm:$0xff]  }
 0x20e   : > { %2472 = vmatmul.mubr.bf16.gmra.mrb[16].mxu0 %v9939_v44 }
 0x20f   : > { %2730 = vmatpush1.bf16.msra.mxu0 %v8620_v56  ;;  %2479 = vmatprep.mubr.bf16.mxu0 %v10028_v25  ;;  %v8646_v56 = vld [vmem:[#allocation5 + $0x704] ss:$8 sps:$4 sm:$0xff]  }
 0x210   : > { %2731 = vmatprep.subr.bf16.mxu0 %v8625_v57  ;;  %v8644_v57 = vld [vmem:[#allocation5 + $0x700] ss:$8 sps:$4 sm:$0xff]  }
 0x213   : > { %2732 = vmatpush1.bf16.msra.mxu0 %v8623_v3  ;;  %v8649_v3 = vld [vmem:[#allocation5 + $0x714] ss:$8 sps:$4 sm:$0xff]  }
 0x214   : > { %2733 = vmatprep.subr.bf16.mxu0 %v8628_v16  ;;  %v8652_v16 = vld [vmem:[#allocation5 + $0x724] ss:$8 sps:$4 sm:$0xff]  }
 0x216   : > { %2480 = vmatmul.mubr.bf16.gmra.mrb[20].mxu0 %v10040_v34 }
 0x217   : > { %2734 = vmatpush1.bf16.msra.mxu0 %v8626_v8  ;;  %2487 = vmatprep.mubr.bf16.mxu0 %v10046_v45  ;;  %v8650_v8 = vld [vmem:[#allocation5 + $0x720] ss:$8 sps:$4 sm:$0xff]  }
 0x218   : > { %2735 = vmatprep.subr.bf16.mxu0 %v8631_v41  ;;  %v8653_v41 = vld [vmem:[#allocation5 + $0x730] ss:$8 sps:$4 sm:$0xff]  }
 0x21b   : > { %2736 = vmatpush1.bf16.msra.mxu0 %v8629_v50  ;;  %v8656_v50 = vld [vmem:[#allocation5 + $0x740] ss:$8 sps:$4 sm:$0xff]  }
 0x21c   : > { %2737 = vmatprep.subr.bf16.mxu0 %v8634_v33  ;;  %v8659_v33 = vld [vmem:[#allocation5 + $0x750] ss:$8 sps:$4 sm:$0xff]  }
 0x21e   : > { %2488 = vmatmul.mubr.bf16.gmra.mrb[24].mxu0 %v10055_v51 }
 0x21f   : > { %2738 = vmatpush1.bf16.msra.mxu0 %v8632_v31  ;;  %2495 = vmatprep.mubr.bf16.mxu0 %v10135_v47  ;;  %v8662_v31 = vld [vmem:[#allocation5 + $0x760] ss:$8 sps:$4 sm:$0xff]  }
 0x220   : > { %2739 = vmatprep.subr.bf16.mxu0 %v8637_v20  ;;  %v8665_v20 = vld [vmem:[#allocation5 + $0x770] ss:$8 sps:$4 sm:$0xff]  }
 0x223   : > { %2740 = vmatpush1.bf16.msra.mxu0 %v8635_v53  ;;  %v8668_v53 = vld [vmem:[#allocation5 + $0x780] ss:$8 sps:$4 sm:$0xff]  }
 0x224   : > { %2741 = vmatprep.subr.bf16.mxu0 %v8640_v30  ;;  %v8671_v30 = vld [vmem:[#allocation5 + $0x790] ss:$8 sps:$4 sm:$0xff]  }
 0x226   : > { %2496 = vmatmul.mubr.bf16.gmra.mrb[28].mxu0 %v10143_v10 }
 0x227   : > { %2742 = vmatpush1.bf16.msra.mxu0 %v8638_v27  ;;  %7299 = vmatprep.mubr.msk.bf16.mxu0 %vm446_vm2, %v9596_v42  ;;  %v8655_v42 = vld [vmem:[#allocation5 + $0x734] ss:$8 sps:$4 sm:$0xff]   ;;  %v8677_v27 = vld [vmem:[#allocation5 + $0x7b0] ss:$8 sps:$4 sm:$0xff]  }
 0x228   : > { %2743 = vmatprep.subr.bf16.mxu0 %v8643_v52  ;;  %v8680_v52 = vld [vmem:[#allocation5 + $0x7c0] ss:$8 sps:$4 sm:$0xff]  }
 0x22b   : > { %2744 = vmatpush1.bf16.msra.mxu0 %v8641_v18  ;;  %v8685_v18 = vld [vmem:[#allocation5 + $0x7d4] ss:$8 sps:$4 sm:$0xff]  }
 0x22c   : > { %3026 = vmatprep.subr.bf16.mxu0 %v8646_v56  ;;  %v8683_v56 = vld [vmem:[#allocation5 + $0x7d0] ss:$8 sps:$4 sm:$0xff]  }
 0x22e   : > { %7300 = vmatmul.mubr.msk.bf16.vlgmr.msra.gmra.mrb[0].mxu0 %vm446_vm2, %v9628_v14  ;;  %v8658_v14 = vld [vmem:[#allocation5 + $0x744] ss:$8 sps:$4 sm:$0xff]  }
 0x22f   : > { %3027 = vmatpush1.bf16.msra.mxu0 %v8644_v57  ;;  %7301 = vmatprep.mubr.msk.bf16.mxu0 %vm446_vm2, %v9664_v61  ;;  %v8661_v61 = vld [vmem:[#allocation5 + $0x754] ss:$8 sps:$4 sm:$0xff]   ;;  %v8688_v57 = vld [vmem:[#allocation5 + $0x7e4] ss:$8 sps:$4 sm:$0xff]  }
 0x230   : > { %3028 = vmatprep.subr.bf16.mxu0 %v8649_v3  ;;  %v8686_v3 = vld [vmem:[#allocation5 + $0x7e0] ss:$8 sps:$4 sm:$0xff]  }
 0x233   : > { %3029 = vmatpush1.bf16.msra.mxu0 %v8647_v0  ;;  %v8689_v0 = vld [vmem:[#allocation5 + $0x7f0] ss:$8 sps:$4 sm:$0xff]  }
 0x234   : > { %3030 = vmatprep.subr.bf16.mxu0 %v8652_v16  ;;  %v8692_v16 = vld [vmem:[#allocation5 + $0x800] ss:$8 sps:$4 sm:$0xff]  }
 0x236   : > { %7302 = vmatmul.mubr.msk.bf16.gmra.mrb[4].mxu0 %vm446_vm2, %v9675_v4  ;;  %v8664_v4 = vld [vmem:[#allocation5 + $0x764] ss:$8 sps:$4 sm:$0xff]  }
 0x237   : > { %3031 = vmatpush1.bf16.msra.mxu0 %v8650_v8  ;;  %7303 = vmatprep.mubr.msk.bf16.mxu0 %vm446_vm2, %v9685_v9  ;;  %v8667_v9 = vld [vmem:[#allocation5 + $0x774] ss:$8 sps:$4 sm:$0xff]  }
 0x238   : > { %3032 = vmatprep.subr.bf16.mxu0 %v8655_v42  ;;  %v8697_v8 = vld [vmem:[#allocation5 + $0x814] ss:$8 sps:$4 sm:$0xff]   ;;  %v8700_v42 = vld [vmem:[#allocation5 + $0x824] ss:$8 sps:$4 sm:$0xff]  }
 0x23b   : > { %3033 = vmatpush1.bf16.msra.mxu0 %v8653_v41  ;;  %v8703_v41 = vld [vmem:[#allocation5 + $0x834] ss:$8 sps:$4 sm:$0xff]  }
 0x23c   : > { %3034 = vmatprep.subr.bf16.mxu0 %v8658_v14  ;;  %v8706_v14 = vld [vmem:[#allocation5 + $0x844] ss:$8 sps:$4 sm:$0xff]  }
 0x23e   : > { %7304 = vmatmul.mubr.msk.bf16.gmra.mrb[8].mxu0 %vm446_vm2, %v9720_v49  ;;  %v8670_v49 = vld [vmem:[#allocation5 + $0x784] ss:$8 sps:$4 sm:$0xff]  }
 0x23f   : > { %3035 = vmatpush1.bf16.msra.mxu0 %v8656_v50  ;;  %7305 = vmatprep.mubr.msk.bf16.mxu0 %vm446_vm2, %v9747_v6  ;;  %v8673_v6 = vld [vmem:[#allocation5 + $0x794] ss:$8 sps:$4 sm:$0xff]  }
 0x240   : > { %3036 = vmatprep.subr.bf16.mxu0 %v8661_v61  ;;  %v8709_v50 = vld [vmem:[#allocation5 + $0x854] ss:$8 sps:$4 sm:$0xff]   ;;  %v8712_v61 = vld [vmem:[#allocation5 + $0x864] ss:$8 sps:$4 sm:$0xff]  }
 0x243   : > { %3037 = vmatpush1.bf16.msra.mxu0 %v8659_v33  ;;  %v8715_v33 = vld [vmem:[#allocation5 + $0x874] ss:$8 sps:$4 sm:$0xff]  }
 0x244   : > { %3038 = vmatprep.subr.bf16.mxu0 %v8664_v4  ;;  %v8718_v4 = vld [vmem:[#allocation5 + $0x884] ss:$8 sps:$4 sm:$0xff]  }
 0x246   : > { %7306 = vmatmul.mubr.msk.bf16.gmra.mrb[12].mxu0 %vm446_vm2, %v9770_v29  ;;  %v8676_v29 = vld [vmem:[#allocation5 + $0x7a4] ss:$8 sps:$4 sm:$0xff]  }
 0x247   : > { %3039 = vmatpush1.bf16.msra.mxu0 %v8662_v31  ;;  %7307 = vmatprep.mubr.msk.bf16.mxu0 %vm446_vm2, %v9806_v62  ;;  %v8679_v62 = vld [vmem:[#allocation5 + $0x7b4] ss:$8 sps:$4 sm:$0xff]  }
 0x248   : > { %3040 = vmatprep.subr.bf16.mxu0 %v8667_v9  ;;  %v8721_v31 = vld [vmem:[#allocation5 + $0x894] ss:$8 sps:$4 sm:$0xff]   ;;  %v8724_v9 = vld [vmem:[#allocation5 + $0x8a4] ss:$8 sps:$4 sm:$0xff]  }
 0x24b   : > { %3041 = vmatpush1.bf16.msra.mxu0 %v8665_v20  ;;  %v8727_v20 = vld [vmem:[#allocation5 + $0x8b4] ss:$8 sps:$4 sm:$0xff]  }
 0x24c   : > { %3042 = vmatprep.subr.bf16.mxu0 %v8670_v49  ;;  %v8730_v49 = vld [vmem:[#allocation5 + $0x8c4] ss:$8 sps:$4 sm:$0xff]  }
 0x24e   : > { %7308 = vmatmul.mubr.msk.bf16.gmra.mrb[16].mxu0 %vm446_vm2, %v9849_v23  ;;  %v8682_v23 = vld [vmem:[#allocation5 + $0x7c4] ss:$8 sps:$4 sm:$0xff]  }
 0x24f   : > { %3043 = vmatpush1.bf16.msra.mxu0 %v8668_v53  ;;  %7309 = vmatprep.mubr.msk.bf16.mxu0 %vm446_vm2, %v9857_v5  ;;  %v9361_v53 = vmov 0  }
 0x250   : > { %3044 = vmatprep.subr.bf16.mxu0 %v8673_v6  ;;  %v8728_v6 = vld [vmem:[#allocation5 + $0x8c0] ss:$8 sps:$4 sm:$0xff]  }
 0x253   : > { %3045 = vmatpush1.bf16.msra.mxu0 %v8671_v30 }
 0x254   : > { %3046 = vmatprep.subr.bf16.mxu0 %v8676_v29 }
 0x256   : > { %7310 = vmatmul.mubr.msk.bf16.gmra.mrb[20].mxu0 %vm446_vm2, %v9891_v40 }
 0x257   : > { %3047 = vmatpush1.bf16.msra.mxu0 %v8674_v35  ;;  %7311 = vmatprep.mubr.msk.bf16.mxu0 %vm446_vm2, %v9899_v22  ;;  %v8691_v22 = vld [vmem:[#allocation5 + $0x7f4] ss:$8 sps:$4 sm:$0xff]   ;;  %v8734_v35 = vld [vmem:[#allocation5 + $0x8e0] ss:$8 sps:$4 sm:$0xff]  }
 0x258   : > { %3048 = vmatprep.subr.bf16.mxu0 %v8679_v62  ;;  %v8739_v62 = vld [vmem:[#allocation5 + $0x8f4] ss:$8 sps:$4 sm:$0xff]  }
 0x25b   : > { %3049 = vmatpush1.bf16.msra.mxu0 %v8677_v27  ;;  %v8737_v27 = vld [vmem:[#allocation5 + $0x8f0] ss:$8 sps:$4 sm:$0xff]  }
 0x25c   : > { %3050 = vmatprep.subr.bf16.mxu0 %v8682_v23  ;;  %v8766_v23 = vld [vmem:[#allocation7 + $0x180] ss:$8 sps:$4 sm:$0xff]  }
 0x25e   : > { %7312 = vmatmul.mubr.msk.bf16.gmra.mrb[24].mxu0 %vm446_vm2, %v9934_v15  ;;  %v8694_v15 = vld [vmem:[#allocation5 + $0x804] ss:$8 sps:$4 sm:$0xff]  }
 0x25f   : > { %3051 = vmatpush1.bf16.msra.mxu0 %v8680_v52  ;;  %7313 = vmatprep.mubr.msk.bf16.mxu0 %vm446_vm2, %v9857_v5  ;;  %v8695_v5 = vld [vmem:[#allocation5 + $0x810] ss:$8 sps:$4 sm:$0xff]   ;;  %v8767_v52 = vld [vmem:[#allocation7 + $0x194] ss:$8 sps:$4 sm:$0xff]  }
 0x260   : > { %3052 = vmatprep.subr.bf16.mxu0 %v8685_v18  ;;  %v8769_v18 = vld [vmem:[#allocation7 + $0x190] ss:$8 sps:$4 sm:$0xff]  }
 0x263   : > { %3053 = vmatpush1.bf16.msra.mxu0 %v8683_v56  ;;  %v8770_v56 = vld [vmem:[#allocation7 + $0x1a4] ss:$8 sps:$4 sm:$0xff]  }
 0x264   : > { %3054 = vmatprep.subr.bf16.mxu0 %v8688_v57  ;;  %v8772_v57 = vld [vmem:[#allocation7 + $0x1a0] ss:$8 sps:$4 sm:$0xff]  }
 0x266   : > { %7314 = vmatmul.mubr.msk.bf16.gmra.mrb[28].mxu0 %vm446_vm2, %v9891_v40  ;;  %v8698_v40 = vld [vmem:[#allocation5 + $0x820] ss:$8 sps:$4 sm:$0xff]  }
 0x267   : > { %3055 = vmatpush1.bf16.msra.mxu0 %v8686_v3  ;;  %3058 = vmatprep.mubr.bf16.mxu0 %v9735_v60  ;;  %v8701_v60 = vld [vmem:[#allocation5 + $0x830] ss:$8 sps:$4 sm:$0xff]   ;;  %v8773_v3 = vld [vmem:[#allocation7 + $0x1b4] ss:$8 sps:$4 sm:$0xff]  }
 0x268   : > { %3056 = vmatprep.subr.bf16.mxu0 %v8691_v22  ;;  %v8775_v22 = vld [vmem:[#allocation7 + $0x1b0] ss:$8 sps:$4 sm:$0xff]  }
 0x26b   : > { %3057 = vmatpush1.bf16.msra.mxu0 %v8689_v0  ;;  %v8776_v0 = vld [vmem:[#allocation7 + $0x1c4] ss:$8 sps:$4 sm:$0xff]  }
 0x26c   : > { %3338 = vmatprep.subr.bf16.mxu0 %v8694_v15  ;;  %v8778_v15 = vld [vmem:[#allocation7 + $0x1c0] ss:$8 sps:$4 sm:$0xff]  }
 0x26e   : > { %3059 = vmatmul.mubr.bf16.vlgmr.msra.gmra.mrb[0].mxu0 %v9743_v48  ;;  %v8704_v48 = vld [vmem:[#allocation5 + $0x840] ss:$8 sps:$4 sm:$0xff]  }
 0x26f   : > { %3339 = vmatpush1.bf16.msra.mxu0 %v8692_v16  ;;  %3066 = vmatprep.mubr.bf16.mxu0 %v9756_v2  ;;  %v8707_v2 = vld [vmem:[#allocation5 + $0x850] ss:$8 sps:$4 sm:$0xff]   ;;  %v8779_v16 = vld [vmem:[#allocation7 + $0x1d4] ss:$8 sps:$4 sm:$0xff]  }
 0x270   : > { %3340 = vmatprep.subr.bf16.mxu0 %v8697_v8  ;;  %v8781_v8 = vld [vmem:[#allocation7 + $0x1d0] ss:$8 sps:$4 sm:$0xff]  }
 0x273   : > { %3341 = vmatpush1.bf16.msra.mxu0 %v8695_v5  ;;  %v8782_v5 = vld [vmem:[#allocation7 + $0x1e4] ss:$8 sps:$4 sm:$0xff]  }
 0x274   : > { %3342 = vmatprep.subr.bf16.mxu0 %v8700_v42  ;;  %v8784_v42 = vld [vmem:[#allocation7 + $0x1e0] ss:$8 sps:$4 sm:$0xff]  }
 0x276   : > { %3067 = vmatmul.mubr.bf16.gmra.mrb[4].mxu0 %v9817_v17  ;;  %v8710_v17 = vld [vmem:[#allocation5 + $0x860] ss:$8 sps:$4 sm:$0xff]  }
 0x277   : > { %3343 = vmatpush1.bf16.msra.mxu0 %v8698_v40  ;;  %3074 = vmatprep.mubr.bf16.mxu0 %v9840_v58  ;;  %v8713_v58 = vld [vmem:[#allocation5 + $0x870] ss:$8 sps:$4 sm:$0xff]   ;;  %v8785_v40 = vld [vmem:[#allocation7 + $0x1f4] ss:$8 sps:$4 sm:$0xff]  }
 0x278   : > { %3344 = vmatprep.subr.bf16.mxu0 %v8703_v41  ;;  %v8787_v41 = vld [vmem:[#allocation7 + $0x1f0] ss:$8 sps:$4 sm:$0xff]  }
 0x27b   : > { %3345 = vmatpush1.bf16.msra.mxu0 %v8701_v60  ;;  %v8790_v60 = vld [vmem:[#allocation7 + $0x4] ss:$8 sps:$4 sm:$0xff]  }
 0x27c   : > { %3346 = vmatprep.subr.bf16.mxu0 %v8706_v14 }
 0x27e   : > { %3075 = vmatmul.mubr.bf16.gmra.mrb[8].mxu0 %v9875_v37  ;;  %v8716_v37 = vld [vmem:[#allocation5 + $0x880] ss:$8 sps:$4 sm:$0xff]  }
 0x27f   : > { %3347 = vmatpush1.bf16.msra.mxu0 %v8704_v48  ;;  %3082 = vmatprep.mubr.bf16.mxu0 %v9882_v54  ;;  %v8719_v54 = vld [vmem:[#allocation5 + $0x890] ss:$8 sps:$4 sm:$0xff]  }
 0x280   : > { %3348 = vmatprep.subr.bf16.mxu0 %v8709_v50 }
 0x283   : > { %3349 = vmatpush1.bf16.msra.mxu0 %v8707_v2 }
 0x284   : > { %3350 = vmatprep.subr.bf16.mxu0 %v8712_v61 }
 0x286   : > { %3083 = vmatmul.mubr.bf16.gmra.mrb[12].mxu0 %v9916_v13  ;;  %v8722_v13 = vld [vmem:[#allocation5 + $0x8a0] ss:$8 sps:$4 sm:$0xff]  }
 0x287   : > { %3351 = vmatpush1.bf16.msra.mxu0 %v8710_v17  ;;  %3090 = vmatprep.mubr.bf16.mxu0 %v9923_v46  ;;  %v8725_v46 = vld [vmem:[#allocation5 + $0x8b0] ss:$8 sps:$4 sm:$0xff]  }
 0x288   : > { %3352 = vmatprep.subr.bf16.mxu0 %v8715_v33 }
 0x28b   : > { %3353 = vmatpush1.bf16.msra.mxu0 %v8713_v58 }
 0x28c   : > { %3354 = vmatprep.subr.bf16.mxu0 %v8718_v4 }
 0x28e   : > { %3091 = vmatmul.mubr.bf16.gmra.mrb[16].mxu0 %v9956_v12  ;;  %v10191_v12 = vrot.slane %v9361_v53, 1 }
 0x28f   : > { %3355 = vmatpush1.bf16.msra.mxu0 %v8716_v37  ;;  %3098 = vmatprep.mubr.bf16.mxu0 %v9963_v39  ;;  %v8733_v39 = vld [vmem:[#allocation5 + $0x8d4] ss:$8 sps:$4 sm:$0xff]  }
 0x290   : > { %3356 = vmatprep.subr.bf16.mxu0 %v8721_v31  ;;  %11190 = vst [vmem:[#allocation13_spill] sm:$0xff] %v10191_v12  ;;  %v2863_v30 = vsel %vm580_vm6, %v9946_v7, %v10191_v12  ;;  %v2862_v29 = vsel %vm580_vm6, %v9968_v36, %v10191_v12  ;;  %v8749_v7 = vld [vmem:[#allocation7 + $0x134] ss:$8 sps:$4 sm:$0xff]   ;;  %v8751_v36 = vld [vmem:[#allocation7 + $0x130] ss:$8 sps:$4 sm:$0xff]  }
 0x293   : > { %3357 = vmatpush1.bf16.msra.mxu0 %v8719_v54 }
 0x294   : > { %3358 = vmatprep.subr.bf16.mxu0 %v8724_v9 }
 0x296   : > { %3099 = vmatmul.mubr.bf16.gmra.mrb[20].mxu0 %v9975_v38  ;;  %v8731_v38 = vld [vmem:[#allocation5 + $0x8d0] ss:$8 sps:$4 sm:$0xff]  }
 0x297   : > { %3359 = vmatpush1.bf16.msra.mxu0 %v8722_v13  ;;  %3106 = vmatprep.mubr.bf16.mxu0 %v10108_v21  ;;  %v8736_v21 = vld [vmem:[#allocation5 + $0x8e4] ss:$8 sps:$4 sm:$0xff]  }
 0x298   : > { %3360 = vmatprep.subr.bf16.mxu0 %v8727_v20 }
 0x29b   : > { %3361 = vmatpush1.bf16.msra.mxu0 %v8725_v46 }
 0x29c   : > { %3362 = vmatprep.subr.bf16.mxu0 %v8730_v49 }
 0x29e   : > { %3107 = vmatmul.mubr.bf16.gmra.mrb[24].mxu0 %v10115_v59  ;;  %v8761_v59 = vld [vmem:[#allocation7 + $0x174] ss:$8 sps:$4 sm:$0xff]  }
 0x29f   : > { %3363 = vmatpush1.bf16.msra.mxu0 %v8728_v6  ;;  %3114 = vmatprep.mubr.bf16.mxu0 %v2863_v30 }
 0x2a0   : > { %3364 = vmatprep.subr.bf16.mxu0 %v8733_v39 }
 0x2a3   : > { %3365 = vmatpush1.bf16.msra.mxu0 %v8731_v38 }
 0x2a4   : > { %3366 = vmatprep.subr.bf16.mxu0 %v8736_v21 }
 0x2a6   : > { %3115 = vmatmul.mubr.bf16.gmra.mrb[28].mxu0 %v2862_v29 }
 0x2a7   : > { %3367 = vmatpush1.bf16.msra.mxu0 %v8734_v35  ;;  %3370 = vmatprep.mubr.bf16.mxu0 %v9810_v1  ;;  %v3175_v1 = vsel %vm1266_vm7, %v10022_v55, %v10191_v12  ;;  %v8752_v55 = vld [vmem:[#allocation7 + $0x144] ss:$8 sps:$4 sm:$0xff]  }
 0x2a8   : > { %3368 = vmatprep.subr.bf16.mxu0 %v8739_v62 }
 0x2ab   : > { %3369 = vmatpush1.bf16.msra.mxu0 %v8737_v27 }
 0x2ae   : > { %3371 = vmatmul.mubr.bf16.vlgmr.msra.gmra.mrb[0].mxu0 %v9826_v19  ;;  %v3174_v19 = vsel %vm1266_vm7, %v10033_v28, %v10191_v12  ;;  %v8755_v28 = vld [vmem:[#allocation7 + $0x154] ss:$8 sps:$4 sm:$0xff]  }
 0x2af   : > { %3378 = vmatprep.mubr.bf16.mxu0 %v9845_v24  ;;  %v8740_v24 = vld [vmem:[#allocation7 + $0x104] ss:$8 sps:$4 sm:$0xff]  }
 0x2b0   : > { %4198 = vmatprep.subr.bf16.mxu1 %v8740_v24 }
 0x2b6   : > { %3379 = vmatmul.mubr.bf16.gmra.mrb[4].mxu0 %v9852_v43  ;;  %v8742_v43 = vld [vmem:[#allocation7 + $0x100] ss:$8 sps:$4 sm:$0xff]  }
 0x2b7   : > { %3386 = vmatprep.mubr.bf16.mxu0 %v9887_v32  ;;  %4199 = vmatpush1.bf16.msra.mxu1 %v8742_v43  ;;  %v8743_v32 = vld [vmem:[#allocation7 + $0x114] ss:$8 sps:$4 sm:$0xff]  }
 0x2b8   : > { %4200 = vmatprep.subr.bf16.mxu1 %v8743_v32 }
 0x2be   : > { %3387 = vmatmul.mubr.bf16.gmra.mrb[8].mxu0 %v9894_v11  ;;  %v8745_v11 = vld [vmem:[#allocation7 + $0x110] ss:$8 sps:$4 sm:$0xff]  }
 0x2bf   : > { %3394 = vmatprep.mubr.bf16.mxu0 %v9930_v63  ;;  %4201 = vmatpush1.bf16.msra.mxu1 %v8745_v11  ;;  %v8746_v63 = vld [vmem:[#allocation7 + $0x124] ss:$8 sps:$4 sm:$0xff]  }
 0x2c0   : > { %4202 = vmatprep.subr.bf16.mxu1 %v8746_v63 }
 0x2c6   : > { %3395 = vmatmul.mubr.bf16.gmra.mrb[12].mxu0 %v9939_v44  ;;  %v8748_v44 = vld [vmem:[#allocation7 + $0x120] ss:$8 sps:$4 sm:$0xff]  }
 0x2c7   : > { %3402 = vmatprep.mubr.bf16.mxu0 %v10028_v25  ;;  %4203 = vmatpush1.bf16.msra.mxu1 %v8748_v44  ;;  %v8754_v25 = vld [vmem:[#allocation7 + $0x140] ss:$8 sps:$4 sm:$0xff]  }
 0x2c8   : > { %4204 = vmatprep.subr.bf16.mxu1 %v8749_v7 }
 0x2cb   : > { %4205 = vmatpush1.bf16.msra.mxu1 %v8751_v36 }
 0x2cc   : > { %4206 = vmatprep.subr.bf16.mxu1 %v8752_v55 }
 0x2ce   : > { %3403 = vmatmul.mubr.bf16.gmra.mrb[16].mxu0 %v10040_v34  ;;  %v8757_v34 = vld [vmem:[#allocation7 + $0x150] ss:$8 sps:$4 sm:$0xff]  }
 0x2cf   : > { %3410 = vmatprep.mubr.bf16.mxu0 %v10046_v45  ;;  %4207 = vmatpush1.bf16.msra.mxu1 %v8754_v25  ;;  %v8758_v45 = vld [vmem:[#allocation7 + $0x164] ss:$8 sps:$4 sm:$0xff]  }
 0x2d0   : > { %4208 = vmatprep.subr.bf16.mxu1 %v8755_v28 }
 0x2d3   : > { %4209 = vmatpush1.bf16.msra.mxu1 %v8757_v34 }
 0x2d4   : > { %4210 = vmatprep.subr.bf16.mxu1 %v8758_v45 }
 0x2d6   : > { %3411 = vmatmul.mubr.bf16.gmra.mrb[20].mxu0 %v10055_v51  ;;  %v8760_v51 = vld [vmem:[#allocation7 + $0x160] ss:$8 sps:$4 sm:$0xff]  }
 0x2d7   : > { %3418 = vmatprep.mubr.bf16.mxu0 %v10135_v47  ;;  %4211 = vmatpush1.bf16.msra.mxu1 %v8760_v51  ;;  %v8763_v47 = vld [vmem:[#allocation7 + $0x170] ss:$8 sps:$4 sm:$0xff]  }
 0x2d8   : > { %4212 = vmatprep.subr.bf16.mxu1 %v8761_v59 }
 0x2db   : > { %4213 = vmatpush1.bf16.msra.mxu1 %v8763_v47 }
 0x2de   : > { %3419 = vmatmul.mubr.bf16.gmra.mrb[24].mxu0 %v10143_v10  ;;  %v8764_v10 = vld [vmem:[#allocation7 + $0x184] ss:$8 sps:$4 sm:$0xff]  }
 0x2df   : > { %3426 = vmatprep.mubr.bf16.mxu0 %v3175_v1  ;;  %4214 = vmatprep.subr.bf16.mxu1 %v8764_v10 }
 0x2e0   : > { %4215 = vmatpush1.bf16.msra.mxu1 %v8766_v23 }
 0x2e1   : > { %4216 = vmatprep.subr.bf16.mxu1 %v8767_v52 }
 0x2e4   : > { %4217 = vmatpush1.bf16.msra.mxu1 %v8769_v18 }
 0x2e5   : > { %4218 = vmatprep.subr.bf16.mxu1 %v8770_v56 }
 0x2e6   : > { %3427 = vmatmul.mubr.bf16.gmra.mrb[28].mxu0 %v3174_v19 }
 0x2e8   : > { %4219 = vmatpush1.bf16.msra.mxu1 %v8772_v57 }
 0x2e9   : > { %4220 = vmatprep.subr.bf16.mxu1 %v8773_v3 }
 0x2ec   : > { %4221 = vmatpush1.bf16.msra.mxu1 %v8775_v22 }
 0x2ed   : > { %4222 = vmatprep.subr.bf16.mxu1 %v8776_v0 }
 0x2f0   : > { %4223 = vmatpush1.bf16.msra.mxu1 %v8778_v15 }
 0x2f1   : > { %4224 = vmatprep.subr.bf16.mxu1 %v8779_v16 }
 0x2f4   : > { %4225 = vmatpush1.bf16.msra.mxu1 %v8781_v8 }
 0x2f5   : > { %4226 = vmatprep.subr.bf16.mxu1 %v8782_v5 }
 0x2f8   : > { %4227 = vmatpush1.bf16.msra.mxu1 %v8784_v42 }
 0x2f9   : > { %4228 = vmatprep.subr.bf16.mxu1 %v8785_v40 }
 0x2fc   : > { %4229 = vmatpush1.bf16.msra.mxu1 %v8787_v41 }
 0x2fd   : > { %4455 = vmatprep.subr.bf16.mxu1 %v8790_v60 }
 0x381   : > { %v10220_v14 = vpop.f32.mrb[0].mxu0 }
 0x382   : > { %v10222_v48 = vpop.f32.mrb[1].mxu0  ;;  %v3479_v17 = vmul.f32 %v10220_v14, %v10220_v14 }
 0x383   : > { %v3376_v50 = vpop.f32.mrb[2].mxu0  ;;  %v3480_v37 = vmul.f32 %v10222_v48, %v10222_v48 }
 0x384   : > { %v3377_v2 = vpop.f32.mrb[3].mxu0 }
 0x389   : > { %v10224_v61 = vpop.f32.mrb[4].mxu0 }
 0x38a   : > { %v3451_v33 = vadd.f32 %v10224_v61, %v10220_v14  ;;  %v3481_v58 = vmul.f32 %v10224_v61, %v10224_v61  ;;  %v10232_v4 = vpop.f32.mrb[5].mxu0 }
 0x38b   : > { %v3464_v31 = vadd.f32 %v10232_v4, %v10222_v48  ;;  %v3482_v54 = vmul.f32 %v10232_v4, %v10232_v4  ;;  %v3384_v9 = vpop.f32.mrb[6].mxu0 }
 0x38c   : > { %v3495_v13 = vadd.f32 %v3481_v58, %v3479_v17  ;;  %v3385_v20 = vpop.f32.mrb[7].mxu0 }
 0x38d   : > { %v3508_v46 = vadd.f32 %v3482_v54, %v3480_v37 }
 0x391   : > { %v10240_v49 = vpop.f32.mrb[8].mxu0 }
 0x392   : > { %v3452_v53 = vadd.f32 %v3451_v33, %v10240_v49  ;;  %v3483_v6 = vmul.f32 %v10240_v49, %v10240_v49  ;;  %v10245_v39 = vpop.f32.mrb[9].mxu0 }
 0x393   : > { %v3465_v30 = vadd.f32 %v3464_v31, %v10245_v39  ;;  %v3484_v38 = vmul.f32 %v10245_v39, %v10245_v39  ;;  %v3392_v21 = vpop.f32.mrb[10].mxu0 }
 0x394   : > { %v3496_v29 = vadd.f32 %v3495_v13, %v3483_v6  ;;  %v3393_v35 = vpop.f32.mrb[11].mxu0 }
 0x395   : > { %v3509_v62 = vadd.f32 %v3508_v46, %v3484_v38 }
 0x399   : > { %v10250_v27 = vpop.f32.mrb[12].mxu0 }
 0x39a   : > { %v3453_v1 = vadd.f32 %v3452_v53, %v10250_v27  ;;  %v3485_v19 = vmul.f32 %v10250_v27, %v10250_v27  ;;  %v10255_v24 = vpop.f32.mrb[13].mxu0 }
 0x39b   : > { %v3466_v43 = vadd.f32 %v3465_v30, %v10255_v24  ;;  %v3486_v32 = vmul.f32 %v10255_v24, %v10255_v24  ;;  %v3400_v11 = vpop.f32.mrb[14].mxu0 }
 0x39c   : > { %v3497_v63 = vadd.f32 %v3496_v29, %v3485_v19  ;;  %v3401_v44 = vpop.f32.mrb[15].mxu0 }
 0x39d   : > { %v3510_v7 = vadd.f32 %v3509_v62, %v3486_v32 }
 0x3a1   : > { %v10260_v36 = vpop.f32.mrb[16].mxu0 }
 0x3a2   : > { %v3454_v55 = vadd.f32 %v3453_v1, %v10260_v36  ;;  %v3487_v25 = vmul.f32 %v10260_v36, %v10260_v36  ;;  %v10265_v28 = vpop.f32.mrb[17].mxu0 }
 0x3a3   : > { %v3467_v34 = vadd.f32 %v3466_v43, %v10265_v28  ;;  %v3488_v45 = vmul.f32 %v10265_v28, %v10265_v28  ;;  %v3408_v51 = vpop.f32.mrb[18].mxu0 }
 0x3a4   : > { %v3498_v59 = vadd.f32 %v3497_v63, %v3487_v25  ;;  %v3409_v47 = vpop.f32.mrb[19].mxu0 }
 0x3a5   : > { %v3511_v10 = vadd.f32 %v3510_v7, %v3488_v45 }
 0x3a9   : > { %v10270_v23 = vpop.f32.mrb[20].mxu0 }
 0x3aa   : > { %v3455_v52 = vadd.f32 %v3454_v55, %v10270_v23  ;;  %v3489_v18 = vmul.f32 %v10270_v23, %v10270_v23  ;;  %v10275_v56 = vpop.f32.mrb[21].mxu0 }
 0x3ab   : > { %v3468_v57 = vadd.f32 %v3467_v34, %v10275_v56  ;;  %v3490_v3 = vmul.f32 %v10275_v56, %v10275_v56  ;;  %v3416_v22 = vpop.f32.mrb[22].mxu0 }
 0x3ac   : > { %v3499_v0 = vadd.f32 %v3498_v59, %v3489_v18  ;;  %v3417_v15 = vpop.f32.mrb[23].mxu0 }
 0x3ad   : > { %v3512_v16 = vadd.f32 %v3511_v10, %v3490_v3 }
 0x3b1   : > { %v10280_v8 = vpop.f32.mrb[24].mxu0 }
 0x3b2   : > { %v3456_v5 = vadd.f32 %v3455_v52, %v10280_v8  ;;  %v3491_v42 = vmul.f32 %v10280_v8, %v10280_v8  ;;  %v10285_v40 = vpop.f32.mrb[25].mxu0 }
 0x3b3   : > { %v3469_v41 = vadd.f32 %v3468_v57, %v10285_v40  ;;  %v3492_v60 = vmul.f32 %v10285_v40, %v10285_v40  ;;  %v3424_v50 = vpop.f32.mrb[26].mxu0 }
 0x3b4   : > { %v3500_v2 = vadd.f32 %v3499_v0, %v3491_v42  ;;  %v3425_v17 = vpop.f32.mrb[27].mxu0 }
 0x3b5   : > { %v3513_v33 = vadd.f32 %v3512_v16, %v3492_v60 }
 0x3b9   : > { %v10290_v58 = vpop.f32.mrb[28].mxu0 }
 0x3ba   : > { %v3457_v37 = vadd.f32 %v3456_v5, %v10290_v58  ;;  %v3493_v31 = vmul.f32 %v10290_v58, %v10290_v58  ;;  %v10295_v54 = vpop.f32.mrb[29].mxu0 }
 0x3bb   : > { %v3470_v9 = vadd.f32 %v3469_v41, %v10295_v54  ;;  %v3494_v13 = vmul.f32 %v10295_v54, %v10295_v54  ;;  %v3432_v20 = vpop.f32.mrb[30].mxu0 }
 0x3bc   : > { %v3458_v46 = vrot.slane %v3457_v37, 4  ;;  %v3501_v53 = vadd.f32 %v3500_v2, %v3493_v31  ;;  %v3433_v6 = vpop.f32.mrb[31].mxu0 }
 0x3bd   : > { %v3471_v30 = vrot.slane %v3470_v9, 4  ;;  %v3514_v38 = vadd.f32 %v3513_v33, %v3494_v13 }
 0x3be   : > { %v3459_v21 = vadd.f32 %v3458_v46, %v3457_v37  ;;  %v3502_v29 = vrot.slane %v3501_v53, 4 }
 0x3bf   : > { %v3472_v35 = vadd.f32 %v3471_v30, %v3470_v9  ;;  %v3515_v62 = vrot.slane %v3514_v38, 4 }
 0x3c0   : > { %v3460_v1 = vrot.slane %v3459_v21, 2  ;;  %v3503_v19 = vadd.f32 %v3502_v29, %v3501_v53 }
 0x3c1   : > { %v3473_v43 = vrot.slane %v3472_v35, 2  ;;  %v3516_v32 = vadd.f32 %v3515_v62, %v3514_v38 }
 0x3c2   : > { %v3461_v11 = vadd.f32 %v3460_v1, %v3459_v21  ;;  %v3504_v63 = vrot.slane %v3503_v19, 2 }
 0x3c3   : > { %v3474_v44 = vadd.f32 %v3473_v43, %v3472_v35  ;;  %v3517_v7 = vrot.slane %v3516_v32, 2 }
 0x3c4   : > { %v3462_v55 = vrot.slane %v3461_v11, 1  ;;  %v3505_v25 = vadd.f32 %v3504_v63, %v3503_v19 }
 0x3c5   : > { %v3475_v34 = vrot.slane %v3474_v44, 1  ;;  %v3518_v45 = vadd.f32 %v3517_v7, %v3516_v32 }
 0x3c6   : > { %v3463_v51 = vadd.f32 %v3462_v55, %v3461_v11  ;;  %v3506_v59 = vrot.slane %v3505_v25, 1 }
 0x3c7   : > { %v3476_v47 = vadd.f32 %v3475_v34, %v3474_v44  ;;  %v3519_v10 = vrot.slane %v3518_v45, 1 }
 0x3c8   : > { %v10300_v52 = vmul.f32 0.015625, %v3463_v51  ;;  %v3507_v18 = vadd.f32 %v3506_v59, %v3505_v25 }
 0x3c9   : > { %v10302_v57 = vmul.f32 0.015625, %v3476_v47  ;;  %v3520_v3 = vadd.f32 %v3519_v10, %v3518_v45 }
 0x3ca   : > { %v3521_v22 = vmul.f32 0.015625, %v3507_v18  ;;  %v3537_v0 = vsub.f32 %v10290_v58, %v10300_v52  ;;  %v3539_v15 = vmul.f32 %v10300_v52, %v10300_v52  ;;  %v3523_v16 = vsub.f32 %v10220_v14, %v10300_v52 }
 0x3cb   : > { %v3522_v5 = vmul.f32 0.015625, %v3520_v3  ;;  %v3538_v42 = vsub.f32 %v10295_v54, %v10302_v57  ;;  %v3540_v41 = vmul.f32 %v10302_v57, %v10302_v57  ;;  %v3524_v60 = vsub.f32 %v10222_v48, %v10302_v57 }
 0x3cc   : > { %v3541_v50 = vsub.f32 %v3521_v22, %v3539_v15  ;;  %v3526_v2 = vsub.f32 %v10232_v4, %v10302_v57  ;;  %v3525_v17 = vsub.f32 %v10224_v61, %v10300_v52  ;;  %v3528_v14 = vsub.f32 %v10245_v39, %v10302_v57 }
 0x3cd   : > { %v3542_v33 = vsub.f32 %v3522_v5, %v3540_v41  ;;  %v3527_v58 = vsub.f32 %v10240_v49, %v10300_v52  ;;  %v3530_v37 = vsub.f32 %v10255_v24, %v10302_v57  ;;  %v3529_v48 = vsub.f32 %v10250_v27, %v10300_v52 }
 0x3ce   : > { %v3543_v31 = vadd.f32 1e-05, %v3541_v50  ;;  %v3532_v4 = vsub.f32 %v10265_v28, %v10302_v57  ;;  %v3531_v61 = vsub.f32 %v10260_v36, %v10300_v52  ;;  %v3534_v39 = vsub.f32 %v10275_v56, %v10302_v57  ;;  %v8791_v28 = vld [vmem:[#allocation7 + $0x10] ss:$8 sps:$4 sm:$0xff]  }
 0x3cf   : > { %v3544_v54 = vadd.f32 1e-05, %v3542_v33  ;;  %v3533_v49 = vsub.f32 %v10270_v23, %v10300_v52  ;;  %v3536_v9 = vsub.f32 %v10285_v40, %v10302_v57  ;;  %v3535_v13 = vsub.f32 %v10280_v8, %v10300_v52 }
 0x3d0   : > { %9172 = vrsqrt.f32 %v3543_v31 }
 0x3d1   : > { %9174 = vrsqrt.f32 %v3544_v54 }
 0x3da   : > { %v10340_v20 = vpop.eup %9172 }
 0x3db   : > { %v10342_v46 = vpop.eup %9174  ;;  %v3561_v53 = vmul.f32 %v10340_v20, %v3537_v0  ;;  %v3547_v6 = vmul.f32 %v10340_v20, %v3523_v16  ;;  %v3549_v30 = vmul.f32 %v10340_v20, %v3525_v17  ;;  %v3551_v38 = vmul.f32 %v10340_v20, %v3527_v58 }
 0x3dc   : > { %v3562_v21 = vmul.f32 %v10342_v46, %v3538_v42  ;;  %v3548_v29 = vmul.f32 %v10342_v46, %v3524_v60  ;;  %v3550_v35 = vmul.f32 %v10342_v46, %v3526_v2  ;;  %v3552_v62 = vmul.f32 %v10342_v46, %v3528_v14 }
 0x3dd   : > { %v3577_v1 = vmax.f32 %v3561_v53, 0.0  ;;  %v3563_v19 = vmax.f32 %v3547_v6, 0.0  ;;  %v3565_v43 = vmax.f32 %v3549_v30, 0.0  ;;  %v3567_v25 = vmax.f32 %v3551_v38, 0.0 }
 0x3de   : > { %v3578_v32 = vmax.f32 %v3562_v21, 0.0  ;;  %v3564_v11 = vmax.f32 %v3548_v29, 0.0  ;;  %v3566_v63 = vmax.f32 %v3550_v35, 0.0  ;;  %v3568_v59 = vmax.f32 %v3552_v62, 0.0 }
 0x3df   : > { %v10352_v44 = vpack.c.bf16 %v3577_v1, %v3577_v1  ;;  %v3579_v7 = vpack.c.bf16 %v3563_v19, %v3563_v19  ;;  %v3581_v55 = vpack.c.bf16 %v3565_v43, %v3565_v43  ;;  %v10361_v50 = vpack.c.bf16 %v3567_v25, %v3567_v25 }
 0x3e0   : > { %v10354_v34 = vpack.c.bf16 %v3578_v32, %v3578_v32  ;;  %v3580_v45 = vpack.c.bf16 %v3564_v11, %v3564_v11  ;;  %v3582_v51 = vpack.c.bf16 %v3566_v63, %v3566_v63  ;;  %v10359_v60 = vpack.c.bf16 %v3568_v59, %v3568_v59 }
 0x3e1   : > { %v3638_v47 = vshrl.u32 %v10352_v44, 16  ;;  %v3716_v10 = vshll.u32 %v10352_v44, 16  ;;  %v3596_v18 = vshrl.u32 %v3579_v7, 16  ;;  %v3602_v5 = vshrl.u32 %v3581_v55, 16 }
 0x3e2   : > { %v3641_v3 = vshrl.u32 %v10354_v34, 16  ;;  %v3599_v22 = vshrl.u32 %v3580_v45, 16  ;;  %v3605_v0 = vshrl.u32 %v3582_v51, 16  ;;  %v3664_v15 = vshll.u32 %v3580_v45, 16 }
 0x3e3   : > { %v3672_v16 = vshll.u32 %v3582_v51, 16  ;;  %v3715_v2 = vrot.slane %v3638_v47, 7  ;;  %v10365_v17 = vrot.slane %v3716_v10, 7  ;;  %v3720_v14 = vshll.u32 %v10354_v34, 16 }
 0x3e4   : > { %v3663_v42 = vrot.slane %v3599_v22, 7  ;;  %v3671_v41 = vrot.slane %v3605_v0, 7  ;;  %v3659_v33 = vrot.slane %v3596_v18, 7  ;;  %v10370_v58 = vrot.slane %v3641_v3, 7 }
 0x3e5   : > { %v3660_v53 = vshll.u32 %v3579_v7, 16  ;;  %v3740_v6 = vrot.slane %v3664_v15, 7  ;;  %v3742_v30 = vrot.slane %v3672_v16, 7  ;;  %v3667_v38 = vrot.slane %v3602_v5, 7 }
 0x3e6   : > { %v3666_v31 = vor.u32 %v3664_v15, %v3663_v42  ;;  %v3674_v54 = vor.u32 %v3672_v16, %v3671_v41  ;;  %v3668_v21 = vshll.u32 %v3581_v55, 16  ;;  %v3611_v1 = vshrl.u32 %v10359_v60, 16 }
 0x3e7   : > { %v3662_v62 = vor.u32 %v3660_v53, %v3659_v33  ;;  %v3739_v63 = vrot.slane %v3660_v53, 7  ;;  %v10419_v53 = vrot.slane %v3720_v14, 7  ;;  %v10480_v36 = vor.u32 %v3720_v14, %v10370_v58  ;;  %v8799_v14 = vld [vmem:[#allocation7 + $0x34] ss:$8 sps:$4 sm:$0xff]  }
 0x3e8   : > { %v3772_v29 = vsel %vm9576_vm4, %v3599_v22, %v3666_v31  ;;  %v3774_v35 = vsel %vm9576_vm4, %v3605_v0, %v3674_v54  ;;  %v3670_v11 = vor.u32 %v3668_v21, %v3667_v38  ;;  %v3741_v25 = vrot.slane %v3668_v21, 7 }
 0x3e9   : > { %v10379_v43 = vsel %vm9582_vm5, %v3772_v29, %v3740_v6  ;;  %v10383_v32 = vsel %vm9582_vm5, %v3774_v35, %v3742_v30  ;;  %v3771_v45 = vsel %vm9576_vm4, %v3596_v18, %v3662_v62  ;;  %v3679_v18 = vrot.slane %v3611_v1, 7 }
 0x3ea   : > { %v10387_v7 = vsel %vm446_vm2, %v10379_v43, 0  ;;  %v10391_v55 = vsel %vm446_vm2, %v10383_v32, 0  ;;  %v3773_v0 = vsel %vm9576_vm4, %v3602_v5, %v3670_v11  ;;  %v10402_v15 = vsel %vm9582_vm5, %v3771_v45, %v3739_v63 }
 0x3eb   : > { %v3926_v51 = vshrl.u32 %v10391_v55, 16  ;;  %v3928_v59 = vshll.u32 %v10391_v55, 16  ;;  %v3932_v22 = vshll.u32 %v10387_v7, 16  ;;  %v10406_v16 = vsel %vm9582_vm5, %v3773_v0, %v3741_v25 }
 0x3ec   : > { %v3940_v42 = vshrl.u32 %v10387_v7, 16  ;;  %v10411_v31 = vsel %vm446_vm2, %v10402_v15, 0  ;;  %v10415_v5 = vsel %vm446_vm2, %v10406_v16, 0  ;;  %v3718_v54 = vor.u32 %v3716_v10, %v3715_v2 }
 0x3ed   : > { %v3930_v41 = vrot.slane %v3928_v59, 1  ;;  %v3934_v33 = vrot.slane %v3932_v22, 1  ;;  %v3918_v6 = vshll.u32 %v10415_v5, 16  ;;  %v3922_v30 = vshll.u32 %v10411_v31, 16  ;;  %v8788_v59 = vld [vmem:[#allocation7] ss:$8 sps:$4 sm:$0xff]  }
 0x3ee   : > { %v3680_v29 = vshll.u32 %v10359_v60, 16  ;;  %v3608_v35 = vshrl.u32 %v10361_v50, 16  ;;  %v3916_v62 = vshrl.u32 %v10415_v5, 16  ;;  %v3676_v10 = vshll.u32 %v10361_v50, 16 }
 0x3ef   : > { %v10423_v38 = vor.u32 %v3930_v41, %v3926_v51  ;;  %v3942_v21 = vor.u32 %v3940_v42, %v3934_v33  ;;  %v3920_v11 = vrot.slane %v3918_v6, 1  ;;  %v3554_v2 = vmul.f32 %v10342_v46, %v3530_v37  ;;  %v8793_v42 = vld [vmem:[#allocation7 + $0x14] ss:$8 sps:$4 sm:$0xff]  }
 0x3f0   : > { %v3924_v25 = vrot.slane %v3922_v30, 1  ;;  %v3936_v45 = vshrl.u32 %v10411_v31, 16  ;;  %v3682_v51 = vor.u32 %v3680_v29, %v3679_v18  ;;  %v3744_v50 = vrot.slane %v3680_v29, 7 }
 0x3f1   : > { %v3935_v63 = vsel %vm580_vm6, %v10423_v38, %v3934_v33  ;;  %v10436_v60 = vor.u32 %v3920_v11, %v3916_v62  ;;  %v10439_v22 = vsel %vm580_vm6, %v3942_v21, %v3930_v41  ;;  %v3675_v0 = vrot.slane %v3608_v35, 7 }
 0x3f2   : > { %4230 = vmatprep.mubr.bf16.mxu1 %v3935_v63  ;;  %v3776_v24 = vsel %vm9576_vm4, %v3611_v1, %v3682_v51  ;;  %v3570_v37 = vmax.f32 %v3554_v2, 0.0  ;;  %v3553_v33 = vmul.f32 %v10340_v20, %v3529_v48  ;;  %v3556_v18 = vmul.f32 %v10342_v46, %v3532_v4  ;;  %v8796_v63 = vld [vmem:[#allocation7 + $0x24] ss:$8 sps:$4 sm:$0xff]  }
 0x3f3   : > { %v3925_v41 = vsel %vm580_vm6, %v10436_v60, %v3924_v25  ;;  %v10455_v6 = vsel %vm9582_vm5, %v3776_v24, %v3744_v50  ;;  %v3678_v30 = vor.u32 %v3676_v10, %v3675_v0  ;;  %v3743_v1 = vrot.slane %v3676_v10, 7 }
 0x3f4   : > { %4231 = vmatmul.mubr.bf16.vlgmr.msra.gmra.mrb[0].mxu1 %v3925_v41  ;;  %v10459_v27 = vsel %vm446_vm2, %v10455_v6, 0  ;;  %v3586_v48 = vpack.c.bf16 %v3570_v37, %v3570_v37  ;;  %v3569_v21 = vmax.f32 %v3553_v33, 0.0  ;;  %v3572_v29 = vmax.f32 %v3556_v18, 0.0  ;;  %v8794_v41 = vld [vmem:[#allocation7 + $0x20] ss:$8 sps:$4 sm:$0xff]  }
 0x3f5   : > { %4238 = vmatprep.mubr.bf16.mxu1 %v10439_v22  ;;  %4456 = vmatpush1.bf16.msra.mxu1 %v8788_v59  ;;  %v3938_v4 = vor.u32 %v3936_v45, %v3924_v25  ;;  %v3948_v62 = vshll.u32 %v10459_v27, 16  ;;  %v3775_v2 = vsel %vm9576_vm4, %v3608_v35, %v3678_v30  ;;  %v3555_v10 = vmul.f32 %v10340_v20, %v3531_v61 }
 0x3f6   : > { %4457 = vmatprep.subr.bf16.mxu1 %v8793_v42  ;;  %v10471_v51 = vsel %vm9582_vm5, %v3775_v2, %v3743_v1  ;;  %v3617_v50 = vshrl.u32 %v3586_v48, 16  ;;  %v3688_v59 = vshll.u32 %v3586_v48, 16  ;;  %v3585_v0 = vpack.c.bf16 %v3569_v21, %v3569_v21 }
 0x3f7   : > { %v3950_v25 = vrot.slane %v3948_v62, 1  ;;  %v10475_v45 = vsel %vm446_vm2, %v10471_v51, 0  ;;  %v3588_v35 = vpack.c.bf16 %v3572_v29, %v3572_v29  ;;  %v3571_v24 = vmax.f32 %v3555_v10, 0.0 }
 0x3f8   : > { %v3944_v61 = vshll.u32 %v10475_v45, 16  ;;  %v3687_v42 = vrot.slane %v3617_v50, 7  ;;  %v3614_v37 = vshrl.u32 %v3585_v0, 16  ;;  %v10487_v33 = vsel %vm9576_vm4, %v3638_v47, %v3718_v54 }
 0x3f9   : > { %4458 = vmatpush1.bf16.msra.mxu1 %v8791_v28  ;;  %v10490_v18 = vsel %vm580_vm6, %v3938_v4, %v3920_v11  ;;  %v3959_v30 = vshrl.u32 %v10459_v27, 16  ;;  %v3684_v1 = vshll.u32 %v3585_v0, 16  ;;  %v3746_v48 = vrot.slane %v3688_v59, 7 }
 0x3fa   : > { %4459 = vmatprep.subr.bf16.mxu1 %v8796_v63  ;;  %v3690_v58 = vor.u32 %v3688_v59, %v3687_v42  ;;  %v3683_v21 = vrot.slane %v3614_v37, 7  ;;  %v3623_v29 = vshrl.u32 %v3588_v35, 16  ;;  %v10495_v44 = vsel %vm580_vm6, %v10423_v38, %v3950_v25  ;;  %v8797_v38 = vld [vmem:[#allocation7 + $0x30] ss:$8 sps:$4 sm:$0xff]  }
 0x3fb   : > { %v3961_v47 = vor.u32 %v3959_v30, %v3950_v25  ;;  %v3587_v54 = vpack.c.bf16 %v3571_v24, %v3571_v24  ;;  %v3558_v11 = vmul.f32 %v10342_v46, %v3534_v39  ;;  %v3946_v28 = vrot.slane %v3944_v61, 1  ;;  %v8802_v39 = vld [vmem:[#allocation7 + $0x44] ss:$8 sps:$4 sm:$0xff]  }
 0x3fc   : > { %4239 = vmatmul.mubr.bf16.gmra.mrb[4].mxu1 %v10490_v18  ;;  %v3778_v4 = vsel %vm9576_vm4, %v3617_v50, %v3690_v58  ;;  %v3686_v62 = vor.u32 %v3684_v1, %v3683_v21  ;;  %v3696_v2 = vshll.u32 %v3588_v35, 16  ;;  %v3745_v63 = vrot.slane %v3684_v1, 7 }
 0x3fd   : > { %4246 = vmatprep.mubr.bf16.mxu1 %v10495_v44  ;;  %4460 = vmatpush1.bf16.msra.mxu1 %v8794_v41  ;;  %v10507_v10 = vsel %vm9582_vm5, %v3778_v4, %v3746_v48  ;;  %v3695_v56 = vrot.slane %v3623_v29, 7  ;;  %v3620_v59 = vshrl.u32 %v3587_v54, 16  ;;  %v3952_v25 = vshrl.u32 %v10475_v45, 16  ;;  %v8800_v48 = vld [vmem:[#allocation7 + $0x40] ss:$8 sps:$4 sm:$0xff]  }
 0x3fe   : > { %4461 = vmatprep.subr.bf16.mxu1 %v8799_v14  ;;  %v10511_v0 = vsel %vm446_vm2, %v10507_v10, 0  ;;  %v3777_v50 = vsel %vm9576_vm4, %v3614_v37, %v3686_v62  ;;  %v3574_v35 = vmax.f32 %v3558_v11, 0.0  ;;  %v3692_v41 = vshll.u32 %v3587_v54, 16  ;;  %v8805_v62 = vld [vmem:[#allocation7 + $0x54] ss:$8 sps:$4 sm:$0xff]  }
 0x3ff   : > { %v3962_v24 = vshll.u32 %v10511_v0, 16  ;;  %v10519_v61 = vsel %vm9582_vm5, %v3777_v50, %v3745_v63  ;;  %v3698_v42 = vor.u32 %v3696_v2, %v3695_v56  ;;  %v3748_v1 = vrot.slane %v3696_v2, 7 }
 0x400   : > { %v10523_v30 = vsel %vm446_vm2, %v10519_v61, 0  ;;  %v3691_v14 = vrot.slane %v3620_v59, 7  ;;  %v3590_v58 = vpack.c.bf16 %v3574_v35, %v3574_v35  ;;  %v10527_v37 = vsel %vm580_vm6, %v10436_v60, %v3946_v28 }
 0x401   : > { %4462 = vmatpush1.bf16.msra.mxu1 %v8797_v38  ;;  %v3954_v21 = vor.u32 %v3952_v25, %v3946_v28  ;;  %v3955_v11 = vshll.u32 %v10523_v30, 16  ;;  %v3780_v4 = vsel %vm9576_vm4, %v3623_v29, %v3698_v42  ;;  %v3964_v54 = vrot.slane %v3962_v24, 1  ;;  %v8803_v42 = vld [vmem:[#allocation7 + $0x50] ss:$8 sps:$4 sm:$0xff]  }
 0x402   : > { %4463 = vmatprep.subr.bf16.mxu1 %v8802_v39  ;;  %v10534_v2 = vsel %vm9582_vm5, %v3780_v4, %v3748_v1  ;;  %v3694_v63 = vor.u32 %v3692_v41, %v3691_v14  ;;  %v3629_v38 = vshrl.u32 %v3590_v58, 16  ;;  %v3973_v28 = vshrl.u32 %v10511_v0, 16 }
 0x403   : > { %v10538_v60 = vsel %vm446_vm2, %v10534_v2, 0  ;;  %v3747_v56 = vrot.slane %v3692_v41, 7  ;;  %v3704_v50 = vshll.u32 %v3590_v58, 16  ;;  %v10543_v29 = vsel %vm580_vm6, %v3961_v47, %v3964_v54 }
 0x404   : > { %4247 = vmatmul.mubr.bf16.gmra.mrb[8].mxu1 %v10527_v37  ;;  %v3976_v39 = vshll.u32 %v10538_v60, 16  ;;  %v3779_v25 = vsel %vm9576_vm4, %v3620_v59, %v3694_v63  ;;  %v3703_v35 = vrot.slane %v3629_v38, 7  ;;  %v3786_v24 = vsel %vm9576_vm4, %v3641_v3, %v10480_v36  ;;  %v8808_v59 = vld [vmem:[#allocation7 + $0x64] ss:$8 sps:$4 sm:$0xff]   ;;  %v8806_v63 = vld [vmem:[#allocation7 + $0x60] ss:$8 sps:$4 sm:$0xff]  }
 0x405   : > { %4254 = vmatprep.mubr.bf16.mxu1 %v10543_v29  ;;  %4464 = vmatpush1.bf16.msra.mxu1 %v8800_v48  ;;  %v3957_v41 = vrot.slane %v3955_v11, 1  ;;  %v10556_v47 = vsel %vm9582_vm5, %v3779_v25, %v3747_v56  ;;  %v3966_v1 = vshrl.u32 %v10523_v30, 16  ;;  %v3975_v14 = vor.u32 %v3973_v28, %v3964_v54 }
 0x406   : > { %4465 = vmatprep.subr.bf16.mxu1 %v8805_v62  ;;  %v10561_v34 = vsel %vm446_vm2, %v10556_v47, 0  ;;  %v3706_v58 = vor.u32 %v3704_v50, %v3703_v35  ;;  %v3557_v3 = vmul.f32 %v10340_v20, %v3533_v49  ;;  %v3978_v36 = vrot.slane %v3976_v39, 1 }
 0x407   : > { %v3750_v48 = vrot.slane %v3704_v50, 7  ;;  %v3560_v11 = vmul.f32 %v10342_v46, %v3536_v9  ;;  %v3559_v4 = vmul.f32 %v10340_v20, %v3535_v13  ;;  %v10576_v54 = vsel %vm580_vm6, %v3954_v21, %v3957_v41  ;;  %v8811_v9 = vld [vmem:[#allocation7 + $0x74] ss:$8 sps:$4 sm:$0xff]  }
 0x408   : > { %v3782_v23 = vsel %vm9576_vm4, %v3629_v38, %v3706_v58  ;;  %v3987_v49 = vshrl.u32 %v10538_v60, 16  ;;  %v3573_v62 = vmax.f32 %v3557_v3, 0.0  ;;  %v3969_v40 = vshll.u32 %v10561_v34, 16  ;;  %v8814_v3 = vld [vmem:[#allocation7 + $0x84] ss:$8 sps:$4 sm:$0xff]  }
 0x409   : > { %4466 = vmatpush1.bf16.msra.mxu1 %v8803_v42  ;;  %v10584_v57 = vsel %vm9582_vm5, %v3782_v23, %v3750_v48  ;;  %v3576_v8 = vmax.f32 %v3560_v11, 0.0  ;;  %v3575_v52 = vmax.f32 %v3559_v4, 0.0  ;;  %v3968_v13 = vor.u32 %v3966_v1, %v3957_v41  ;;  %v8809_v41 = vld [vmem:[#allocation7 + $0x70] ss:$8 sps:$4 sm:$0xff]  }
 0x40a   : > { %4467 = vmatprep.subr.bf16.mxu1 %v8808_v59  ;;  %v10588_v20 = vsel %vm446_vm2, %v10584_v57, 0  ;;  %v3589_v46 = vpack.c.bf16 %v3573_v62, %v3573_v62  ;;  %v3980_v21 = vshrl.u32 %v10561_v34, 16  ;;  %v10592_v38 = vsel %vm580_vm6, %v3975_v14, %v3978_v36 }
 0x40b   : > { %v3989_v28 = vor.u32 %v3987_v49, %v3978_v36  ;;  %v3990_v56 = vshll.u32 %v10588_v20, 16  ;;  %v3592_v50 = vpack.c.bf16 %v3576_v8, %v3576_v8  ;;  %v3591_v35 = vpack.c.bf16 %v3575_v52, %v3575_v52 }
 0x40c   : > { %4255 = vmatmul.mubr.bf16.gmra.mrb[12].mxu1 %v10576_v54  ;;  %v3626_v39 = vshrl.u32 %v3589_v46, 16  ;;  %v3700_v25 = vshll.u32 %v3589_v46, 16  ;;  %v10599_v42 = vsel %vm9582_vm5, %v3786_v24, %v10419_v53  ;;  %v3971_v1 = vrot.slane %v3969_v40, 1  ;;  %v8812_v40 = vld [vmem:[#allocation7 + $0x80] ss:$8 sps:$4 sm:$0xff]  }
 0x40d   : > { %4262 = vmatprep.mubr.bf16.mxu1 %v10592_v38  ;;  %4468 = vmatpush1.bf16.msra.mxu1 %v8806_v63  ;;  %v3635_v59 = vshrl.u32 %v3592_v50, 16  ;;  %v3712_v14 = vshll.u32 %v3592_v50, 16  ;;  %v10606_v58 = vsel %vm9582_vm5, %v10487_v33, %v10365_v17  ;;  %v3992_v36 = vrot.slane %v3990_v56, 1  ;;  %v8817_v46 = vld [vmem:[#allocation7 + $0x94] ss:$8 sps:$4 sm:$0xff]  }
 0x40e   : > { %4469 = vmatprep.subr.bf16.mxu1 %v8811_v9  ;;  %v3699_v48 = vrot.slane %v3626_v39, 7  ;;  %v3632_v11 = vshrl.u32 %v3591_v35, 16  ;;  %v3708_v53 = vshll.u32 %v3591_v35, 16  ;;  %v10609_v24 = vsel %vm580_vm6, %v3968_v13, %v3971_v1 }
 0x40f   : > { %v3711_v4 = vrot.slane %v3635_v59, 7  ;;  %v4001_v23 = vshrl.u32 %v10588_v20, 16  ;;  %v10614_v49 = vsel %vm446_vm2, %v10599_v42, 0  ;;  %v10617_v62 = vsel %vm580_vm6, %v3989_v28, %v3992_v36 }
 0x410   : > { %v3702_v17 = vor.u32 %v3700_v25, %v3699_v48  ;;  %v3749_v33 = vrot.slane %v3700_v25, 7  ;;  %v3707_v63 = vrot.slane %v3632_v11, 7  ;;  %v3752_v52 = vrot.slane %v3712_v14, 7  ;;  %v8815_v48 = vld [vmem:[#allocation7 + $0x90] ss:$8 sps:$4 sm:$0xff]  }
 0x411   : > { %4470 = vmatpush1.bf16.msra.mxu1 %v8809_v41  ;;  %v3714_v8 = vor.u32 %v3712_v14, %v3711_v4  ;;  %v4604_v9 = vrot.slane %v10391_v55, 1  ;;  %v4605_v13 = vrot.slane %v10387_v7, 1  ;;  %v3751_v35 = vrot.slane %v3708_v53, 7 }
 0x412   : > { %4471 = vmatprep.subr.bf16.mxu1 %v8814_v3  ;;  %v3781_v56 = vsel %vm9576_vm4, %v3626_v39, %v3702_v17  ;;  %v3710_v50 = vor.u32 %v3708_v53, %v3707_v63  ;;  %v10625_v28 = vsel %vm446_vm2, %v10606_v58, 0  ;;  %v4018_v7 = vshll.u32 %v10614_v49, 16 }
 0x413   : > { %v10629_v25 = vsel %vm9582_vm5, %v3781_v56, %v3749_v33  ;;  %v3784_v55 = vsel %vm9576_vm4, %v3635_v59, %v3714_v8  ;;  %v10635_v41 = vsel %vm1266_vm7, %v4604_v9, %v4605_v13  ;;  %v4601_v59 = vrot.slane %v10415_v5, 1 }
 0x414   : > { %4263 = vmatmul.mubr.bf16.gmra.mrb[16].mxu1 %v10609_v24  ;;  %v10640_v39 = vsel %vm446_vm2, %v10629_v25, 0  ;;  %v10644_v14 = vsel %vm9582_vm5, %v3784_v55, %v3752_v52  ;;  %v3783_v3 = vsel %vm9576_vm4, %v3632_v11, %v3710_v50  ;;  %v4011_v33 = vshll.u32 %v10625_v28, 16  ;;  %v8820_v11 = vld [vmem:[#allocation7 + $0xa4] ss:$8 sps:$4 sm:$0xff]  }
 0x415   : > { %4270 = vmatprep.mubr.bf16.mxu1 %v10617_v62  ;;  %4472 = vmatpush1.bf16.msra.mxu1 %v8812_v40  ;;  %v3983_v53 = vshll.u32 %v10640_v39, 16  ;;  %v3843_v4 = vsel %vm446_vm2, %v10644_v14, 0  ;;  %v10655_v17 = vsel %vm9582_vm5, %v3783_v3, %v3751_v35  ;;  %v3982_v26 = vor.u32 %v3980_v21, %v3971_v1 }
 0x416   : > { %4473 = vmatprep.subr.bf16.mxu1 %v8817_v46  ;;  %v4004_v63 = vshll.u32 %v3843_v4, 16  ;;  %v10660_v5 = vsel %vm446_vm2, %v10655_v17, 0  ;;  %v4602_v40 = vrot.slane %v10411_v31, 1  ;;  %v4003_v52 = vor.u32 %v4001_v23, %v3992_v36  ;;  %v8818_v46 = vld [vmem:[#allocation7 + $0xa0] ss:$8 sps:$4 sm:$0xff]  }
 0x417   : > { %v3985_v8 = vrot.slane %v3983_v53, 1  ;;  %v3997_v56 = vshll.u32 %v10660_v5, 16  ;;  %v10665_v19 = vsel %vm1266_vm7, %v4605_v13, %v4604_v9  ;;  %v4020_v50 = vrot.slane %v4018_v7, 1  ;;  %v8823_v7 = vld [vmem:[#allocation7 + $0xb4] ss:$8 sps:$4 sm:$0xff]  }
 0x418   : > { %v10668_v35 = vsel %vm1266_vm7, %v4601_v59, %v4602_v40  ;;  %v10671_v21 = vsel %vm1266_vm7, %v4602_v40, %v4601_v59  ;;  %v4611_v1 = vrot.slane %v10459_v27, 1  ;;  %v4006_v55 = vrot.slane %v4004_v63, 1 }
 0x419   : > { %4474 = vmatpush1.bf16.msra.mxu1 %v8815_v48  ;;  %v3994_v31 = vshrl.u32 %v10640_v39, 16  ;;  %v10675_v36 = vrot.slane %v4011_v33, 1  ;;  %v4609_v23 = vrot.slane %v10475_v45, 1  ;;  %v10679_v13 = vsel %vm580_vm6, %v3982_v26, %v3985_v8 }
 0x41a   : > { %4475 = vmatprep.subr.bf16.mxu1 %v8820_v11  ;;  %v4015_v3 = vshrl.u32 %v3843_v4, 16  ;;  %v10682_v53 = vsel %vm1266_vm7, %v4604_v9, %v4611_v1  ;;  %v4615_v27 = vrot.slane %v10511_v0, 1  ;;  %v3999_v40 = vrot.slane %v3997_v56, 1  ;;  %v8821_v0 = vld [vmem:[#allocation7 + $0xb0] ss:$8 sps:$4 sm:$0xff]  }
 0x41b   : > { %v3996_v48 = vor.u32 %v3994_v31, %v3985_v8  ;;  %v10686_v63 = vsel %vm1266_vm7, %v4601_v59, %v4609_v23  ;;  %v4613_v33 = vrot.slane %v10523_v30, 1  ;;  %v10691_v45 = vsel %vm580_vm6, %v4003_v52, %v4006_v55  ;;  %v8826_v56 = vld [vmem:[#allocation7 + $0xc4] ss:$8 sps:$4 sm:$0xff]  }
 0x41c   : > { %4271 = vmatmul.mubr.bf16.gmra.mrb[20].mxu1 %v10679_v13  ;;  %11192 = vst [vmem:[#allocation12_spill] sm:$0xff] %v10691_v45  ;;  %v10694_v26 = vsel %vm1266_vm7, %v4611_v1, %v4615_v27  ;;  %v4619_v9 = vrot.slane %v10538_v60, 1  ;;  %v4617_v11 = vrot.slane %v10561_v34, 1  ;;  %v10699_v59 = vor.u32 %v4015_v3, %v4006_v55 }
 0x41d   : > { %4278 = vmatprep.mubr.bf16.mxu1 %v10691_v45  ;;  %4476 = vmatpush1.bf16.msra.mxu1 %v8818_v46  ;;  %v10702_v30 = vsel %vm1266_vm7, %v4609_v23, %v4613_v33  ;;  %v4623_v8 = vrot.slane %v10588_v20, 1  ;;  %v4621_v52 = vrot.slane %v10640_v39, 1  ;;  %v10712_v34 = vrot.slane %v3843_v4, 1 }
 0x41e   : > { %4477 = vmatprep.subr.bf16.mxu1 %v8823_v7  ;;  %v10707_v1 = vsel %vm1266_vm7, %v4615_v27, %v4619_v9  ;;  %v10710_v60 = vsel %vm1266_vm7, %v4613_v33, %v4617_v11  ;;  %v10715_v46 = vrot.slane %v10660_v5, 1  ;;  %v4631_v39 = vrot.slane %v10614_v49, 1  ;;  %v8824_v33 = vld [vmem:[#allocation7 + $0xc0] ss:$8 sps:$4 sm:$0xff]  }
 0x41f   : > { %v10718_v31 = vsel %vm1266_vm7, %v4619_v9, %v4623_v8  ;;  %v10721_v20 = vsel %vm1266_vm7, %v4617_v11, %v4621_v52  ;;  %v4629_v23 = vrot.slane %v10625_v28, 1  ;;  %v10727_v7 = vsel %vm1266_vm7, %v4623_v8, %v10712_v34 }
 0x420   : > { %11193 = vst [vmem:[#allocation14_spill] sm:$0xff] %v10715_v46  ;;  %v10731_v4 = vsel %vm1266_vm7, %v4621_v52, %v10715_v46  ;;  %v5265_v3 = vshrl.u32 %v10614_v49, 16  ;;  %v5261_v27 = vshrl.u32 %v10625_v28, 16  ;;  %v10737_v9 = vsel %vm1266_vm7, %v10712_v34, %v4631_v39  ;;  %v8829_v49 = vld [vmem:[#allocation7 + $0xd4] ss:$8 sps:$4 sm:$0xff]  }
 0x421   : > { %4478 = vmatpush1.bf16.msra.mxu1 %v8821_v0  ;;  %v10741_v11 = vsel %vm1266_vm7, %v10715_v46, %v4629_v23  ;;  %v10745_v8 = vsel %vm1266_vm7, %v4631_v39, %v10712_v34  ;;  %v10749_v52 = vsel %vm1266_vm7, %v4629_v23, %v10715_v46  ;;  %v10753_v12 = vsel %vm580_vm6, %v3996_v48, %v3999_v40  ;;  %v8832_v48 = vld [vmem:[#allocation7 + $0xe4] ss:$8 sps:$4 sm:$0xff]   ;;  %v8830_v46 = vld [vmem:[#allocation7 + $0xe0] ss:$8 sps:$4 sm:$0xff]  }
 0x422   : > { %4479 = vmatprep.subr.bf16.mxu1 %v8826_v56  ;;  %v5267_v28 = vor.u32 %v5265_v3, %v4020_v50  ;;  %v5263_v0 = vor.u32 %v5261_v27, %v10675_v36  ;;  %v10758_v45 = vsel %vm580_vm6, %v10699_v59, %v4020_v50  ;;  %v8827_v56 = vld [vmem:[#allocation7 + $0xd0] ss:$8 sps:$4 sm:$0xff]   ;;  %v4008_v3 = vshrl.u32 %v10660_v5, 16  ;;  %v8835_v50 = vld [vmem:[#allocation7 + $0xf4] ss:$8 sps:$4 sm:$0xff]  }
 0x423   : > { %v8833_v5 = vld [vmem:[#allocation7 + $0xf0] ss:$8 sps:$4 sm:$0xff]  }
 0x424   : > { %4279 = vmatmul.mubr.bf16.gmra.mrb[24].mxu1 %v10753_v12  ;;  %v10761_v39 = vsel %vm580_vm6, %v5267_v28, %v4006_v55  ;;  %v10764_v23 = vsel %vm580_vm6, %v5263_v0, %v3999_v40  ;;  %v10768_v27 = vor.u32 %v4008_v3, %v3999_v40  ;;  %v8836_v40 = vld [vmem:[#allocation7 + $0x200] ss:$8 sps:$4 sm:$0xff]   ;;  %v8847_v0 = vld [vmem:[#allocation7 + $0x234] ss:$8 sps:$4 sm:$0xff]   ;;  %v8850_v3 = vld [vmem:[#allocation7 + $0x244] ss:$8 sps:$4 sm:$0xff]  }
 0x425   : > { %4286 = vmatprep.mubr.bf16.mxu1 %v10758_v45  ;;  %4480 = vmatpush1.bf16.msra.mxu1 %v8824_v33  ;;  %v8838_v33 = vld [vmem:[#allocation7 + $0x204] ss:$8 sps:$4 sm:$0xff]   ;;  %v8842_v28 = vld [vmem:[#allocation7 + $0x220] ss:$8 sps:$4 sm:$0xff]  }
 0x426   : > { %4481 = vmatprep.subr.bf16.mxu1 %v8829_v49  ;;  %v10773_v55 = vsel %vm580_vm6, %v10768_v27, %v10675_v36  ;;  %v8841_v49 = vld [vmem:[#allocation7 + $0x214] ss:$8 sps:$4 sm:$0xff]   ;;  %v8839_v36 = vld [vmem:[#allocation7 + $0x210] ss:$8 sps:$4 sm:$0xff]  }
 0x429   : > { %4482 = vmatpush1.bf16.msra.mxu1 %v8827_v56  ;;  %v8845_v56 = vld [vmem:[#allocation7 + $0x230] ss:$8 sps:$4 sm:$0xff]  }
 0x42a   : > { %4483 = vmatprep.subr.bf16.mxu1 %v8832_v48  ;;  %v8848_v48 = vld [vmem:[#allocation7 + $0x240] ss:$8 sps:$4 sm:$0xff]  }
 0x42c   : > { %4287 = vmatmul.mubr.bf16.gmra.mrb[28].mxu1 %v10773_v55 }
 0x42d   : > { %4484 = vmatpush1.bf16.msra.mxu1 %v8830_v46  ;;  %7443 = vmatprep.mubr.msk.bf16.mxu1 %vm446_vm2, %v10383_v32  ;;  %v8844_v46 = vld [vmem:[#allocation7 + $0x224] ss:$8 sps:$4 sm:$0xff]  }
 0x42e   : > { %4485 = vmatprep.subr.bf16.mxu1 %v8835_v50  ;;  %v8853_v50 = vld [vmem:[#allocation7 + $0x254] ss:$8 sps:$4 sm:$0xff]  }
 0x431   : > { %4486 = vmatpush1.bf16.msra.mxu1 %v8833_v5  ;;  %v8851_v5 = vld [vmem:[#allocation7 + $0x250] ss:$8 sps:$4 sm:$0xff]  }
 0x432   : > { %4809 = vmatprep.subr.bf16.mxu1 %v8838_v33  ;;  %v8856_v33 = vld [vmem:[#allocation7 + $0x264] ss:$8 sps:$4 sm:$0xff]  }
 0x434   : > { %7444 = vmatmul.mubr.msk.bf16.vlgmr.msra.gmra.mrb[0].mxu1 %vm446_vm2, %v10406_v16 }
 0x435   : > { %7445 = vmatprep.mubr.msk.bf16.mxu1 %vm446_vm2, %v10379_v43  ;;  %4810 = vmatpush1.bf16.msra.mxu1 %v8836_v40  ;;  %v8854_v40 = vld [vmem:[#allocation7 + $0x260] ss:$8 sps:$4 sm:$0xff]  }
 0x436   : > { %4811 = vmatprep.subr.bf16.mxu1 %v8841_v49  ;;  %v8859_v49 = vld [vmem:[#allocation7 + $0x274] ss:$8 sps:$4 sm:$0xff]  }
 0x439   : > { %4812 = vmatpush1.bf16.msra.mxu1 %v8839_v36  ;;  %v8857_v36 = vld [vmem:[#allocation7 + $0x270] ss:$8 sps:$4 sm:$0xff]  }
 0x43a   : > { %4813 = vmatprep.subr.bf16.mxu1 %v8844_v46  ;;  %v8862_v46 = vld [vmem:[#allocation7 + $0x284] ss:$8 sps:$4 sm:$0xff]  }
 0x43c   : > { %7446 = vmatmul.mubr.msk.bf16.gmra.mrb[4].mxu1 %vm446_vm2, %v10402_v15 }
 0x43d   : > { %7447 = vmatprep.mubr.msk.bf16.mxu1 %vm446_vm2, %v10383_v32  ;;  %4814 = vmatpush1.bf16.msra.mxu1 %v8842_v28  ;;  %v8860_v28 = vld [vmem:[#allocation7 + $0x280] ss:$8 sps:$4 sm:$0xff]  }
 0x43e   : > { %4815 = vmatprep.subr.bf16.mxu1 %v8847_v0  ;;  %v8865_v0 = vld [vmem:[#allocation7 + $0x294] ss:$8 sps:$4 sm:$0xff]  }
 0x441   : > { %4816 = vmatpush1.bf16.msra.mxu1 %v8845_v56  ;;  %v8863_v56 = vld [vmem:[#allocation7 + $0x290] ss:$8 sps:$4 sm:$0xff]  }
 0x442   : > { %4817 = vmatprep.subr.bf16.mxu1 %v8850_v3  ;;  %v8868_v3 = vld [vmem:[#allocation7 + $0x2a4] ss:$8 sps:$4 sm:$0xff]  }
 0x444   : > { %7448 = vmatmul.mubr.msk.bf16.gmra.mrb[8].mxu1 %vm446_vm2, %v10406_v16 }
 0x445   : > { %7449 = vmatprep.mubr.msk.bf16.mxu1 %vm446_vm2, %v10455_v6  ;;  %4818 = vmatpush1.bf16.msra.mxu1 %v8848_v48  ;;  %v8866_v48 = vld [vmem:[#allocation7 + $0x2a0] ss:$8 sps:$4 sm:$0xff]  }
 0x446   : > { %4819 = vmatprep.subr.bf16.mxu1 %v8853_v50  ;;  %v8871_v50 = vld [vmem:[#allocation7 + $0x2b4] ss:$8 sps:$4 sm:$0xff]  }
 0x449   : > { %4820 = vmatpush1.bf16.msra.mxu1 %v8851_v5  ;;  %v8869_v5 = vld [vmem:[#allocation7 + $0x2b0] ss:$8 sps:$4 sm:$0xff]  }
 0x44a   : > { %4821 = vmatprep.subr.bf16.mxu1 %v8856_v33  ;;  %v8874_v33 = vld [vmem:[#allocation7 + $0x2c4] ss:$8 sps:$4 sm:$0xff]  }
 0x44c   : > { %7450 = vmatmul.mubr.msk.bf16.gmra.mrb[12].mxu1 %vm446_vm2, %v10471_v51 }
 0x44d   : > { %7451 = vmatprep.mubr.msk.bf16.mxu1 %vm446_vm2, %v10507_v10  ;;  %4822 = vmatpush1.bf16.msra.mxu1 %v8854_v40  ;;  %v8872_v40 = vld [vmem:[#allocation7 + $0x2c0] ss:$8 sps:$4 sm:$0xff]  }
 0x44e   : > { %4823 = vmatprep.subr.bf16.mxu1 %v8859_v49  ;;  %v8877_v49 = vld [vmem:[#allocation7 + $0x2d4] ss:$8 sps:$4 sm:$0xff]  }
 0x451   : > { %4824 = vmatpush1.bf16.msra.mxu1 %v8857_v36  ;;  %v8875_v36 = vld [vmem:[#allocation7 + $0x2d0] ss:$8 sps:$4 sm:$0xff]  }
 0x452   : > { %4825 = vmatprep.subr.bf16.mxu1 %v8862_v46  ;;  %v8880_v46 = vld [vmem:[#allocation7 + $0x2e4] ss:$8 sps:$4 sm:$0xff]  }
 0x454   : > { %7452 = vmatmul.mubr.msk.bf16.gmra.mrb[16].mxu1 %vm446_vm2, %v10519_v61 }
 0x455   : > { %7453 = vmatprep.mubr.msk.bf16.mxu1 %vm446_vm2, %v10534_v2  ;;  %4826 = vmatpush1.bf16.msra.mxu1 %v8860_v28  ;;  %v8878_v28 = vld [vmem:[#allocation7 + $0x2e0] ss:$8 sps:$4 sm:$0xff]  }
 0x456   : > { %4827 = vmatprep.subr.bf16.mxu1 %v8865_v0  ;;  %v8883_v0 = vld [vmem:[#allocation7 + $0x2f4] ss:$8 sps:$4 sm:$0xff]  }
 0x459   : > { %4828 = vmatpush1.bf16.msra.mxu1 %v8863_v56  ;;  %v8881_v56 = vld [vmem:[#allocation7 + $0x2f0] ss:$8 sps:$4 sm:$0xff]  }
 0x45a   : > { %4829 = vmatprep.subr.bf16.mxu1 %v8868_v3  ;;  %v8886_v3 = vld [vmem:[#allocation7 + $0x304] ss:$8 sps:$4 sm:$0xff]  }
 0x45c   : > { %7454 = vmatmul.mubr.msk.bf16.gmra.mrb[20].mxu1 %vm446_vm2, %v10556_v47 }
 0x45d   : > { %7455 = vmatprep.mubr.msk.bf16.mxu1 %vm446_vm2, %v10584_v57  ;;  %4830 = vmatpush1.bf16.msra.mxu1 %v8866_v48  ;;  %v8884_v48 = vld [vmem:[#allocation7 + $0x300] ss:$8 sps:$4 sm:$0xff]  }
 0x45e   : > { %4831 = vmatprep.subr.bf16.mxu1 %v8871_v50  ;;  %v8889_v50 = vld [vmem:[#allocation7 + $0x314] ss:$8 sps:$4 sm:$0xff]  }
 0x461   : > { %4832 = vmatpush1.bf16.msra.mxu1 %v8869_v5  ;;  %v8887_v5 = vld [vmem:[#allocation7 + $0x310] ss:$8 sps:$4 sm:$0xff]  }
 0x462   : > { %4833 = vmatprep.subr.bf16.mxu1 %v8874_v33  ;;  %v8892_v33 = vld [vmem:[#allocation7 + $0x324] ss:$8 sps:$4 sm:$0xff]  }
 0x464   : > { %7456 = vmatmul.mubr.msk.bf16.gmra.mrb[24].mxu1 %vm446_vm2, %v10629_v25 }
 0x465   : > { %7457 = vmatprep.mubr.msk.bf16.mxu1 %vm446_vm2, %v10644_v14  ;;  %4834 = vmatpush1.bf16.msra.mxu1 %v8872_v40  ;;  %v8890_v40 = vld [vmem:[#allocation7 + $0x320] ss:$8 sps:$4 sm:$0xff]  }
 0x466   : > { %4835 = vmatprep.subr.bf16.mxu1 %v8877_v49  ;;  %v8895_v49 = vld [vmem:[#allocation7 + $0x334] ss:$8 sps:$4 sm:$0xff]  }
 0x469   : > { %4836 = vmatpush1.bf16.msra.mxu1 %v8875_v36  ;;  %v8898_v36 = vld [vmem:[#allocation7 + $0x344] ss:$8 sps:$4 sm:$0xff]  }
 0x46a   : > { %4837 = vmatprep.subr.bf16.mxu1 %v8880_v46  ;;  %v8901_v46 = vld [vmem:[#allocation7 + $0x354] ss:$8 sps:$4 sm:$0xff]  }
 0x46c   : > { %7458 = vmatmul.mubr.msk.bf16.gmra.mrb[28].mxu1 %vm446_vm2, %v10655_v17 }
 0x46d   : > { %4838 = vmatpush1.bf16.msra.mxu1 %v8878_v28  ;;  %4841 = vmatprep.mubr.bf16.mxu1 %v10635_v41  ;;  %v8893_v41 = vld [vmem:[#allocation7 + $0x330] ss:$8 sps:$4 sm:$0xff]  }
 0x46e   : > { %4839 = vmatprep.subr.bf16.mxu1 %v8883_v0  ;;  %v8899_v28 = vld [vmem:[#allocation7 + $0x350] ss:$8 sps:$4 sm:$0xff]   ;;  %v8904_v0 = vld [vmem:[#allocation7 + $0x364] ss:$8 sps:$4 sm:$0xff]  }
 0x471   : > { %4840 = vmatpush1.bf16.msra.mxu1 %v8881_v56  ;;  %v8902_v56 = vld [vmem:[#allocation7 + $0x360] ss:$8 sps:$4 sm:$0xff]  }
 0x472   : > { %5115 = vmatprep.subr.bf16.mxu1 %v8886_v3  ;;  %v8907_v3 = vld [vmem:[#allocation7 + $0x374] ss:$8 sps:$4 sm:$0xff]  }
 0x474   : > { %4842 = vmatmul.mubr.bf16.vlgmr.msra.gmra.mrb[0].mxu1 %v10668_v35  ;;  %v8896_v35 = vld [vmem:[#allocation7 + $0x340] ss:$8 sps:$4 sm:$0xff]  }
 0x475   : > { %4849 = vmatprep.mubr.bf16.mxu1 %v10665_v19  ;;  %5116 = vmatpush1.bf16.msra.mxu1 %v8884_v48  ;;  %v8905_v48 = vld [vmem:[#allocation7 + $0x370] ss:$8 sps:$4 sm:$0xff]  }
 0x476   : > { %5117 = vmatprep.subr.bf16.mxu1 %v8889_v50  ;;  %v8910_v50 = vld [vmem:[#allocation7 + $0x384] ss:$8 sps:$4 sm:$0xff]  }
 0x479   : > { %5118 = vmatpush1.bf16.msra.mxu1 %v8887_v5  ;;  %v8908_v5 = vld [vmem:[#allocation7 + $0x380] ss:$8 sps:$4 sm:$0xff]  }
 0x47a   : > { %5119 = vmatprep.subr.bf16.mxu1 %v8892_v33  ;;  %v8913_v33 = vld [vmem:[#allocation7 + $0x394] ss:$8 sps:$4 sm:$0xff]  }
 0x47c   : > { %4850 = vmatmul.mubr.bf16.gmra.mrb[4].mxu1 %v10671_v21 }
 0x47d   : > { %4857 = vmatprep.mubr.bf16.mxu1 %v10682_v53  ;;  %5120 = vmatpush1.bf16.msra.mxu1 %v8890_v40  ;;  %v8911_v40 = vld [vmem:[#allocation7 + $0x390] ss:$8 sps:$4 sm:$0xff]  }
 0x47e   : > { %5121 = vmatprep.subr.bf16.mxu1 %v8895_v49  ;;  %v8916_v49 = vld [vmem:[#allocation7 + $0x3a4] ss:$8 sps:$4 sm:$0xff]  }
 0x481   : > { %5122 = vmatpush1.bf16.msra.mxu1 %v8893_v41  ;;  %v8914_v41 = vld [vmem:[#allocation7 + $0x3a0] ss:$8 sps:$4 sm:$0xff]  }
 0x482   : > { %5123 = vmatprep.subr.bf16.mxu1 %v8898_v36  ;;  %v8919_v36 = vld [vmem:[#allocation7 + $0x3b4] ss:$8 sps:$4 sm:$0xff]  }
 0x484   : > { %4858 = vmatmul.mubr.bf16.gmra.mrb[8].mxu1 %v10686_v63 }
 0x485   : > { %4865 = vmatprep.mubr.bf16.mxu1 %v10694_v26  ;;  %5124 = vmatpush1.bf16.msra.mxu1 %v8896_v35  ;;  %v8917_v35 = vld [vmem:[#allocation7 + $0x3b0] ss:$8 sps:$4 sm:$0xff]  }
 0x486   : > { %5125 = vmatprep.subr.bf16.mxu1 %v8901_v46  ;;  %v8922_v46 = vld [vmem:[#allocation7 + $0x3c4] ss:$8 sps:$4 sm:$0xff]  }
 0x489   : > { %5126 = vmatpush1.bf16.msra.mxu1 %v8899_v28  ;;  %v8920_v28 = vld [vmem:[#allocation7 + $0x3c0] ss:$8 sps:$4 sm:$0xff]  }
 0x48a   : > { %5127 = vmatprep.subr.bf16.mxu1 %v8904_v0  ;;  %v8925_v0 = vld [vmem:[#allocation7 + $0x3d4] ss:$8 sps:$4 sm:$0xff]  }
 0x48c   : > { %4866 = vmatmul.mubr.bf16.gmra.mrb[12].mxu1 %v10702_v30 }
 0x48d   : > { %4873 = vmatprep.mubr.bf16.mxu1 %v10707_v1  ;;  %5128 = vmatpush1.bf16.msra.mxu1 %v8902_v56  ;;  %v8923_v56 = vld [vmem:[#allocation7 + $0x3d0] ss:$8 sps:$4 sm:$0xff]  }
 0x48e   : > { %5129 = vmatprep.subr.bf16.mxu1 %v8907_v3  ;;  %v8928_v3 = vld [vmem:[#allocation7 + $0x3e4] ss:$8 sps:$4 sm:$0xff]  }
 0x491   : > { %5130 = vmatpush1.bf16.msra.mxu1 %v8905_v48  ;;  %v8926_v48 = vld [vmem:[#allocation7 + $0x3e0] ss:$8 sps:$4 sm:$0xff]  }
 0x492   : > { %5131 = vmatprep.subr.bf16.mxu1 %v8910_v50  ;;  %v8931_v50 = vld [vmem:[#allocation7 + $0x3f4] ss:$8 sps:$4 sm:$0xff]  }
 0x494   : > { %4874 = vmatmul.mubr.bf16.gmra.mrb[16].mxu1 %v10710_v60 }
 0x495   : > { %4881 = vmatprep.mubr.bf16.mxu1 %v10718_v31  ;;  %5132 = vmatpush1.bf16.msra.mxu1 %v8908_v5  ;;  %v8929_v5 = vld [vmem:[#allocation7 + $0x3f0] ss:$8 sps:$4 sm:$0xff]  }
 0x496   : > { %5133 = vmatprep.subr.bf16.mxu1 %v8913_v33  ;;  %v8934_v33 = vld [vmem:[#allocation7 + $0x404] ss:$8 sps:$4 sm:$0xff]  }
 0x499   : > { %5134 = vmatpush1.bf16.msra.mxu1 %v8911_v40  ;;  %v8932_v40 = vld [vmem:[#allocation7 + $0x400] ss:$8 sps:$4 sm:$0xff]  }
 0x49a   : > { %5135 = vmatprep.subr.bf16.mxu1 %v8916_v49  ;;  %v8937_v49 = vld [vmem:[#allocation7 + $0x414] ss:$8 sps:$4 sm:$0xff]  }
 0x49c   : > { %4882 = vmatmul.mubr.bf16.gmra.mrb[20].mxu1 %v10721_v20 }
 0x49d   : > { %4889 = vmatprep.mubr.bf16.mxu1 %v10727_v7  ;;  %5136 = vmatpush1.bf16.msra.mxu1 %v8914_v41  ;;  %v8935_v41 = vld [vmem:[#allocation7 + $0x410] ss:$8 sps:$4 sm:$0xff]  }
 0x49e   : > { %5137 = vmatprep.subr.bf16.mxu1 %v8919_v36  ;;  %v8940_v36 = vld [vmem:[#allocation7 + $0x424] ss:$8 sps:$4 sm:$0xff]  }
 0x4a1   : > { %5138 = vmatpush1.bf16.msra.mxu1 %v8917_v35  ;;  %v8938_v35 = vld [vmem:[#allocation7 + $0x420] ss:$8 sps:$4 sm:$0xff]  }
 0x4a2   : > { %5139 = vmatprep.subr.bf16.mxu1 %v8922_v46  ;;  %v8941_v46 = vld [vmem:[#allocation7 + $0x430] ss:$8 sps:$4 sm:$0xff]  }
 0x4a4   : > { %4890 = vmatmul.mubr.bf16.gmra.mrb[24].mxu1 %v10731_v4 }
 0x4a5   : > { %4897 = vmatprep.mubr.bf16.mxu1 %v10737_v9  ;;  %5140 = vmatpush1.bf16.msra.mxu1 %v8920_v28  ;;  %v8944_v28 = vld [vmem:[#allocation7 + $0x440] ss:$8 sps:$4 sm:$0xff]  }
 0x4a6   : > { %5141 = vmatprep.subr.bf16.mxu1 %v8925_v0  ;;  %v8949_v0 = vld [vmem:[#allocation7 + $0x454] ss:$8 sps:$4 sm:$0xff]  }
 0x4a9   : > { %5142 = vmatpush1.bf16.msra.mxu1 %v8923_v56  ;;  %v8947_v56 = vld [vmem:[#allocation7 + $0x450] ss:$8 sps:$4 sm:$0xff]  }
 0x4aa   : > { %5143 = vmatprep.subr.bf16.mxu1 %v8928_v3  ;;  %v8952_v3 = vld [vmem:[#allocation7 + $0x464] ss:$8 sps:$4 sm:$0xff]  }
 0x4ac   : > { %4898 = vmatmul.mubr.bf16.gmra.mrb[28].mxu1 %v10741_v11 }
 0x4ad   : > { %5144 = vmatpush1.bf16.msra.mxu1 %v8926_v48  ;;  %7523 = vmatprep.mubr.msk.bf16.mxu1 %vm446_vm2, %v10379_v43  ;;  %v8943_v43 = vld [vmem:[#allocation7 + $0x434] ss:$8 sps:$4 sm:$0xff]   ;;  %v8950_v48 = vld [vmem:[#allocation7 + $0x460] ss:$8 sps:$4 sm:$0xff]  }
 0x4ae   : > { %5145 = vmatprep.subr.bf16.mxu1 %v8931_v50  ;;  %v8955_v50 = vld [vmem:[#allocation7 + $0x474] ss:$8 sps:$4 sm:$0xff]  }
 0x4b1   : > { %5146 = vmatpush1.bf16.msra.mxu1 %v8929_v5  ;;  %v8953_v5 = vld [vmem:[#allocation7 + $0x470] ss:$8 sps:$4 sm:$0xff]  }
 0x4b2   : > { %5431 = vmatprep.subr.bf16.mxu1 %v8934_v33  ;;  %v8958_v33 = vld [vmem:[#allocation7 + $0x484] ss:$8 sps:$4 sm:$0xff]  }
 0x4b4   : > { %7524 = vmatmul.mubr.msk.bf16.vlgmr.msra.gmra.mrb[0].mxu1 %vm446_vm2, %v10402_v15  ;;  %v8946_v15 = vld [vmem:[#allocation7 + $0x444] ss:$8 sps:$4 sm:$0xff]  }
 0x4b5   : > { %7525 = vmatprep.mubr.msk.bf16.mxu1 %vm446_vm2, %v10383_v32  ;;  %5432 = vmatpush1.bf16.msra.mxu1 %v8932_v40  ;;  %v8956_v40 = vld [vmem:[#allocation7 + $0x480] ss:$8 sps:$4 sm:$0xff]  }
 0x4b6   : > { %5433 = vmatprep.subr.bf16.mxu1 %v8937_v49  ;;  %v8961_v49 = vld [vmem:[#allocation7 + $0x494] ss:$8 sps:$4 sm:$0xff]  }
 0x4b9   : > { %5434 = vmatpush1.bf16.msra.mxu1 %v8935_v41  ;;  %v8959_v41 = vld [vmem:[#allocation7 + $0x490] ss:$8 sps:$4 sm:$0xff]  }
 0x4ba   : > { %5435 = vmatprep.subr.bf16.mxu1 %v8940_v36  ;;  %v8964_v36 = vld [vmem:[#allocation7 + $0x4a4] ss:$8 sps:$4 sm:$0xff]  }
 0x4bc   : > { %7526 = vmatmul.mubr.msk.bf16.gmra.mrb[4].mxu1 %vm446_vm2, %v10406_v16 }
 0x4bd   : > { %7527 = vmatprep.mubr.msk.bf16.mxu1 %vm446_vm2, %v10455_v6  ;;  %5436 = vmatpush1.bf16.msra.mxu1 %v8938_v35  ;;  %v8962_v35 = vld [vmem:[#allocation7 + $0x4a0] ss:$8 sps:$4 sm:$0xff]  }
 0x4be   : > { %5437 = vmatprep.subr.bf16.mxu1 %v8943_v43  ;;  %v8967_v43 = vld [vmem:[#allocation7 + $0x4b4] ss:$8 sps:$4 sm:$0xff]  }
 0x4c1   : > { %5438 = vmatpush1.bf16.msra.mxu1 %v8941_v46  ;;  %v8965_v46 = vld [vmem:[#allocation7 + $0x4b0] ss:$8 sps:$4 sm:$0xff]  }
 0x4c2   : > { %5439 = vmatprep.subr.bf16.mxu1 %v8946_v15  ;;  %v8970_v15 = vld [vmem:[#allocation7 + $0x4c4] ss:$8 sps:$4 sm:$0xff]  }
 0x4c4   : > { %7528 = vmatmul.mubr.msk.bf16.gmra.mrb[8].mxu1 %vm446_vm2, %v10471_v51 }
 0x4c5   : > { %7529 = vmatprep.mubr.msk.bf16.mxu1 %vm446_vm2, %v10507_v10  ;;  %5440 = vmatpush1.bf16.msra.mxu1 %v8944_v28  ;;  %v8968_v28 = vld [vmem:[#allocation7 + $0x4c0] ss:$8 sps:$4 sm:$0xff]  }
 0x4c6   : > { %5441 = vmatprep.subr.bf16.mxu1 %v8949_v0  ;;  %v8973_v0 = vld [vmem:[#allocation7 + $0x4d4] ss:$8 sps:$4 sm:$0xff]  }
 0x4c9   : > { %5442 = vmatpush1.bf16.msra.mxu1 %v8947_v56  ;;  %v8971_v56 = vld [vmem:[#allocation7 + $0x4d0] ss:$8 sps:$4 sm:$0xff]  }
 0x4ca   : > { %5443 = vmatprep.subr.bf16.mxu1 %v8952_v3  ;;  %v8976_v3 = vld [vmem:[#allocation7 + $0x4e4] ss:$8 sps:$4 sm:$0xff]  }
 0x4cc   : > { %7530 = vmatmul.mubr.msk.bf16.gmra.mrb[12].mxu1 %vm446_vm2, %v10519_v61 }
 0x4cd   : > { %7531 = vmatprep.mubr.msk.bf16.mxu1 %vm446_vm2, %v10534_v2  ;;  %5444 = vmatpush1.bf16.msra.mxu1 %v8950_v48  ;;  %v8974_v48 = vld [vmem:[#allocation7 + $0x4e0] ss:$8 sps:$4 sm:$0xff]  }
 0x4ce   : > { %5445 = vmatprep.subr.bf16.mxu1 %v8955_v50  ;;  %v8979_v50 = vld [vmem:[#allocation7 + $0x4f4] ss:$8 sps:$4 sm:$0xff]  }
 0x4d1   : > { %5446 = vmatpush1.bf16.msra.mxu1 %v8953_v5  ;;  %v8977_v5 = vld [vmem:[#allocation7 + $0x4f0] ss:$8 sps:$4 sm:$0xff]  }
 0x4d2   : > { %5447 = vmatprep.subr.bf16.mxu1 %v8958_v33  ;;  %v8982_v33 = vld [vmem:[#allocation7 + $0x504] ss:$8 sps:$4 sm:$0xff]  }
 0x4d4   : > { %7532 = vmatmul.mubr.msk.bf16.gmra.mrb[16].mxu1 %vm446_vm2, %v10556_v47 }
 0x4d5   : > { %7533 = vmatprep.mubr.msk.bf16.mxu1 %vm446_vm2, %v10584_v57  ;;  %5448 = vmatpush1.bf16.msra.mxu1 %v8956_v40  ;;  %v8980_v40 = vld [vmem:[#allocation7 + $0x500] ss:$8 sps:$4 sm:$0xff]  }
 0x4d6   : > { %5449 = vmatprep.subr.bf16.mxu1 %v8961_v49  ;;  %v8985_v49 = vld [vmem:[#allocation7 + $0x514] ss:$8 sps:$4 sm:$0xff]  }
 0x4d9   : > { %5450 = vmatpush1.bf16.msra.mxu1 %v8959_v41  ;;  %v8983_v41 = vld [vmem:[#allocation7 + $0x510] ss:$8 sps:$4 sm:$0xff]  }
 0x4da   : > { %5451 = vmatprep.subr.bf16.mxu1 %v8964_v36  ;;  %v8988_v36 = vld [vmem:[#allocation7 + $0x524] ss:$8 sps:$4 sm:$0xff]  }
 0x4dc   : > { %7534 = vmatmul.mubr.msk.bf16.gmra.mrb[20].mxu1 %vm446_vm2, %v10629_v25 }
 0x4dd   : > { %7535 = vmatprep.mubr.msk.bf16.mxu1 %vm446_vm2, %v10644_v14  ;;  %5452 = vmatpush1.bf16.msra.mxu1 %v8962_v35  ;;  %v8986_v35 = vld [vmem:[#allocation7 + $0x520] ss:$8 sps:$4 sm:$0xff]  }
 0x4de   : > { %5453 = vmatprep.subr.bf16.mxu1 %v8967_v43  ;;  %v8991_v43 = vld [vmem:[#allocation7 + $0x534] ss:$8 sps:$4 sm:$0xff]  }
 0x4e1   : > { %5454 = vmatpush1.bf16.msra.mxu1 %v8965_v46  ;;  %v8994_v46 = vld [vmem:[#allocation7 + $0x544] ss:$8 sps:$4 sm:$0xff]  }
 0x4e2   : > { %5455 = vmatprep.subr.bf16.mxu1 %v8970_v15  ;;  %v8997_v15 = vld [vmem:[#allocation7 + $0x554] ss:$8 sps:$4 sm:$0xff]  }
 0x4e4   : > { %7536 = vmatmul.mubr.msk.bf16.gmra.mrb[24].mxu1 %vm446_vm2, %v10655_v17 }
 0x4e5   : > { %7537 = vmatprep.mubr.msk.bf16.mxu1 %vm446_vm2, %v10599_v42  ;;  %5456 = vmatpush1.bf16.msra.mxu1 %v8968_v28  ;;  %v8995_v28 = vld [vmem:[#allocation7 + $0x550] ss:$8 sps:$4 sm:$0xff]  }
 0x4e6   : > { %5457 = vmatprep.subr.bf16.mxu1 %v8973_v0  ;;  %v9000_v0 = vld [vmem:[#allocation7 + $0x564] ss:$8 sps:$4 sm:$0xff]  }
 0x4e9   : > { %5458 = vmatpush1.bf16.msra.mxu1 %v8971_v56  ;;  %v8998_v56 = vld [vmem:[#allocation7 + $0x560] ss:$8 sps:$4 sm:$0xff]  }
 0x4ea   : > { %5459 = vmatprep.subr.bf16.mxu1 %v8976_v3  ;;  %v9003_v3 = vld [vmem:[#allocation7 + $0x574] ss:$8 sps:$4 sm:$0xff]  }
 0x4ec   : > { %7538 = vmatmul.mubr.msk.bf16.gmra.mrb[28].mxu1 %vm446_vm2, %v10606_v58 }
 0x4ed   : > { %5460 = vmatpush1.bf16.msra.mxu1 %v8974_v48  ;;  %5463 = vmatprep.mubr.bf16.mxu1 %v10439_v22  ;;  %v8989_v22 = vld [vmem:[#allocation7 + $0x530] ss:$8 sps:$4 sm:$0xff]  }
 0x4ee   : > { %5461 = vmatprep.subr.bf16.mxu1 %v8979_v50  ;;  %v9001_v48 = vld [vmem:[#allocation7 + $0x570] ss:$8 sps:$4 sm:$0xff]   ;;  %v9006_v50 = vld [vmem:[#allocation7 + $0x584] ss:$8 sps:$4 sm:$0xff]  }
 0x4f1   : > { %5462 = vmatpush1.bf16.msra.mxu1 %v8977_v5  ;;  %v9004_v5 = vld [vmem:[#allocation7 + $0x580] ss:$8 sps:$4 sm:$0xff]  }
 0x4f2   : > { %5741 = vmatprep.subr.bf16.mxu1 %v8982_v33  ;;  %v9009_v33 = vld [vmem:[#allocation7 + $0x594] ss:$8 sps:$4 sm:$0xff]  }
 0x4f4   : > { %5464 = vmatmul.mubr.bf16.vlgmr.msra.gmra.mrb[0].mxu1 %v10490_v18  ;;  %v8992_v18 = vld [vmem:[#allocation7 + $0x540] ss:$8 sps:$4 sm:$0xff]  }
 0x4f5   : > { %5471 = vmatprep.mubr.bf16.mxu1 %v10495_v44  ;;  %5742 = vmatpush1.bf16.msra.mxu1 %v8980_v40  ;;  %v11194_v40 = vld [vmem:[#allocation12_spill] sm:$0xff] }
 0x4f6   : > { %5743 = vmatprep.subr.bf16.mxu1 %v8985_v49  ;;  %v9007_v49 = vld [vmem:[#allocation7 + $0x590] ss:$8 sps:$4 sm:$0xff]  }
 0x4f9   : > { %5744 = vmatpush1.bf16.msra.mxu1 %v8983_v41  ;;  %v9012_v41 = vld [vmem:[#allocation7 + $0x5a4] ss:$8 sps:$4 sm:$0xff]  }
 0x4fa   : > { %5745 = vmatprep.subr.bf16.mxu1 %v8988_v36  ;;  %v9010_v36 = vld [vmem:[#allocation7 + $0x5a0] ss:$8 sps:$4 sm:$0xff]  }
 0x4fc   : > { %5472 = vmatmul.mubr.bf16.gmra.mrb[4].mxu1 %v10527_v37 }
 0x4fd   : > { %5479 = vmatprep.mubr.bf16.mxu1 %v10543_v29  ;;  %5746 = vmatpush1.bf16.msra.mxu1 %v8986_v35  ;;  %v9015_v35 = vld [vmem:[#allocation7 + $0x5b4] ss:$8 sps:$4 sm:$0xff]  }
 0x4fe   : > { %5747 = vmatprep.subr.bf16.mxu1 %v8991_v43  ;;  %v9013_v43 = vld [vmem:[#allocation7 + $0x5b0] ss:$8 sps:$4 sm:$0xff]  }
 0x501   : > { %5748 = vmatpush1.bf16.msra.mxu1 %v8989_v22  ;;  %v9018_v22 = vld [vmem:[#allocation7 + $0x5c4] ss:$8 sps:$4 sm:$0xff]  }
 0x502   : > { %5749 = vmatprep.subr.bf16.mxu1 %v8994_v46  ;;  %v9016_v46 = vld [vmem:[#allocation7 + $0x5c0] ss:$8 sps:$4 sm:$0xff]  }
 0x504   : > { %5480 = vmatmul.mubr.bf16.gmra.mrb[8].mxu1 %v10576_v54 }
 0x505   : > { %5487 = vmatprep.mubr.bf16.mxu1 %v10592_v38  ;;  %5750 = vmatpush1.bf16.msra.mxu1 %v8992_v18  ;;  %v9021_v18 = vld [vmem:[#allocation7 + $0x5d4] ss:$8 sps:$4 sm:$0xff]  }
 0x506   : > { %5751 = vmatprep.subr.bf16.mxu1 %v8997_v15  ;;  %v9019_v15 = vld [vmem:[#allocation7 + $0x5d0] ss:$8 sps:$4 sm:$0xff]  }
 0x509   : > { %5752 = vmatpush1.bf16.msra.mxu1 %v8995_v28  ;;  %v9024_v28 = vld [vmem:[#allocation7 + $0x5e4] ss:$8 sps:$4 sm:$0xff]  }
 0x50a   : > { %5753 = vmatprep.subr.bf16.mxu1 %v9000_v0  ;;  %v9022_v0 = vld [vmem:[#allocation7 + $0x5e0] ss:$8 sps:$4 sm:$0xff]  }
 0x50c   : > { %5488 = vmatmul.mubr.bf16.gmra.mrb[12].mxu1 %v10609_v24 }
 0x50d   : > { %5495 = vmatprep.mubr.bf16.mxu1 %v10617_v62  ;;  %5754 = vmatpush1.bf16.msra.mxu1 %v8998_v56  ;;  %v9027_v56 = vld [vmem:[#allocation7 + $0x5f4] ss:$8 sps:$4 sm:$0xff]  }
 0x50e   : > { %5755 = vmatprep.subr.bf16.mxu1 %v9003_v3  ;;  %v9025_v3 = vld [vmem:[#allocation7 + $0x5f0] ss:$8 sps:$4 sm:$0xff]  }
 0x511   : > { %5756 = vmatpush1.bf16.msra.mxu1 %v9001_v48  ;;  %v9030_v48 = vld [vmem:[#allocation7 + $0x604] ss:$8 sps:$4 sm:$0xff]  }
 0x512   : > { %5757 = vmatprep.subr.bf16.mxu1 %v9006_v50  ;;  %v9028_v50 = vld [vmem:[#allocation7 + $0x600] ss:$8 sps:$4 sm:$0xff]  }
 0x514   : > { %5496 = vmatmul.mubr.bf16.gmra.mrb[16].mxu1 %v10679_v13 }
 0x515   : > { %5503 = vmatprep.mubr.bf16.mxu1 %v11194_v40  ;;  %5758 = vmatpush1.bf16.msra.mxu1 %v9004_v5  ;;  %v9033_v5 = vld [vmem:[#allocation7 + $0x614] ss:$8 sps:$4 sm:$0xff]  }
 0x516   : > { %5759 = vmatprep.subr.bf16.mxu1 %v9009_v33  ;;  %v9031_v33 = vld [vmem:[#allocation7 + $0x610] ss:$8 sps:$4 sm:$0xff]  }
 0x519   : > { %5760 = vmatpush1.bf16.msra.mxu1 %v9007_v49  ;;  %v9036_v49 = vld [vmem:[#allocation7 + $0x624] ss:$8 sps:$4 sm:$0xff]  }
 0x51a   : > { %5761 = vmatprep.subr.bf16.mxu1 %v9012_v41  ;;  %v9034_v41 = vld [vmem:[#allocation7 + $0x620] ss:$8 sps:$4 sm:$0xff]  }
 0x51c   : > { %5504 = vmatmul.mubr.bf16.gmra.mrb[20].mxu1 %v10753_v12 }
 0x51d   : > { %5511 = vmatprep.mubr.bf16.mxu1 %v10758_v45  ;;  %5762 = vmatpush1.bf16.msra.mxu1 %v9010_v36  ;;  %v9039_v36 = vld [vmem:[#allocation7 + $0x634] ss:$8 sps:$4 sm:$0xff]  }
 0x51e   : > { %5763 = vmatprep.subr.bf16.mxu1 %v9015_v35  ;;  %v9042_v35 = vld [vmem:[#allocation7 + $0x644] ss:$8 sps:$4 sm:$0xff]  }
 0x521   : > { %5764 = vmatpush1.bf16.msra.mxu1 %v9013_v43  ;;  %v9045_v43 = vld [vmem:[#allocation7 + $0x654] ss:$8 sps:$4 sm:$0xff]  }
 0x522   : > { %5765 = vmatprep.subr.bf16.mxu1 %v9018_v22  ;;  %v9043_v22 = vld [vmem:[#allocation7 + $0x650] ss:$8 sps:$4 sm:$0xff]  }
 0x524   : > { %5512 = vmatmul.mubr.bf16.gmra.mrb[24].mxu1 %v10773_v55 }
 0x525   : > { %5519 = vmatprep.mubr.bf16.mxu1 %v10761_v39  ;;  %5766 = vmatpush1.bf16.msra.mxu1 %v9016_v46  ;;  %v9048_v46 = vld [vmem:[#allocation7 + $0x664] ss:$8 sps:$4 sm:$0xff]  }
 0x526   : > { %5767 = vmatprep.subr.bf16.mxu1 %v9021_v18  ;;  %v9046_v18 = vld [vmem:[#allocation7 + $0x660] ss:$8 sps:$4 sm:$0xff]  }
 0x529   : > { %5768 = vmatpush1.bf16.msra.mxu1 %v9019_v15  ;;  %v9051_v15 = vld [vmem:[#allocation7 + $0x674] ss:$8 sps:$4 sm:$0xff]  }
 0x52a   : > { %5769 = vmatprep.subr.bf16.mxu1 %v9024_v28  ;;  %v9049_v28 = vld [vmem:[#allocation7 + $0x670] ss:$8 sps:$4 sm:$0xff]  }
 0x52c   : > { %5520 = vmatmul.mubr.bf16.gmra.mrb[28].mxu1 %v10764_v23 }
 0x52d   : > { %5770 = vmatpush1.bf16.msra.mxu1 %v9022_v0  ;;  %5773 = vmatprep.mubr.bf16.mxu1 %v10665_v19  ;;  %v9037_v19 = vld [vmem:[#allocation7 + $0x630] ss:$8 sps:$4 sm:$0xff]   ;;  %v9054_v0 = vld [vmem:[#allocation7 + $0x684] ss:$8 sps:$4 sm:$0xff]  }
 0x52e   : > { %5771 = vmatprep.subr.bf16.mxu1 %v9027_v56  ;;  %v9052_v56 = vld [vmem:[#allocation7 + $0x680] ss:$8 sps:$4 sm:$0xff]  }
 0x531   : > { %5772 = vmatpush1.bf16.msra.mxu1 %v9025_v3  ;;  %v9057_v3 = vld [vmem:[#allocation7 + $0x694] ss:$8 sps:$4 sm:$0xff]  }
 0x532   : > { %6047 = vmatprep.subr.bf16.mxu1 %v9030_v48  ;;  %v9055_v48 = vld [vmem:[#allocation7 + $0x690] ss:$8 sps:$4 sm:$0xff]  }
 0x534   : > { %5774 = vmatmul.mubr.bf16.vlgmr.msra.gmra.mrb[0].mxu1 %v10671_v21  ;;  %v9040_v21 = vld [vmem:[#allocation7 + $0x640] ss:$8 sps:$4 sm:$0xff]  }
 0x535   : > { %5781 = vmatprep.mubr.bf16.mxu1 %v10682_v53  ;;  %6048 = vmatpush1.bf16.msra.mxu1 %v9028_v50  ;;  %v9060_v50 = vld [vmem:[#allocation7 + $0x6a4] ss:$8 sps:$4 sm:$0xff]  }
 0x536   : > { %6049 = vmatprep.subr.bf16.mxu1 %v9033_v5  ;;  %v9058_v5 = vld [vmem:[#allocation7 + $0x6a0] ss:$8 sps:$4 sm:$0xff]  }
 0x539   : > { %6050 = vmatpush1.bf16.msra.mxu1 %v9031_v33  ;;  %v9063_v33 = vld [vmem:[#allocation7 + $0x6b4] ss:$8 sps:$4 sm:$0xff]  }
 0x53a   : > { %6051 = vmatprep.subr.bf16.mxu1 %v9036_v49  ;;  %v9061_v49 = vld [vmem:[#allocation7 + $0x6b0] ss:$8 sps:$4 sm:$0xff]  }
 0x53c   : > { %5782 = vmatmul.mubr.bf16.gmra.mrb[4].mxu1 %v10686_v63 }
 0x53d   : > { %5789 = vmatprep.mubr.bf16.mxu1 %v10694_v26  ;;  %6052 = vmatpush1.bf16.msra.mxu1 %v9034_v41  ;;  %v9066_v41 = vld [vmem:[#allocation7 + $0x6c4] ss:$8 sps:$4 sm:$0xff]  }
 0x53e   : > { %6053 = vmatprep.subr.bf16.mxu1 %v9039_v36  ;;  %v9064_v36 = vld [vmem:[#allocation7 + $0x6c0] ss:$8 sps:$4 sm:$0xff]  }
 0x541   : > { %6054 = vmatpush1.bf16.msra.mxu1 %v9037_v19  ;;  %v9069_v19 = vld [vmem:[#allocation7 + $0x6d4] ss:$8 sps:$4 sm:$0xff]  }
 0x542   : > { %6055 = vmatprep.subr.bf16.mxu1 %v9042_v35  ;;  %v9067_v35 = vld [vmem:[#allocation7 + $0x6d0] ss:$8 sps:$4 sm:$0xff]  }
 0x544   : > { %5790 = vmatmul.mubr.bf16.gmra.mrb[8].mxu1 %v10702_v30 }
 0x545   : > { %5797 = vmatprep.mubr.bf16.mxu1 %v10707_v1  ;;  %6056 = vmatpush1.bf16.msra.mxu1 %v9040_v21  ;;  %v9072_v21 = vld [vmem:[#allocation7 + $0x6e4] ss:$8 sps:$4 sm:$0xff]  }
 0x546   : > { %6057 = vmatprep.subr.bf16.mxu1 %v9045_v43  ;;  %v9070_v43 = vld [vmem:[#allocation7 + $0x6e0] ss:$8 sps:$4 sm:$0xff]  }
 0x549   : > { %6058 = vmatpush1.bf16.msra.mxu1 %v9043_v22  ;;  %v9075_v22 = vld [vmem:[#allocation7 + $0x6f4] ss:$8 sps:$4 sm:$0xff]  }
 0x54a   : > { %6059 = vmatprep.subr.bf16.mxu1 %v9048_v46  ;;  %v9073_v46 = vld [vmem:[#allocation7 + $0x6f0] ss:$8 sps:$4 sm:$0xff]  }
 0x54c   : > { %5798 = vmatmul.mubr.bf16.gmra.mrb[12].mxu1 %v10710_v60 }
 0x54d   : > { %5805 = vmatprep.mubr.bf16.mxu1 %v10718_v31  ;;  %6060 = vmatpush1.bf16.msra.mxu1 %v9046_v18  ;;  %v9078_v18 = vld [vmem:[#allocation7 + $0x704] ss:$8 sps:$4 sm:$0xff]  }
 0x54e   : > { %6061 = vmatprep.subr.bf16.mxu1 %v9051_v15  ;;  %v9076_v15 = vld [vmem:[#allocation7 + $0x700] ss:$8 sps:$4 sm:$0xff]  }
 0x551   : > { %6062 = vmatpush1.bf16.msra.mxu1 %v9049_v28  ;;  %v9081_v28 = vld [vmem:[#allocation7 + $0x714] ss:$8 sps:$4 sm:$0xff]  }
 0x552   : > { %6063 = vmatprep.subr.bf16.mxu1 %v9054_v0  ;;  %v9079_v0 = vld [vmem:[#allocation7 + $0x710] ss:$8 sps:$4 sm:$0xff]  }
 0x554   : > { %5806 = vmatmul.mubr.bf16.gmra.mrb[16].mxu1 %v10721_v20 }
 0x555   : > { %5813 = vmatprep.mubr.bf16.mxu1 %v10727_v7  ;;  %6064 = vmatpush1.bf16.msra.mxu1 %v9052_v56  ;;  %v9084_v56 = vld [vmem:[#allocation7 + $0x724] ss:$8 sps:$4 sm:$0xff]  }
 0x556   : > { %6065 = vmatprep.subr.bf16.mxu1 %v9057_v3  ;;  %v9082_v3 = vld [vmem:[#allocation7 + $0x720] ss:$8 sps:$4 sm:$0xff]  }
 0x559   : > { %6066 = vmatpush1.bf16.msra.mxu1 %v9055_v48  ;;  %v9085_v48 = vld [vmem:[#allocation7 + $0x730] ss:$8 sps:$4 sm:$0xff]  }
 0x55a   : > { %6067 = vmatprep.subr.bf16.mxu1 %v9060_v50  ;;  %v9093_v50 = vld [vmem:[#allocation7 + $0x754] ss:$8 sps:$4 sm:$0xff]  }
 0x55c   : > { %5814 = vmatmul.mubr.bf16.gmra.mrb[20].mxu1 %v10731_v4 }
 0x55d   : > { %5821 = vmatprep.mubr.bf16.mxu1 %v10737_v9  ;;  %6068 = vmatpush1.bf16.msra.mxu1 %v9058_v5  ;;  %v9091_v5 = vld [vmem:[#allocation7 + $0x750] ss:$8 sps:$4 sm:$0xff]  }
 0x55e   : > { %6069 = vmatprep.subr.bf16.mxu1 %v9063_v33  ;;  %v9099_v33 = vld [vmem:[#allocation7 + $0x774] ss:$8 sps:$4 sm:$0xff]  }
 0x561   : > { %6070 = vmatpush1.bf16.msra.mxu1 %v9061_v49  ;;  %v9097_v49 = vld [vmem:[#allocation7 + $0x770] ss:$8 sps:$4 sm:$0xff]  }
 0x562   : > { %6071 = vmatprep.subr.bf16.mxu1 %v9066_v41  ;;  %v9105_v41 = vld [vmem:[#allocation7 + $0x794] ss:$8 sps:$4 sm:$0xff]  }
 0x564   : > { %5822 = vmatmul.mubr.bf16.gmra.mrb[24].mxu1 %v10741_v11 }
 0x565   : > { %5829 = vmatprep.mubr.bf16.mxu1 %v10745_v8  ;;  %6072 = vmatpush1.bf16.msra.mxu1 %v9064_v36  ;;  %v9103_v36 = vld [vmem:[#allocation7 + $0x790] ss:$8 sps:$4 sm:$0xff]  }
 0x566   : > { %6073 = vmatprep.subr.bf16.mxu1 %v9069_v19  ;;  %v9111_v19 = vld [vmem:[#allocation7 + $0x7b4] ss:$8 sps:$4 sm:$0xff]  }
 0x569   : > { %6074 = vmatpush1.bf16.msra.mxu1 %v9067_v35  ;;  %v9109_v35 = vld [vmem:[#allocation7 + $0x7b0] ss:$8 sps:$4 sm:$0xff]  }
 0x56a   : > { %6075 = vmatprep.subr.bf16.mxu1 %v9072_v21  ;;  %v9112_v21 = vld [vmem:[#allocation7 + $0x7c0] ss:$8 sps:$4 sm:$0xff]  }
 0x56c   : > { %5830 = vmatmul.mubr.bf16.gmra.mrb[28].mxu1 %v10749_v52 }
 0x56d   : > { %6076 = vmatpush1.bf16.msra.mxu1 %v9070_v43  ;;  %7635 = vmatprep.mubr.msk.bf16.mxu1 %vm446_vm2, %v10383_v32  ;;  %v9087_v32 = vld [vmem:[#allocation7 + $0x734] ss:$8 sps:$4 sm:$0xff]  }
 0x56e   : > { %6077 = vmatprep.subr.bf16.mxu1 %v9075_v22  ;;  %v9117_v43 = vld [vmem:[#allocation7 + $0x7d4] ss:$8 sps:$4 sm:$0xff]   ;;  %v9115_v22 = vld [vmem:[#allocation7 + $0x7d0] ss:$8 sps:$4 sm:$0xff]  }
 0x571   : > { %6078 = vmatpush1.bf16.msra.mxu1 %v9073_v46  ;;  %v9120_v46 = vld [vmem:[#allocation7 + $0x7e4] ss:$8 sps:$4 sm:$0xff]  }
 0x572   : > { %6357 = vmatprep.subr.bf16.mxu1 %v9078_v18  ;;  %v9123_v18 = vld [vmem:[#allocation7 + $0x7f4] ss:$8 sps:$4 sm:$0xff]  }
 0x574   : > { %7636 = vmatmul.mubr.msk.bf16.vlgmr.msra.gmra.mrb[0].mxu1 %vm446_vm2, %v10406_v16  ;;  %v9090_v16 = vld [vmem:[#allocation7 + $0x744] ss:$8 sps:$4 sm:$0xff]  }
 0x575   : > { %7637 = vmatprep.mubr.msk.bf16.mxu1 %vm446_vm2, %v10455_v6  ;;  %6358 = vmatpush1.bf16.msra.mxu1 %v9076_v15  ;;  %v9088_v6 = vld [vmem:[#allocation7 + $0x740] ss:$8 sps:$4 sm:$0xff]   ;;  %v9121_v15 = vld [vmem:[#allocation7 + $0x7f0] ss:$8 sps:$4 sm:$0xff]  }
 0x576   : > { %6359 = vmatprep.subr.bf16.mxu1 %v9081_v28  ;;  %v9124_v28 = vld [vmem:[#allocation7 + $0x800] ss:$8 sps:$4 sm:$0xff]  }
 0x579   : > { %6360 = vmatpush1.bf16.msra.mxu1 %v9079_v0  ;;  %v9127_v0 = vld [vmem:[#allocation7 + $0x810] ss:$8 sps:$4 sm:$0xff]  }
 0x57a   : > { %6361 = vmatprep.subr.bf16.mxu1 %v9084_v56  ;;  %v9132_v56 = vld [vmem:[#allocation7 + $0x824] ss:$8 sps:$4 sm:$0xff]  }
 0x57c   : > { %7638 = vmatmul.mubr.msk.bf16.gmra.mrb[4].mxu1 %vm446_vm2, %v10471_v51  ;;  %v9096_v51 = vld [vmem:[#allocation7 + $0x764] ss:$8 sps:$4 sm:$0xff]  }
 0x57d   : > { %7639 = vmatprep.mubr.msk.bf16.mxu1 %vm446_vm2, %v10507_v10  ;;  %6362 = vmatpush1.bf16.msra.mxu1 %v9082_v3  ;;  %v9094_v10 = vld [vmem:[#allocation7 + $0x760] ss:$8 sps:$4 sm:$0xff]   ;;  %v9135_v3 = vld [vmem:[#allocation7 + $0x834] ss:$8 sps:$4 sm:$0xff]  }
 0x57e   : > { %6363 = vmatprep.subr.bf16.mxu1 %v9087_v32  ;;  %v9138_v32 = vld [vmem:[#allocation7 + $0x844] ss:$8 sps:$4 sm:$0xff]  }
 0x581   : > { %6364 = vmatpush1.bf16.msra.mxu1 %v9085_v48  ;;  %v9139_v48 = vld [vmem:[#allocation7 + $0x850] ss:$8 sps:$4 sm:$0xff]  }
 0x582   : > { %6365 = vmatprep.subr.bf16.mxu1 %v9090_v16  ;;  %v9144_v16 = vld [vmem:[#allocation7 + $0x864] ss:$8 sps:$4 sm:$0xff]  }
 0x584   : > { %7640 = vmatmul.mubr.msk.bf16.gmra.mrb[8].mxu1 %vm446_vm2, %v10519_v61  ;;  %v9102_v61 = vld [vmem:[#allocation7 + $0x784] ss:$8 sps:$4 sm:$0xff]  }
 0x585   : > { %7641 = vmatprep.mubr.msk.bf16.mxu1 %vm446_vm2, %v10534_v2  ;;  %6366 = vmatpush1.bf16.msra.mxu1 %v9088_v6  ;;  %v9100_v2 = vld [vmem:[#allocation7 + $0x780] ss:$8 sps:$4 sm:$0xff]   ;;  %v9145_v6 = vld [vmem:[#allocation7 + $0x870] ss:$8 sps:$4 sm:$0xff]  }
 0x586   : > { %6367 = vmatprep.subr.bf16.mxu1 %v9093_v50  ;;  %v9150_v50 = vld [vmem:[#allocation7 + $0x884] ss:$8 sps:$4 sm:$0xff]  }
 0x589   : > { %6368 = vmatpush1.bf16.msra.mxu1 %v9091_v5  ;;  %v9151_v5 = vld [vmem:[#allocation7 + $0x890] ss:$8 sps:$4 sm:$0xff]  }
 0x58a   : > { %6369 = vmatprep.subr.bf16.mxu1 %v9096_v51  ;;  %v9156_v51 = vld [vmem:[#allocation7 + $0x8a4] ss:$8 sps:$4 sm:$0xff]  }
 0x58c   : > { %7642 = vmatmul.mubr.msk.bf16.gmra.mrb[12].mxu1 %vm446_vm2, %v10556_v47  ;;  %v9108_v47 = vld [vmem:[#allocation7 + $0x7a4] ss:$8 sps:$4 sm:$0xff]  }
 0x58d   : > { %7643 = vmatprep.mubr.msk.bf16.mxu1 %vm446_vm2, %v10584_v57  ;;  %6370 = vmatpush1.bf16.msra.mxu1 %v9094_v10  ;;  %v9106_v57 = vld [vmem:[#allocation7 + $0x7a0] ss:$8 sps:$4 sm:$0xff]   ;;  %v9157_v10 = vld [vmem:[#allocation7 + $0x8b0] ss:$8 sps:$4 sm:$0xff]  }
 0x58e   : > { %6371 = vmatprep.subr.bf16.mxu1 %v9099_v33  ;;  %v9162_v33 = vld [vmem:[#allocation7 + $0x8c4] ss:$8 sps:$4 sm:$0xff]  }
 0x591   : > { %6372 = vmatpush1.bf16.msra.mxu1 %v9097_v49  ;;  %v11195_v49 = vld [vmem:[#allocation13_spill] sm:$0xff] }
 0x592   : > { %6373 = vmatprep.subr.bf16.mxu1 %v9102_v61  ;;  %v6194_v61 = vsel %vm580_vm6, %v10699_v59, %v11195_v49 }
 0x594   : > { %7644 = vmatmul.mubr.msk.bf16.gmra.mrb[16].mxu1 %vm446_vm2, %v10629_v25  ;;  %v9114_v25 = vld [vmem:[#allocation7 + $0x7c4] ss:$8 sps:$4 sm:$0xff]  }
 0x595   : > { %7645 = vmatprep.mubr.msk.bf16.mxu1 %vm446_vm2, %v10644_v14  ;;  %6374 = vmatpush1.bf16.msra.mxu1 %v9100_v2  ;;  %v9163_v2 = vld [vmem:[#allocation7 + $0x8d0] ss:$8 sps:$4 sm:$0xff]  }
 0x596   : > { %6375 = vmatprep.subr.bf16.mxu1 %v9105_v41  ;;  %v9171_v41 = vld [vmem:[#allocation7 + $0x8f4] ss:$8 sps:$4 sm:$0xff]  }
 0x599   : > { %6376 = vmatpush1.bf16.msra.mxu1 %v9103_v36  ;;  %v6193_v36 = vsel %vm580_vm6, %v10768_v27, %v11195_v49 }
 0x59a   : > { %6377 = vmatprep.subr.bf16.mxu1 %v9108_v47 }
 0x59c   : > { %7646 = vmatmul.mubr.msk.bf16.gmra.mrb[20].mxu1 %vm446_vm2, %v10655_v17 }
 0x59d   : > { %7647 = vmatprep.mubr.msk.bf16.mxu1 %vm446_vm2, %v10599_v42  ;;  %6378 = vmatpush1.bf16.msra.mxu1 %v9106_v57  ;;  %v9118_v42 = vld [vmem:[#allocation7 + $0x7e0] ss:$8 sps:$4 sm:$0xff]  }
 0x59e   : > { %6379 = vmatprep.subr.bf16.mxu1 %v9111_v19 }
 0x5a1   : > { %6380 = vmatpush1.bf16.msra.mxu1 %v9109_v35 }
 0x5a2   : > { %6381 = vmatprep.subr.bf16.mxu1 %v9114_v25 }
 0x5a4   : > { %7648 = vmatmul.mubr.msk.bf16.gmra.mrb[24].mxu1 %vm446_vm2, %v10606_v58  ;;  %v9126_v58 = vld [vmem:[#allocation7 + $0x804] ss:$8 sps:$4 sm:$0xff]  }
 0x5a5   : > { %7649 = vmatprep.mubr.msk.bf16.mxu1 %vm446_vm2, %v10644_v14  ;;  %6382 = vmatpush1.bf16.msra.mxu1 %v9112_v21  ;;  %v9129_v14 = vld [vmem:[#allocation7 + $0x814] ss:$8 sps:$4 sm:$0xff]  }
 0x5a6   : > { %6383 = vmatprep.subr.bf16.mxu1 %v9117_v43 }
 0x5a9   : > { %6384 = vmatpush1.bf16.msra.mxu1 %v9115_v22 }
 0x5aa   : > { %6385 = vmatprep.subr.bf16.mxu1 %v9120_v46 }
 0x5ac   : > { %7650 = vmatmul.mubr.msk.bf16.gmra.mrb[28].mxu1 %vm446_vm2, %v10655_v17  ;;  %v9130_v17 = vld [vmem:[#allocation7 + $0x820] ss:$8 sps:$4 sm:$0xff]  }
 0x5ad   : > { %6386 = vmatpush1.bf16.msra.mxu1 %v9118_v42  ;;  %6389 = vmatprep.mubr.bf16.mxu1 %v10495_v44  ;;  %v9133_v44 = vld [vmem:[#allocation7 + $0x830] ss:$8 sps:$4 sm:$0xff]  }
 0x5ae   : > { %6387 = vmatprep.subr.bf16.mxu1 %v9123_v18 }
 0x5b1   : > { %6388 = vmatpush1.bf16.msra.mxu1 %v9121_v15 }
 0x5b2   : > { %6667 = vmatprep.subr.bf16.mxu1 %v9126_v58 }
 0x5b4   : > { %6390 = vmatmul.mubr.bf16.vlgmr.msra.gmra.mrb[0].mxu1 %v10527_v37  ;;  %v9136_v37 = vld [vmem:[#allocation7 + $0x840] ss:$8 sps:$4 sm:$0xff]  }
 0x5b5   : > { %6397 = vmatprep.mubr.bf16.mxu1 %v10543_v29  ;;  %6668 = vmatpush1.bf16.msra.mxu1 %v9124_v28  ;;  %v9141_v29 = vld [vmem:[#allocation7 + $0x854] ss:$8 sps:$4 sm:$0xff]  }
 0x5b6   : > { %6669 = vmatprep.subr.bf16.mxu1 %v9129_v14 }
 0x5b9   : > { %6670 = vmatpush1.bf16.msra.mxu1 %v9127_v0 }
 0x5ba   : > { %6671 = vmatprep.subr.bf16.mxu1 %v9132_v56 }
 0x5bc   : > { %6398 = vmatmul.mubr.bf16.gmra.mrb[4].mxu1 %v10576_v54  ;;  %v9142_v54 = vld [vmem:[#allocation7 + $0x860] ss:$8 sps:$4 sm:$0xff]  }
 0x5bd   : > { %6405 = vmatprep.mubr.bf16.mxu1 %v10592_v38  ;;  %6672 = vmatpush1.bf16.msra.mxu1 %v9130_v17  ;;  %v9147_v38 = vld [vmem:[#allocation7 + $0x874] ss:$8 sps:$4 sm:$0xff]  }
 0x5be   : > { %6673 = vmatprep.subr.bf16.mxu1 %v9135_v3 }
 0x5c1   : > { %6674 = vmatpush1.bf16.msra.mxu1 %v9133_v44 }
 0x5c2   : > { %6675 = vmatprep.subr.bf16.mxu1 %v9138_v32 }
 0x5c4   : > { %6406 = vmatmul.mubr.bf16.gmra.mrb[8].mxu1 %v10609_v24  ;;  %v9148_v24 = vld [vmem:[#allocation7 + $0x880] ss:$8 sps:$4 sm:$0xff]  }
 0x5c5   : > { %6413 = vmatprep.mubr.bf16.mxu1 %v10617_v62  ;;  %6676 = vmatpush1.bf16.msra.mxu1 %v9136_v37  ;;  %v9153_v62 = vld [vmem:[#allocation7 + $0x894] ss:$8 sps:$4 sm:$0xff]  }
 0x5c6   : > { %6677 = vmatprep.subr.bf16.mxu1 %v9141_v29 }
 0x5c9   : > { %6678 = vmatpush1.bf16.msra.mxu1 %v9139_v48 }
 0x5ca   : > { %6679 = vmatprep.subr.bf16.mxu1 %v9144_v16 }
 0x5cc   : > { %6414 = vmatmul.mubr.bf16.gmra.mrb[12].mxu1 %v10679_v13  ;;  %v9154_v13 = vld [vmem:[#allocation7 + $0x8a0] ss:$8 sps:$4 sm:$0xff]  }
 0x5cd   : > { %6421 = vmatprep.mubr.bf16.mxu1 %v11194_v40  ;;  %6680 = vmatpush1.bf16.msra.mxu1 %v9142_v54  ;;  %v9159_v40 = vld [vmem:[#allocation7 + $0x8b4] ss:$8 sps:$4 sm:$0xff]  }
 0x5ce   : > { %6681 = vmatprep.subr.bf16.mxu1 %v9147_v38 }
 0x5d1   : > { %6682 = vmatpush1.bf16.msra.mxu1 %v9145_v6 }
 0x5d2   : > { %6683 = vmatprep.subr.bf16.mxu1 %v9150_v50 }
 0x5d4   : > { %6422 = vmatmul.mubr.bf16.gmra.mrb[16].mxu1 %v10753_v12  ;;  %v9160_v12 = vld [vmem:[#allocation7 + $0x8c0] ss:$8 sps:$4 sm:$0xff]  }
 0x5d5   : > { %6429 = vmatprep.mubr.bf16.mxu1 %v10758_v45  ;;  %6684 = vmatpush1.bf16.msra.mxu1 %v9148_v24  ;;  %v9165_v45 = vld [vmem:[#allocation7 + $0x8d4] ss:$8 sps:$4 sm:$0xff]  }
 0x5d6   : > { %6685 = vmatprep.subr.bf16.mxu1 %v9153_v62 }
 0x5d9   : > { %6686 = vmatpush1.bf16.msra.mxu1 %v9151_v5 }
 0x5da   : > { %6687 = vmatprep.subr.bf16.mxu1 %v9156_v51 }
 0x5dc   : > { %6430 = vmatmul.mubr.bf16.gmra.mrb[20].mxu1 %v10773_v55  ;;  %v9168_v55 = vld [vmem:[#allocation7 + $0x8e4] ss:$8 sps:$4 sm:$0xff]  }
 0x5dd   : > { %6437 = vmatprep.mubr.bf16.mxu1 %v10761_v39  ;;  %6688 = vmatpush1.bf16.msra.mxu1 %v9154_v13  ;;  %v9166_v39 = vld [vmem:[#allocation7 + $0x8e0] ss:$8 sps:$4 sm:$0xff]  }
 0x5de   : > { %6689 = vmatprep.subr.bf16.mxu1 %v9159_v40 }
 0x5e1   : > { %6690 = vmatpush1.bf16.msra.mxu1 %v9157_v10 }
 0x5e2   : > { %6691 = vmatprep.subr.bf16.mxu1 %v9162_v33 }
 0x5e4   : > { %6438 = vmatmul.mubr.bf16.gmra.mrb[24].mxu1 %v10764_v23  ;;  %v9169_v23 = vld [vmem:[#allocation7 + $0x8f0] ss:$8 sps:$4 sm:$0xff]  }
 0x5e5   : > { %6445 = vmatprep.mubr.bf16.mxu1 %v6194_v61  ;;  %6692 = vmatpush1.bf16.msra.mxu1 %v9160_v12 }
 0x5e6   : > { %6693 = vmatprep.subr.bf16.mxu1 %v9165_v45 }
 0x5e9   : > { %6694 = vmatpush1.bf16.msra.mxu1 %v9163_v2 }
 0x5ea   : > { %6695 = vmatprep.subr.bf16.mxu1 %v9168_v55 }
 0x5ec   : > { %6446 = vmatmul.mubr.bf16.gmra.mrb[28].mxu1 %v6193_v36 }
 0x5ed   : > { %6696 = vmatpush1.bf16.msra.mxu1 %v9166_v39  ;;  %6699 = vmatprep.mubr.bf16.mxu1 %v10682_v53  ;;  %v6504_v53 = vsel %vm1266_vm7, %v10712_v34, %v11195_v49 }
 0x5ee   : > { %6697 = vmatprep.subr.bf16.mxu1 %v9171_v41 }
 0x5f1   : > { %6698 = vmatpush1.bf16.msra.mxu1 %v9169_v23 }
 0x5f4   : > { %6700 = vmatmul.mubr.bf16.vlgmr.msra.gmra.mrb[0].mxu1 %v10686_v63  ;;  %v11196_v63 = vld [vmem:[#allocation14_spill] sm:$0xff] }
 0x5f5   : > { %6707 = vmatprep.mubr.bf16.mxu1 %v10694_v26  ;;  %v6503_v26 = vsel %vm1266_vm7, %v11196_v63, %v11195_v49 }
 0x5fc   : > { %6708 = vmatmul.mubr.bf16.gmra.mrb[4].mxu1 %v10702_v30 }
 0x5fd   : > { %6715 = vmatprep.mubr.bf16.mxu1 %v10707_v1 }
 0x604   : > { %6716 = vmatmul.mubr.bf16.gmra.mrb[8].mxu1 %v10710_v60 }
 0x605   : > { %6723 = vmatprep.mubr.bf16.mxu1 %v10718_v31 }
 0x60c   : > { %6724 = vmatmul.mubr.bf16.gmra.mrb[12].mxu1 %v10721_v20 }
 0x60d   : > { %6731 = vmatprep.mubr.bf16.mxu1 %v10727_v7 }
 0x614   : > { %6732 = vmatmul.mubr.bf16.gmra.mrb[16].mxu1 %v10731_v4 }
 0x615   : > { %6739 = vmatprep.mubr.bf16.mxu1 %v10737_v9 }
 0x61c   : > { %6740 = vmatmul.mubr.bf16.gmra.mrb[20].mxu1 %v10741_v11 }
 0x61d   : > { %6747 = vmatprep.mubr.bf16.mxu1 %v10745_v8 }
 0x624   : > { %6748 = vmatmul.mubr.bf16.gmra.mrb[24].mxu1 %v10749_v52 }
 0x625   : > { %6755 = vmatprep.mubr.bf16.mxu1 %v6504_v53 }
 0x62c   : > { %6756 = vmatmul.mubr.bf16.gmra.mrb[28].mxu1 %v6503_v26 }
 0x6c7   : > { %v10960_v59 = vpop.f32.mrb[0].mxu1 }
 0x6c8   : > { %v10962_v30 = vpop.f32.mrb[1].mxu1  ;;  %v6808_v20 = vmul.f32 %v10960_v59, %v10960_v59 }
 0x6c9   : > { %v6705_v1 = vpop.f32.mrb[2].mxu1  ;;  %v6809_v9 = vmul.f32 %v10962_v30, %v10962_v30 }
 0x6ca   : > { %v6706_v60 = vpop.f32.mrb[3].mxu1 }
 0x6cf   : > { %v10964_v31 = vpop.f32.mrb[4].mxu1 }
 0x6d0   : > { %v6780_v34 = vadd.f32 %v10964_v31, %v10960_v59  ;;  %v6810_v7 = vmul.f32 %v10964_v31, %v10964_v31  ;;  %v10972_v4 = vpop.f32.mrb[5].mxu1 }
 0x6d1   : > { %v6793_v11 = vadd.f32 %v10972_v4, %v10962_v30  ;;  %v6811_v8 = vmul.f32 %v10972_v4, %v10972_v4  ;;  %v6713_v52 = vpop.f32.mrb[6].mxu1 }
 0x6d2   : > { %v6824_v27 = vadd.f32 %v6810_v7, %v6808_v20  ;;  %v6714_v47 = vpop.f32.mrb[7].mxu1 }
 0x6d3   : > { %v6837_v57 = vadd.f32 %v6811_v8, %v6809_v9 }
 0x6d7   : > { %v10980_v19 = vpop.f32.mrb[8].mxu1 }
 0x6d8   : > { %v6781_v35 = vadd.f32 %v6780_v34, %v10980_v19  ;;  %v6812_v25 = vmul.f32 %v10980_v19, %v10980_v19  ;;  %v10985_v21 = vpop.f32.mrb[9].mxu1 }
 0x6d9   : > { %v6794_v43 = vadd.f32 %v6793_v11, %v10985_v21  ;;  %v6813_v22 = vmul.f32 %v10985_v21, %v10985_v21  ;;  %v6721_v46 = vpop.f32.mrb[10].mxu1 }
 0x6da   : > { %v6825_v42 = vadd.f32 %v6824_v27, %v6812_v25  ;;  %v6722_v18 = vpop.f32.mrb[11].mxu1 }
 0x6db   : > { %v6838_v15 = vadd.f32 %v6837_v57, %v6813_v22 }
 0x6df   : > { %v10990_v58 = vpop.f32.mrb[12].mxu1 }
 0x6e0   : > { %v6782_v28 = vadd.f32 %v6781_v35, %v10990_v58  ;;  %v6814_v14 = vmul.f32 %v10990_v58, %v10990_v58  ;;  %v10995_v0 = vpop.f32.mrb[13].mxu1 }
 0x6e1   : > { %v6795_v56 = vadd.f32 %v6794_v43, %v10995_v0  ;;  %v6815_v17 = vmul.f32 %v10995_v0, %v10995_v0  ;;  %v6729_v3 = vpop.f32.mrb[14].mxu1 }
 0x6e2   : > { %v6826_v44 = vadd.f32 %v6825_v42, %v6814_v14  ;;  %v6730_v32 = vpop.f32.mrb[15].mxu1 }
 0x6e3   : > { %v6839_v37 = vadd.f32 %v6838_v15, %v6815_v17 }
 0x6e7   : > { %v11000_v29 = vpop.f32.mrb[16].mxu1 }
 0x6e8   : > { %v6783_v48 = vadd.f32 %v6782_v28, %v11000_v29  ;;  %v6816_v16 = vmul.f32 %v11000_v29, %v11000_v29  ;;  %v11005_v54 = vpop.f32.mrb[17].mxu1 }
 0x6e9   : > { %v6796_v38 = vadd.f32 %v6795_v56, %v11005_v54  ;;  %v6817_v6 = vmul.f32 %v11005_v54, %v11005_v54  ;;  %v6737_v50 = vpop.f32.mrb[18].mxu1 }
 0x6ea   : > { %v6827_v24 = vadd.f32 %v6826_v44, %v6816_v16  ;;  %v6738_v62 = vpop.f32.mrb[19].mxu1 }
 0x6eb   : > { %v6840_v5 = vadd.f32 %v6839_v37, %v6817_v6 }
 0x6ef   : > { %v11010_v51 = vpop.f32.mrb[20].mxu1 }
 0x6f0   : > { %v6784_v13 = vadd.f32 %v6783_v48, %v11010_v51  ;;  %v6818_v40 = vmul.f32 %v11010_v51, %v11010_v51  ;;  %v11015_v10 = vpop.f32.mrb[21].mxu1 }
 0x6f1   : > { %v6797_v33 = vadd.f32 %v6796_v38, %v11015_v10  ;;  %v6819_v12 = vmul.f32 %v11015_v10, %v11015_v10  ;;  %v6745_v45 = vpop.f32.mrb[22].mxu1 }
 0x6f2   : > { %v6828_v49 = vadd.f32 %v6827_v24, %v6818_v40  ;;  %v6746_v61 = vpop.f32.mrb[23].mxu1 }
 0x6f3   : > { %v6841_v2 = vadd.f32 %v6840_v5, %v6819_v12 }
 0x6f7   : > { %v11020_v55 = vpop.f32.mrb[24].mxu1 }
 0x6f8   : > { %v6785_v39 = vadd.f32 %v6784_v13, %v11020_v55  ;;  %v6820_v41 = vmul.f32 %v11020_v55, %v11020_v55  ;;  %v11025_v36 = vpop.f32.mrb[25].mxu1 }
 0x6f9   : > { %v6798_v23 = vadd.f32 %v6797_v33, %v11025_v36  ;;  %v6821_v53 = vmul.f32 %v11025_v36, %v11025_v36  ;;  %v6753_v63 = vpop.f32.mrb[26].mxu1 }
 0x6fa   : > { %v6829_v26 = vadd.f32 %v6828_v49, %v6820_v41  ;;  %v6754_v1 = vpop.f32.mrb[27].mxu1 }
 0x6fb   : > { %v6842_v60 = vadd.f32 %v6841_v2, %v6821_v53 }
 0x6ff   : > { %v11030_v20 = vpop.f32.mrb[28].mxu1 }
 0x700   : > { %v6786_v34 = vadd.f32 %v6785_v39, %v11030_v20  ;;  %v6822_v7 = vmul.f32 %v11030_v20, %v11030_v20  ;;  %v11035_v9 = vpop.f32.mrb[29].mxu1 }
 0x701   : > { %v6799_v11 = vadd.f32 %v6798_v23, %v11035_v9  ;;  %v6823_v8 = vmul.f32 %v11035_v9, %v11035_v9  ;;  %v6761_v52 = vpop.f32.mrb[30].mxu1 }
 0x702   : > { %v6787_v27 = vrot.slane %v6786_v34, 4  ;;  %v6830_v47 = vadd.f32 %v6829_v26, %v6822_v7  ;;  %v6762_v57 = vpop.f32.mrb[31].mxu1  ;;  %v9180_v52 = vld [vmem:[%s9563_s30] sm:$0xff] }
 0x703   : > { %v6800_v35 = vrot.slane %v6799_v11, 4  ;;  %v6843_v25 = vadd.f32 %v6842_v60, %v6823_v8 }
 0x704   : > { %v6788_v43 = vadd.f32 %v6787_v27, %v6786_v34  ;;  %v6831_v22 = vrot.slane %v6830_v47, 4 }
 0x705   : > { %v6801_v46 = vadd.f32 %v6800_v35, %v6799_v11  ;;  %v6844_v42 = vrot.slane %v6843_v25, 4  ;;  %v9182_v35 = vld [vmem:[%s9563_s30 + $0x20] sm:$0xff] }
 0x706   : > { %v6789_v18 = vrot.slane %v6788_v43, 2  ;;  %v6832_v15 = vadd.f32 %v6831_v22, %v6830_v47  ;;  %v9181_v47 = vld [vmem:[%s9563_s30 + $0x10] sm:$0xff] }
 0x707   : > { %v6802_v28 = vrot.slane %v6801_v46, 2  ;;  %v6845_v14 = vadd.f32 %v6844_v42, %v6843_v25 }
 0x708   : > { %v6790_v56 = vadd.f32 %v6789_v18, %v6788_v43  ;;  %v6833_v17 = vrot.slane %v6832_v15, 2  ;;  %v9183_v43 = vld [vmem:[%s9563_s30 + $0x30] sm:$0xff] }
 0x709   : > { %v6803_v3 = vadd.f32 %v6802_v28, %v6801_v46  ;;  %v6846_v44 = vrot.slane %v6845_v14, 2  ;;  %v9184_v46 = vld [vmem:[%s9563_s30 + $0x40] sm:$0xff]  ;;  %v9185_v18 = vld [vmem:[%s9563_s30 + $0x50] sm:$0xff] }
 0x70a   : > { %v6791_v32 = vrot.slane %v6790_v56, 1  ;;  %v6834_v37 = vadd.f32 %v6833_v17, %v6832_v15  ;;  %v9186_v28 = vld [vmem:[%s9563_s30 + $0x60] sm:$0xff] }
 0x70b   : > { %v6804_v48 = vrot.slane %v6803_v3, 1  ;;  %v6847_v16 = vadd.f32 %v6846_v44, %v6845_v14 }
 0x70c   : > { %v6792_v38 = vadd.f32 %v6791_v32, %v6790_v56  ;;  %v6835_v6 = vrot.slane %v6834_v37, 1  ;;  %v9187_v56 = vld [vmem:[%s9563_s30 + $0x70] sm:$0xff] }
 0x70d   : > { %v6805_v50 = vadd.f32 %v6804_v48, %v6803_v3  ;;  %v6848_v24 = vrot.slane %v6847_v16, 1 }
 0x70e   : > { %v6806_v62 = vmul.f32 0.015625, %v6792_v38  ;;  %v6836_v5 = vadd.f32 %v6835_v6, %v6834_v37 }
 0x70f   : > { %v11040_v13 = vmul.f32 0.015625, %v6805_v50  ;;  %v6849_v40 = vadd.f32 %v6848_v24, %v6847_v16  ;;  %v9188_v50 = vld [vmem:[%s9563_s30 + $0x8] sm:$0xff] }
 0x710   : > { %v6850_v33 = vmul.f32 0.015625, %v6836_v5  ;;  %v6852_v12 = vsub.f32 %v10960_v59, %v6806_v62  ;;  %v6854_v45 = vsub.f32 %v10964_v31, %v6806_v62  ;;  %v6856_v49 = vsub.f32 %v10980_v19, %v6806_v62 }
 0x711   : > { %v6858_v61 = vsub.f32 %v10990_v58, %v6806_v62  ;;  %v6860_v2 = vsub.f32 %v11000_v29, %v6806_v62  ;;  %v6862_v39 = vsub.f32 %v11010_v51, %v6806_v62  ;;  %v6864_v41 = vsub.f32 %v11020_v55, %v6806_v62 }
 0x712   : > { %v6866_v23 = vsub.f32 %v11030_v20, %v6806_v62  ;;  %v6868_v53 = vmul.f32 %v6806_v62, %v6806_v62  ;;  %v6851_v63 = vmul.f32 0.015625, %v6849_v40  ;;  %v6853_v26 = vsub.f32 %v10962_v30, %v11040_v13  ;;  %v9189_v62 = vld [vmem:[%s9563_s30 + $0x18] sm:$0xff] }
 0x713   : > { %v6855_v59 = vsub.f32 %v10972_v4, %v11040_v13  ;;  %v6857_v31 = vsub.f32 %v10985_v21, %v11040_v13  ;;  %v6859_v19 = vsub.f32 %v10995_v0, %v11040_v13  ;;  %v6861_v58 = vsub.f32 %v11005_v54, %v11040_v13 }
 0x714   : > { %v6870_v29 = vsub.f32 %v6850_v33, %v6868_v53  ;;  %v6863_v51 = vsub.f32 %v11015_v10, %v11040_v13  ;;  %v6865_v55 = vsub.f32 %v11025_v36, %v11040_v13  ;;  %v6867_v30 = vsub.f32 %v11035_v9, %v11040_v13  ;;  %v9191_v33 = vld [vmem:[%s9563_s30 + $0x38] sm:$0xff] }
 0x715   : > { %v6869_v4 = vmul.f32 %v11040_v13, %v11040_v13  ;;  %v9190_v13 = vld [vmem:[%s9563_s30 + $0x28] sm:$0xff] }
 0x716   : > { %v6872_v21 = vadd.f32 1e-05, %v6870_v29 }
 0x717   : > { %v6871_v1 = vsub.f32 %v6851_v63, %v6869_v4 }
 0x718   : > { %9176 = vrsqrt.f32 %v6872_v21 }
 0x719   : > { %v6873_v0 = vadd.f32 1e-05, %v6871_v1 }
 0x71b   : > { %9178 = vrsqrt.f32 %v6873_v0 }
 0x722   : > { %v9177_v54 = vpop.eup %9176 }
 0x723   : > { %v6876_v10 = vmul.f32 %v9177_v54, %v6852_v12  ;;  %v6878_v60 = vmul.f32 %v9177_v54, %v6854_v45  ;;  %v6880_v36 = vmul.f32 %v9177_v54, %v6856_v49  ;;  %v6882_v20 = vmul.f32 %v9177_v54, %v6858_v61  ;;  %v9192_v45 = vld [vmem:[%s9563_s30 + $0x48] sm:$0xff]  ;;  %v9193_v61 = vld [vmem:[%s9563_s30 + $0x58] sm:$0xff] }
 0x724   : > { %v6884_v34 = vmul.f32 %v9177_v54, %v6860_v2  ;;  %v6886_v7 = vmul.f32 %v9177_v54, %v6862_v39  ;;  %v6888_v9 = vmul.f32 %v9177_v54, %v6864_v41  ;;  %v6890_v11 = vmul.f32 %v9177_v54, %v6866_v23  ;;  %v9194_v39 = vld [vmem:[%s9563_s30 + $0x68] sm:$0xff]  ;;  %v9195_v23 = vld [vmem:[%s9563_s30 + $0x78] sm:$0xff] }
 0x725   : > { %v9179_v8 = vpop.eup %9178  ;;  %v6892_v27 = vadd.f32 %v9180_v52, %v6876_v10  ;;  %v6894_v57 = vadd.f32 %v9181_v47, %v6878_v60  ;;  %v6896_v25 = vadd.f32 %v9182_v35, %v6880_v36  ;;  %v6898_v22 = vadd.f32 %v9183_v43, %v6882_v20 }
 0x726   : > { %v6900_v42 = vadd.f32 %v9184_v46, %v6884_v34  ;;  %v6902_v15 = vadd.f32 %v9185_v18, %v6886_v7  ;;  %v6904_v14 = vadd.f32 %v9186_v28, %v6888_v9  ;;  %v6906_v17 = vadd.f32 %v9187_v56, %v6890_v11 }
 0x727   : > { %6908 = vst [vmem:[%s11079_s20] sm:$0xff] %v6892_v27  ;;  %6910 = vst [vmem:[%s11079_s20 + $0x10] sm:$0xff] %v6894_v57  ;;  %v6877_v3 = vmul.f32 %v9179_v8, %v6853_v26  ;;  %v6879_v44 = vmul.f32 %v9179_v8, %v6855_v59  ;;  %v6881_v32 = vmul.f32 %v9179_v8, %v6857_v31 }
 0x728   : > { %6912 = vst [vmem:[%s11079_s20 + $0x20] sm:$0xff] %v6896_v25  ;;  %6914 = vst [vmem:[%s11079_s20 + $0x30] sm:$0xff] %v6898_v22  ;;  %v6883_v37 = vmul.f32 %v9179_v8, %v6859_v19  ;;  %v6885_v48 = vmul.f32 %v9179_v8, %v6861_v58  ;;  %v6887_v16 = vmul.f32 %v9179_v8, %v6863_v51 }
 0x729   : > { %6916 = vst [vmem:[%s11079_s20 + $0x40] sm:$0xff] %v6900_v42  ;;  %6918 = vst [vmem:[%s11079_s20 + $0x50] sm:$0xff] %v6902_v15  ;;  %v6889_v38 = vmul.f32 %v9179_v8, %v6865_v55  ;;  %v6891_v6 = vmul.f32 %v9179_v8, %v6867_v30  ;;  %v6893_v24 = vadd.f32 %v9188_v50, %v6877_v3 }
 0x72a   : > { %6920 = vst [vmem:[%s11079_s20 + $0x60] sm:$0xff] %v6904_v14  ;;  %6922 = vst [vmem:[%s11079_s20 + $0x70] sm:$0xff] %v6906_v17  ;;  %v6895_v5 = vadd.f32 %v9189_v62, %v6879_v44  ;;  %v6897_v40 = vadd.f32 %v9190_v13, %v6881_v32  ;;  %v6899_v12 = vadd.f32 %v9191_v33, %v6883_v37 }
 0x72b   : > { %v6901_v49 = vadd.f32 %v9192_v45, %v6885_v48  ;;  %v6903_v2 = vadd.f32 %v9193_v61, %v6887_v16  ;;  %v6905_v41 = vadd.f32 %v9194_v39, %v6889_v38  ;;  %v6907_v53 = vadd.f32 %v9195_v23, %v6891_v6  ;;  %6909 = vst [vmem:[%s11079_s20 + $0x8] sm:$0xff] %v6893_v24 }
 0x72c   : > { %6911 = vst [vmem:[%s11079_s20 + $0x18] sm:$0xff] %v6895_v5  ;;  %6913 = vst [vmem:[%s11079_s20 + $0x28] sm:$0xff] %v6897_v40 }
 0x72d   : > { %6915 = vst [vmem:[%s11079_s20 + $0x38] sm:$0xff] %v6899_v12  ;;  %6917 = vst [vmem:[%s11079_s20 + $0x48] sm:$0xff] %v6901_v49 }
 0x72e   : > { %6919 = vst [vmem:[%s11079_s20 + $0x58] sm:$0xff] %v6903_v2  ;;  %6921 = vst [vmem:[%s11079_s20 + $0x68] sm:$0xff] %v6905_v41 }
 0x72f   : > { %6923 = vst [vmem:[%s11079_s20 + $0x78] sm:$0xff] %v6907_v53 }
 0x730   : > { %9295 = shalt.err (!%p9292_p2)
}
 0x731   : > { %s9296_s25 = scalar_lea.hbm %s11097_s26, 2048  ;;  %s9300_s21 = scalar_lea.hbm %s11158_s3, 4096 }
 0x732   : > { %p9297_p13 = scmp.ne.s32.totalorder %s11097_s26, %s9296_s25  ;;  %p9301_p4 = scmp.lt.u32.totalorder %s11097_s26, %s11158_s3 }
 0x733   : > { %p9302_p5 = scmp.lt.u32.totalorder %s9300_s21, %s9296_s25  ;;  %p9304_p11 = scmp.lt.u32.totalorder %s9296_s25, %s11097_s26 }
 0x734   : > { %p9298_p6 = pnand %p9297_p13, %p11197_p0 }
 0x735   : > { %p9303_p8 = por %p9302_p5, %p9301_p4 }
 0x736   : > { %p9299_p10 = pneg %p9298_p6 }
 0x737   : > { %p9305_p1 = por %p9304_p11, %p9303_p8 }
 0x739   : > { %p9306_p3 = pnand %p9305_p1, %p9299_p10 }
 0x73b   : > { %9309 = shalt.err (!%p9306_p3)
}
 0x73c   : > { %s9363_s30 = smov 256   ;;  %s9364_s18 = smov 16  }
 0x73d   : > { %8244 = dma.vmem_to_hbm [thread:$0]  (%p11197_p0), %s11099_s17, 2048, %s11097_s26, %s6925_s27, %s9363_s30, %s9363_s30, %s9364_s18  }
 0x73e PF: > { %s6953_s20 = sand.u32 1, %s9340_s12   ;;  %p11198_p7 = scmp.ne.s32.totalorder %s11173_s19, 0 }
 0x73f   : > { %p11199_p9 = scmp.ge.s32.totalorder %s9352_s15, 2  ;;  %s6954_s16 = scalar_lea.sflag [#allocation4], %s6953_s20 }
 0x741   : > { %p8258_p12 = pnand %p11199_p9, %p11198_p7 }
 0x743   : > { %9335 = dma.done.wait (!%p8258_p12), %s6954_s16, 2048  }
 0x744   : > { %9337 = vsyncadd (!%p8258_p12), %s6954_s16, 4294965248  ;;  %p17_p2 = scmp.ge.s32.totalorder %s9495_s4, 4   ;;  %s11200_s12 = smov %s9344_s13 }
 0x745   : > { %s11201_s13 = smov %s9348_s14  ;;  %s11202_s14 = smov %s9511_s9 }
 0x746   : > { %s11203_s15 = smov %s9495_s4  ;;  %19 = sbr.rel (!%p17_p2) target bundleno = 6 (0x6), region = 101 }
 0x74d   :  { %6959 = vsyncpa [#allocation3], 1 }
 0x74e   :  { %6961 = vsyncpa [#allocation3 + $0x1], 1 }
 0x74f   :  { %6962 = vsyncpa [#allocation6], 1 }
 0x750   :  { %6963 = vsyncpa [#allocation4], 1 }
 0x751   :  { %6965 = vsyncpa [#allocation4 + $0x1], 1 }

</bundles_post_ra>
